<compile_context>
chip_gen: v5e
topology: v5e:2x2
jax: 0.10.0
libtpu: 0.0.40
codegen_flags: <defaults>
</compile_context>

<pallas_src>
import jax
import jax.numpy as jnp
from jax import lax
from jax.experimental import pallas as pl
from jax.experimental.pallas import tpu as pltpu
import numpy as np

# ----- shapes (small, consistent with the module) -----
IN_SIZE = (1, 1, 22, 22, 22)          # (N, C, D, H, W)
OUT_DIM = 4                           # output_dimensions
KD = KH = KW = 3                      # Conv3d(1, 1, 3)
POOL = 10                             # MaxPool3d(10), stride 10
D, H, W = IN_SIZE[2:]
CD, CH, CW = D - KD + 1, H - KH + 1, W - KW + 1          # conv output: 20,20,20
PD, PH, PW = CD // POOL, CH // POOL, CW // POOL          # pooled: 2,2,2
N_FEAT = PD * PH * PW                                    # 8 features into Linear
LANES_IN = D * W                                         # 484: packed lane index = d*W + w
L_OUT = (CD - 1) * W + CW                                # 438: last valid output lane + 1
# taps read lanes up to (L_OUT-1) + (KD-1)*W + (KW-1) = 483 < 484  (always in-bounds)


def _build_pool_masks() -> np.ndarray:
    """0/1 lane masks; row m = pd*PW + pw selects lanes d*W+w inside that pool window."""
    m = np.zeros((PD * PW, L_OUT), np.float32)
    for pd in range(PD):
        for pw in range(PW):
            for d in range(pd * POOL, (pd + 1) * POOL):
                for w in range(pw * POOL, (pw + 1) * POOL):
                    m[pd * PW + pw, d * W + w] = 1.0
    return m


_POOL_MASKS = _build_pool_masks()


def cnn_kernel(x_ref, mask_ref, cw_ref, cb_ref, lwT_ref, lb_ref, o_ref):
    """x_ref: (H, D*W) lane-packed volume, packed[h, d*W+w] = x[d,h,w] (VMEM);
    mask_ref: (PD*PW, L_OUT) 0/1 pool lane masks (VMEM); cw_ref: (27,) SMEM;
    cb_ref: (1,) SMEM; lwT_ref: (N_FEAT, OUT_DIM) VMEM; lb_ref: (1, OUT_DIM) VMEM;
    o_ref: (1, OUT_DIM) VMEM."""
    # Hoist the 27 conv weights (SMEM scalar reads); each is used exactly once below.
    ws = [cw_ref[i] for i in range(KD * KH * KW)]

    # ---- Conv3d(1,1,3) as 27 whole-slab shifted FMAs on the lane-packed layout ----
    # acc[h, d*W + w] = sum_{kd,kh,kw} w[kd,kh,kw] * x[d+kd, h+kh, w+kw]
    # (lanes with w >= CW or d >= CD hold cross-boundary junk; they are never selected
    #  by the pool masks below.)
    acc = None
    for kh in range(KH):
        xh = x_ref[pl.ds(kh, CH), :]                  # (CH, D*W) sublane-shifted slab (hoisted)
        part = None                                   # per-kh partial -> short acc dep-chain
        for kd in range(KD):
            base = kd * W
            for kw in range(KW):
                w_s = ws[kd * KH * KW + kh * KW + kw]                 # scalar, used once
                term = w_s * xh[:, base + kw: base + kw + L_OUT]      # (CH, L_OUT) lane window
                part = term if part is None else part + term
        acc = part if acc is None else acc + part     # (CH, L_OUT)

    # ---- pool over output height (two 10-row sublane maxes), then fold bias + ReLU ----
    cb = cb_ref[0]
    act = [
        jnp.maximum(
            jnp.max(acc[ph * POOL:(ph + 1) * POOL, :], axis=0, keepdims=True) + cb, 0.0)
        for ph in range(PH)
    ]                                                  # PH x (1, L_OUT), all values >= 0

    # ---- pool over (depth, width) via 0/1 lane masks + Linear, accumulated onto (1, OUT_DIM) ----
    masks = mask_ref[...]                              # (PD*PW, L_OUT)
    lwT = lwT_ref[...]                                 # (N_FEAT, OUT_DIM)
    out = lb_ref[...]                                  # (1, OUT_DIM)
    for k in range(N_FEAT):                            # torch flatten order (pd, ph, pw)
        pd, rem = divmod(k, PH * PW)
        ph, pw = divmod(rem, PW)
        m = pd * PW + pw
        # mask-multiply is safe: act >= 0, so masked-out lanes (0.0) never win the max
        feat = jnp.max(act[ph] * masks[m:m + 1, :], axis=1, keepdims=True)   # (1, 1)
        out = out + feat * lwT[k:k + 1, :]
    o_ref[...] = out


@jax.jit
def torch_cnn_forward(x, conv_w, conv_b, lin_w, lin_b):
    """x: any shape with numel == prod(IN_SIZE) (mirrors x.view(in_size)).
    All prep (view, lane-pack transpose, casts) is fused under this jit with the pallas_call."""
    x3 = x.reshape(IN_SIZE).reshape(D, H, W).astype(jnp.float32)
    xp = jnp.transpose(x3, (1, 0, 2)).reshape(H, D * W)   # packed[h, d*W + w] = x[d, h, w]
    cw_flat = conv_w.reshape(-1).astype(jnp.float32)      # (27,)
    cb = conv_b.reshape(1).astype(jnp.float32)            # (1,)
    lwT = lin_w.T.astype(jnp.float32)                     # (N_FEAT, OUT_DIM)
    lb = lin_b.reshape(1, OUT_DIM).astype(jnp.float32)    # (1, OUT_DIM)
    masks = jnp.asarray(_POOL_MASKS)                      # (PD*PW, L_OUT) constant under jit

    # Single sample by construction (the module views its input to in_size with N=1),
    # so no grid / batch axis; all (tiny, <1 MiB) operands live in VMEM/SMEM for one call.
    return pl.pallas_call(
        cnn_kernel,
        out_shape=jax.ShapeDtypeStruct((1, OUT_DIM), jnp.float32),
        in_specs=[
            pl.BlockSpec(memory_space=pltpu.MemorySpace.VMEM),  # lane-packed volume
            pl.BlockSpec(memory_space=pltpu.MemorySpace.VMEM),  # pool lane masks
            pl.BlockSpec(memory_space=pltpu.MemorySpace.SMEM),  # conv weights (flat)
            pl.BlockSpec(memory_space=pltpu.MemorySpace.SMEM),  # conv bias
            pl.BlockSpec(memory_space=pltpu.MemorySpace.VMEM),  # linear weight^T
            pl.BlockSpec(memory_space=pltpu.MemorySpace.VMEM),  # linear bias
        ],
        out_specs=pl.BlockSpec(memory_space=pltpu.MemorySpace.VMEM),
    )(xp, masks, cw_flat, cb, lwT, lb)


def reference_forward(x, conv_w, conv_b, lin_w, lin_b):
    """Pure-JAX reference matching torch semantics (NCDHW)."""
    x5 = x.reshape(IN_SIZE).astype(jnp.float32)
    conv = lax.conv_general_dilated(
        x5, conv_w.astype(jnp.float32),
        window_strides=(1, 1, 1), padding="VALID",
        dimension_numbers=("NCDHW", "OIDHW", "NCDHW"),
    ) + conv_b.reshape(1, 1, 1, 1, 1)
    act = jnp.maximum(conv, 0.0)
    pooled = lax.reduce_window(
        act, -jnp.inf, lax.max,
        window_dimensions=(1, 1, POOL, POOL, POOL),
        window_strides=(1, 1, POOL, POOL, POOL),
        padding="VALID",
    )
    flat = pooled.reshape(1, -1)
    return flat @ lin_w.T + lin_b[None, :]


if __name__ == "__main__":
    key = jax.random.PRNGKey(0)
    k1, k2, k3, k4, k5 = jax.random.split(key, 5)

    # deterministic synthetic parameters (shapes from torch_CNN.__init__)
    conv_w = jax.random.normal(k1, (1, 1, KD, KH, KW), jnp.float32) * 0.1
    conv_b = jax.random.normal(k2, (1,), jnp.float32) * 0.1
    lin_w = jax.random.normal(k3, (OUT_DIM, N_FEAT), jnp.float32) * 0.1
    lin_b = jax.random.normal(k4, (OUT_DIM,), jnp.float32) * 0.1

    # example input (any shape with matching numel; forward views it to in_size)
    x = jax.random.normal(k5, IN_SIZE, jnp.float32)

    out = torch_cnn_forward(x, conv_w, conv_b, lin_w, lin_b)
    out = jax.block_until_ready(out)

    ref = jax.block_until_ready(reference_forward(x, conv_w, conv_b, lin_w, lin_b))
    np.testing.assert_allclose(np.asarray(out), np.asarray(ref), rtol=1e-4, atol=1e-5)

    print("KERNEL_OK")
</pallas_src>

<mosaic_0001>
module attributes {stable_mosaic.version = 11 : i64} {
  func.func @cnn_kernel(%arg0: memref<22x484xf32, #tpu.memory_space<vmem>>, %arg1: memref<4x438xf32, #tpu.memory_space<vmem>>, %arg2: memref<27xf32, #tpu.memory_space<smem>>, %arg3: memref<1xf32, #tpu.memory_space<smem>>, %arg4: memref<8x4xf32, #tpu.memory_space<vmem>>, %arg5: memref<1x4xf32, #tpu.memory_space<vmem>>, %arg6: memref<1x4xf32, #tpu.memory_space<vmem>>) attributes {dimension_semantics = [], scalar_prefetch = 0 : i64, scratch_operands = 0 : i64, tpu.core_type = #tpu.core_type<tc>} {
    %c0 = arith.constant 0 : index
    %0 = memref.load %arg2[%c0] : memref<27xf32, #tpu.memory_space<smem>>
    %c1 = arith.constant 1 : index
    %1 = memref.load %arg2[%c1] : memref<27xf32, #tpu.memory_space<smem>>
    %c2 = arith.constant 2 : index
    %2 = memref.load %arg2[%c2] : memref<27xf32, #tpu.memory_space<smem>>
    %c3 = arith.constant 3 : index
    %3 = memref.load %arg2[%c3] : memref<27xf32, #tpu.memory_space<smem>>
    %c4 = arith.constant 4 : index
    %4 = memref.load %arg2[%c4] : memref<27xf32, #tpu.memory_space<smem>>
    %c5 = arith.constant 5 : index
    %5 = memref.load %arg2[%c5] : memref<27xf32, #tpu.memory_space<smem>>
    %c6 = arith.constant 6 : index
    %6 = memref.load %arg2[%c6] : memref<27xf32, #tpu.memory_space<smem>>
    %c7 = arith.constant 7 : index
    %7 = memref.load %arg2[%c7] : memref<27xf32, #tpu.memory_space<smem>>
    %c8 = arith.constant 8 : index
    %8 = memref.load %arg2[%c8] : memref<27xf32, #tpu.memory_space<smem>>
    %c9 = arith.constant 9 : index
    %9 = memref.load %arg2[%c9] : memref<27xf32, #tpu.memory_space<smem>>
    %c10 = arith.constant 10 : index
    %10 = memref.load %arg2[%c10] : memref<27xf32, #tpu.memory_space<smem>>
    %c11 = arith.constant 11 : index
    %11 = memref.load %arg2[%c11] : memref<27xf32, #tpu.memory_space<smem>>
    %c12 = arith.constant 12 : index
    %12 = memref.load %arg2[%c12] : memref<27xf32, #tpu.memory_space<smem>>
    %c13 = arith.constant 13 : index
    %13 = memref.load %arg2[%c13] : memref<27xf32, #tpu.memory_space<smem>>
    %c14 = arith.constant 14 : index
    %14 = memref.load %arg2[%c14] : memref<27xf32, #tpu.memory_space<smem>>
    %c15 = arith.constant 15 : index
    %15 = memref.load %arg2[%c15] : memref<27xf32, #tpu.memory_space<smem>>
    %c16 = arith.constant 16 : index
    %16 = memref.load %arg2[%c16] : memref<27xf32, #tpu.memory_space<smem>>
    %c17 = arith.constant 17 : index
    %17 = memref.load %arg2[%c17] : memref<27xf32, #tpu.memory_space<smem>>
    %c18 = arith.constant 18 : index
    %18 = memref.load %arg2[%c18] : memref<27xf32, #tpu.memory_space<smem>>
    %c19 = arith.constant 19 : index
    %19 = memref.load %arg2[%c19] : memref<27xf32, #tpu.memory_space<smem>>
    %c20 = arith.constant 20 : index
    %20 = memref.load %arg2[%c20] : memref<27xf32, #tpu.memory_space<smem>>
    %c21 = arith.constant 21 : index
    %21 = memref.load %arg2[%c21] : memref<27xf32, #tpu.memory_space<smem>>
    %c22 = arith.constant 22 : index
    %22 = memref.load %arg2[%c22] : memref<27xf32, #tpu.memory_space<smem>>
    %c23 = arith.constant 23 : index
    %23 = memref.load %arg2[%c23] : memref<27xf32, #tpu.memory_space<smem>>
    %c24 = arith.constant 24 : index
    %24 = memref.load %arg2[%c24] : memref<27xf32, #tpu.memory_space<smem>>
    %c25 = arith.constant 25 : index
    %25 = memref.load %arg2[%c25] : memref<27xf32, #tpu.memory_space<smem>>
    %c26 = arith.constant 26 : index
    %26 = memref.load %arg2[%c26] : memref<27xf32, #tpu.memory_space<smem>>
    %c0_0 = arith.constant 0 : index
    %c0_1 = arith.constant 0 : index
    %27 = vector.load %arg0[%c0_0, %c0_1] : memref<22x484xf32, #tpu.memory_space<vmem>>, vector<20x484xf32>
    %28 = vector.extract_strided_slice %27 {offsets = [0, 0], sizes = [20, 438], strides = [1, 1]} : vector<20x484xf32> to vector<20x438xf32>
    %29 = vector.broadcast %0 : f32 to vector<20x438xf32>
    %30 = arith.mulf %29, %28 : vector<20x438xf32>
    %31 = vector.extract_strided_slice %27 {offsets = [0, 1], sizes = [20, 438], strides = [1, 1]} : vector<20x484xf32> to vector<20x438xf32>
    %32 = vector.broadcast %1 : f32 to vector<20x438xf32>
    %33 = arith.mulf %32, %31 : vector<20x438xf32>
    %34 = arith.addf %30, %33 : vector<20x438xf32>
    %35 = vector.extract_strided_slice %27 {offsets = [0, 2], sizes = [20, 438], strides = [1, 1]} : vector<20x484xf32> to vector<20x438xf32>
    %36 = vector.broadcast %2 : f32 to vector<20x438xf32>
    %37 = arith.mulf %36, %35 : vector<20x438xf32>
    %38 = arith.addf %34, %37 : vector<20x438xf32>
    %39 = vector.extract_strided_slice %27 {offsets = [0, 22], sizes = [20, 438], strides = [1, 1]} : vector<20x484xf32> to vector<20x438xf32>
    %40 = vector.broadcast %9 : f32 to vector<20x438xf32>
    %41 = arith.mulf %40, %39 : vector<20x438xf32>
    %42 = arith.addf %38, %41 : vector<20x438xf32>
    %43 = vector.extract_strided_slice %27 {offsets = [0, 23], sizes = [20, 438], strides = [1, 1]} : vector<20x484xf32> to vector<20x438xf32>
    %44 = vector.broadcast %10 : f32 to vector<20x438xf32>
    %45 = arith.mulf %44, %43 : vector<20x438xf32>
    %46 = arith.addf %42, %45 : vector<20x438xf32>
    %47 = vector.extract_strided_slice %27 {offsets = [0, 24], sizes = [20, 438], strides = [1, 1]} : vector<20x484xf32> to vector<20x438xf32>
    %48 = vector.broadcast %11 : f32 to vector<20x438xf32>
    %49 = arith.mulf %48, %47 : vector<20x438xf32>
    %50 = arith.addf %46, %49 : vector<20x438xf32>
    %51 = vector.extract_strided_slice %27 {offsets = [0, 44], sizes = [20, 438], strides = [1, 1]} : vector<20x484xf32> to vector<20x438xf32>
    %52 = vector.broadcast %18 : f32 to vector<20x438xf32>
    %53 = arith.mulf %52, %51 : vector<20x438xf32>
    %54 = arith.addf %50, %53 : vector<20x438xf32>
    %55 = vector.extract_strided_slice %27 {offsets = [0, 45], sizes = [20, 438], strides = [1, 1]} : vector<20x484xf32> to vector<20x438xf32>
    %56 = vector.broadcast %19 : f32 to vector<20x438xf32>
    %57 = arith.mulf %56, %55 : vector<20x438xf32>
    %58 = arith.addf %54, %57 : vector<20x438xf32>
    %59 = vector.extract_strided_slice %27 {offsets = [0, 46], sizes = [20, 438], strides = [1, 1]} : vector<20x484xf32> to vector<20x438xf32>
    %60 = vector.broadcast %20 : f32 to vector<20x438xf32>
    %61 = arith.mulf %60, %59 : vector<20x438xf32>
    %62 = arith.addf %58, %61 : vector<20x438xf32>
    %c1_2 = arith.constant 1 : index
    %c0_3 = arith.constant 0 : index
    %63 = vector.load %arg0[%c1_2, %c0_3] : memref<22x484xf32, #tpu.memory_space<vmem>>, vector<20x484xf32>
    %64 = vector.extract_strided_slice %63 {offsets = [0, 0], sizes = [20, 438], strides = [1, 1]} : vector<20x484xf32> to vector<20x438xf32>
    %65 = vector.broadcast %3 : f32 to vector<20x438xf32>
    %66 = arith.mulf %65, %64 : vector<20x438xf32>
    %67 = vector.extract_strided_slice %63 {offsets = [0, 1], sizes = [20, 438], strides = [1, 1]} : vector<20x484xf32> to vector<20x438xf32>
    %68 = vector.broadcast %4 : f32 to vector<20x438xf32>
    %69 = arith.mulf %68, %67 : vector<20x438xf32>
    %70 = arith.addf %66, %69 : vector<20x438xf32>
    %71 = vector.extract_strided_slice %63 {offsets = [0, 2], sizes = [20, 438], strides = [1, 1]} : vector<20x484xf32> to vector<20x438xf32>
    %72 = vector.broadcast %5 : f32 to vector<20x438xf32>
    %73 = arith.mulf %72, %71 : vector<20x438xf32>
    %74 = arith.addf %70, %73 : vector<20x438xf32>
    %75 = vector.extract_strided_slice %63 {offsets = [0, 22], sizes = [20, 438], strides = [1, 1]} : vector<20x484xf32> to vector<20x438xf32>
    %76 = vector.broadcast %12 : f32 to vector<20x438xf32>
    %77 = arith.mulf %76, %75 : vector<20x438xf32>
    %78 = arith.addf %74, %77 : vector<20x438xf32>
    %79 = vector.extract_strided_slice %63 {offsets = [0, 23], sizes = [20, 438], strides = [1, 1]} : vector<20x484xf32> to vector<20x438xf32>
    %80 = vector.broadcast %13 : f32 to vector<20x438xf32>
    %81 = arith.mulf %80, %79 : vector<20x438xf32>
    %82 = arith.addf %78, %81 : vector<20x438xf32>
    %83 = vector.extract_strided_slice %63 {offsets = [0, 24], sizes = [20, 438], strides = [1, 1]} : vector<20x484xf32> to vector<20x438xf32>
    %84 = vector.broadcast %14 : f32 to vector<20x438xf32>
    %85 = arith.mulf %84, %83 : vector<20x438xf32>
    %86 = arith.addf %82, %85 : vector<20x438xf32>
    %87 = vector.extract_strided_slice %63 {offsets = [0, 44], sizes = [20, 438], strides = [1, 1]} : vector<20x484xf32> to vector<20x438xf32>
    %88 = vector.broadcast %21 : f32 to vector<20x438xf32>
    %89 = arith.mulf %88, %87 : vector<20x438xf32>
    %90 = arith.addf %86, %89 : vector<20x438xf32>
    %91 = vector.extract_strided_slice %63 {offsets = [0, 45], sizes = [20, 438], strides = [1, 1]} : vector<20x484xf32> to vector<20x438xf32>
    %92 = vector.broadcast %22 : f32 to vector<20x438xf32>
    %93 = arith.mulf %92, %91 : vector<20x438xf32>
    %94 = arith.addf %90, %93 : vector<20x438xf32>
    %95 = vector.extract_strided_slice %63 {offsets = [0, 46], sizes = [20, 438], strides = [1, 1]} : vector<20x484xf32> to vector<20x438xf32>
    %96 = vector.broadcast %23 : f32 to vector<20x438xf32>
    %97 = arith.mulf %96, %95 : vector<20x438xf32>
    %98 = arith.addf %94, %97 : vector<20x438xf32>
    %99 = arith.addf %62, %98 : vector<20x438xf32>
    %c2_4 = arith.constant 2 : index
    %c0_5 = arith.constant 0 : index
    %100 = vector.load %arg0[%c2_4, %c0_5] : memref<22x484xf32, #tpu.memory_space<vmem>>, vector<20x484xf32>
    %101 = vector.extract_strided_slice %100 {offsets = [0, 0], sizes = [20, 438], strides = [1, 1]} : vector<20x484xf32> to vector<20x438xf32>
    %102 = vector.broadcast %6 : f32 to vector<20x438xf32>
    %103 = arith.mulf %102, %101 : vector<20x438xf32>
    %104 = vector.extract_strided_slice %100 {offsets = [0, 1], sizes = [20, 438], strides = [1, 1]} : vector<20x484xf32> to vector<20x438xf32>
    %105 = vector.broadcast %7 : f32 to vector<20x438xf32>
    %106 = arith.mulf %105, %104 : vector<20x438xf32>
    %107 = arith.addf %103, %106 : vector<20x438xf32>
    %108 = vector.extract_strided_slice %100 {offsets = [0, 2], sizes = [20, 438], strides = [1, 1]} : vector<20x484xf32> to vector<20x438xf32>
    %109 = vector.broadcast %8 : f32 to vector<20x438xf32>
    %110 = arith.mulf %109, %108 : vector<20x438xf32>
    %111 = arith.addf %107, %110 : vector<20x438xf32>
    %112 = vector.extract_strided_slice %100 {offsets = [0, 22], sizes = [20, 438], strides = [1, 1]} : vector<20x484xf32> to vector<20x438xf32>
    %113 = vector.broadcast %15 : f32 to vector<20x438xf32>
    %114 = arith.mulf %113, %112 : vector<20x438xf32>
    %115 = arith.addf %111, %114 : vector<20x438xf32>
    %116 = vector.extract_strided_slice %100 {offsets = [0, 23], sizes = [20, 438], strides = [1, 1]} : vector<20x484xf32> to vector<20x438xf32>
    %117 = vector.broadcast %16 : f32 to vector<20x438xf32>
    %118 = arith.mulf %117, %116 : vector<20x438xf32>
    %119 = arith.addf %115, %118 : vector<20x438xf32>
    %120 = vector.extract_strided_slice %100 {offsets = [0, 24], sizes = [20, 438], strides = [1, 1]} : vector<20x484xf32> to vector<20x438xf32>
    %121 = vector.broadcast %17 : f32 to vector<20x438xf32>
    %122 = arith.mulf %121, %120 : vector<20x438xf32>
    %123 = arith.addf %119, %122 : vector<20x438xf32>
    %124 = vector.extract_strided_slice %100 {offsets = [0, 44], sizes = [20, 438], strides = [1, 1]} : vector<20x484xf32> to vector<20x438xf32>
    %125 = vector.broadcast %24 : f32 to vector<20x438xf32>
    %126 = arith.mulf %125, %124 : vector<20x438xf32>
    %127 = arith.addf %123, %126 : vector<20x438xf32>
    %128 = vector.extract_strided_slice %100 {offsets = [0, 45], sizes = [20, 438], strides = [1, 1]} : vector<20x484xf32> to vector<20x438xf32>
    %129 = vector.broadcast %25 : f32 to vector<20x438xf32>
    %130 = arith.mulf %129, %128 : vector<20x438xf32>
    %131 = arith.addf %127, %130 : vector<20x438xf32>
    %132 = vector.extract_strided_slice %100 {offsets = [0, 46], sizes = [20, 438], strides = [1, 1]} : vector<20x484xf32> to vector<20x438xf32>
    %133 = vector.broadcast %26 : f32 to vector<20x438xf32>
    %134 = arith.mulf %133, %132 : vector<20x438xf32>
    %135 = arith.addf %131, %134 : vector<20x438xf32>
    %136 = arith.addf %99, %135 : vector<20x438xf32>
    %c0_6 = arith.constant 0 : index
    %137 = memref.load %arg3[%c0_6] : memref<1xf32, #tpu.memory_space<smem>>
    %138 = vector.extract_strided_slice %136 {offsets = [0, 0], sizes = [10, 438], strides = [1, 1]} : vector<20x438xf32> to vector<10x438xf32>
    %cst = arith.constant dense<0xFF800000> : vector<438xf32>
    %139 = vector.multi_reduction <maximumf>, %138, %cst [0] : vector<10x438xf32> to vector<438xf32>
    %140 = vector.shape_cast %139 : vector<438xf32> to vector<1x438xf32>
    %141 = vector.broadcast %137 : f32 to vector<1x438xf32>
    %142 = arith.addf %140, %141 : vector<1x438xf32>
    %cst_7 = arith.constant 0.000000e+00 : f32
    %143 = vector.broadcast %cst_7 : f32 to vector<1x438xf32>
    %144 = arith.maximumf %142, %143 : vector<1x438xf32>
    %145 = vector.extract_strided_slice %136 {offsets = [10, 0], sizes = [10, 438], strides = [1, 1]} : vector<20x438xf32> to vector<10x438xf32>
    %cst_8 = arith.constant dense<0xFF800000> : vector<438xf32>
    %146 = vector.multi_reduction <maximumf>, %145, %cst_8 [0] : vector<10x438xf32> to vector<438xf32>
    %147 = vector.shape_cast %146 : vector<438xf32> to vector<1x438xf32>
    %148 = vector.broadcast %137 : f32 to vector<1x438xf32>
    %149 = arith.addf %147, %148 : vector<1x438xf32>
    %cst_9 = arith.constant 0.000000e+00 : f32
    %150 = vector.broadcast %cst_9 : f32 to vector<1x438xf32>
    %151 = arith.maximumf %149, %150 : vector<1x438xf32>
    %c0_10 = arith.constant 0 : index
    %c0_11 = arith.constant 0 : index
    %152 = vector.load %arg1[%c0_10, %c0_11] : memref<4x438xf32, #tpu.memory_space<vmem>>, vector<4x438xf32>
    %c0_12 = arith.constant 0 : index
    %c0_13 = arith.constant 0 : index
    %153 = vector.load %arg4[%c0_12, %c0_13] : memref<8x4xf32, #tpu.memory_space<vmem>>, vector<8x4xf32>
    %c0_14 = arith.constant 0 : index
    %c0_15 = arith.constant 0 : index
    %154 = vector.load %arg5[%c0_14, %c0_15] : memref<1x4xf32, #tpu.memory_space<vmem>>, vector<1x4xf32>
    %155 = vector.extract_strided_slice %152 {offsets = [0, 0], sizes = [1, 438], strides = [1, 1]} : vector<4x438xf32> to vector<1x438xf32>
    %156 = arith.mulf %144, %155 : vector<1x438xf32>
    %cst_16 = arith.constant dense<0xFF800000> : vector<1xf32>
    %157 = vector.multi_reduction <maximumf>, %156, %cst_16 [1] : vector<1x438xf32> to vector<1xf32>
    %158 = vector.shape_cast %157 : vector<1xf32> to vector<1x1xf32>
    %159 = vector.extract_strided_slice %153 {offsets = [0, 0], sizes = [1, 4], strides = [1, 1]} : vector<8x4xf32> to vector<1x4xf32>
    %160 = vector.broadcast %158 : vector<1x1xf32> to vector<1x4xf32>
    %161 = arith.mulf %160, %159 : vector<1x4xf32>
    %162 = arith.addf %154, %161 : vector<1x4xf32>
    %163 = vector.extract_strided_slice %152 {offsets = [1, 0], sizes = [1, 438], strides = [1, 1]} : vector<4x438xf32> to vector<1x438xf32>
    %164 = arith.mulf %144, %163 : vector<1x438xf32>
    %cst_17 = arith.constant dense<0xFF800000> : vector<1xf32>
    %165 = vector.multi_reduction <maximumf>, %164, %cst_17 [1] : vector<1x438xf32> to vector<1xf32>
    %166 = vector.shape_cast %165 : vector<1xf32> to vector<1x1xf32>
    %167 = vector.extract_strided_slice %153 {offsets = [1, 0], sizes = [1, 4], strides = [1, 1]} : vector<8x4xf32> to vector<1x4xf32>
    %168 = vector.broadcast %166 : vector<1x1xf32> to vector<1x4xf32>
    %169 = arith.mulf %168, %167 : vector<1x4xf32>
    %170 = arith.addf %162, %169 : vector<1x4xf32>
    %171 = vector.extract_strided_slice %152 {offsets = [0, 0], sizes = [1, 438], strides = [1, 1]} : vector<4x438xf32> to vector<1x438xf32>
    %172 = arith.mulf %151, %171 : vector<1x438xf32>
    %cst_18 = arith.constant dense<0xFF800000> : vector<1xf32>
    %173 = vector.multi_reduction <maximumf>, %172, %cst_18 [1] : vector<1x438xf32> to vector<1xf32>
    %174 = vector.shape_cast %173 : vector<1xf32> to vector<1x1xf32>
    %175 = vector.extract_strided_slice %153 {offsets = [2, 0], sizes = [1, 4], strides = [1, 1]} : vector<8x4xf32> to vector<1x4xf32>
    %176 = vector.broadcast %174 : vector<1x1xf32> to vector<1x4xf32>
    %177 = arith.mulf %176, %175 : vector<1x4xf32>
    %178 = arith.addf %170, %177 : vector<1x4xf32>
    %179 = vector.extract_strided_slice %152 {offsets = [1, 0], sizes = [1, 438], strides = [1, 1]} : vector<4x438xf32> to vector<1x438xf32>
    %180 = arith.mulf %151, %179 : vector<1x438xf32>
    %cst_19 = arith.constant dense<0xFF800000> : vector<1xf32>
    %181 = vector.multi_reduction <maximumf>, %180, %cst_19 [1] : vector<1x438xf32> to vector<1xf32>
    %182 = vector.shape_cast %181 : vector<1xf32> to vector<1x1xf32>
    %183 = vector.extract_strided_slice %153 {offsets = [3, 0], sizes = [1, 4], strides = [1, 1]} : vector<8x4xf32> to vector<1x4xf32>
    %184 = vector.broadcast %182 : vector<1x1xf32> to vector<1x4xf32>
    %185 = arith.mulf %184, %183 : vector<1x4xf32>
    %186 = arith.addf %178, %185 : vector<1x4xf32>
    %187 = vector.extract_strided_slice %152 {offsets = [2, 0], sizes = [1, 438], strides = [1, 1]} : vector<4x438xf32> to vector<1x438xf32>
    %188 = arith.mulf %144, %187 : vector<1x438xf32>
    %cst_20 = arith.constant dense<0xFF800000> : vector<1xf32>
    %189 = vector.multi_reduction <maximumf>, %188, %cst_20 [1] : vector<1x438xf32> to vector<1xf32>
    %190 = vector.shape_cast %189 : vector<1xf32> to vector<1x1xf32>
    %191 = vector.extract_strided_slice %153 {offsets = [4, 0], sizes = [1, 4], strides = [1, 1]} : vector<8x4xf32> to vector<1x4xf32>
    %192 = vector.broadcast %190 : vector<1x1xf32> to vector<1x4xf32>
    %193 = arith.mulf %192, %191 : vector<1x4xf32>
    %194 = arith.addf %186, %193 : vector<1x4xf32>
    %195 = vector.extract_strided_slice %152 {offsets = [3, 0], sizes = [1, 438], strides = [1, 1]} : vector<4x438xf32> to vector<1x438xf32>
    %196 = arith.mulf %144, %195 : vector<1x438xf32>
    %cst_21 = arith.constant dense<0xFF800000> : vector<1xf32>
    %197 = vector.multi_reduction <maximumf>, %196, %cst_21 [1] : vector<1x438xf32> to vector<1xf32>
    %198 = vector.shape_cast %197 : vector<1xf32> to vector<1x1xf32>
    %199 = vector.extract_strided_slice %153 {offsets = [5, 0], sizes = [1, 4], strides = [1, 1]} : vector<8x4xf32> to vector<1x4xf32>
    %200 = vector.broadcast %198 : vector<1x1xf32> to vector<1x4xf32>
    %201 = arith.mulf %200, %199 : vector<1x4xf32>
    %202 = arith.addf %194, %201 : vector<1x4xf32>
    %203 = vector.extract_strided_slice %152 {offsets = [2, 0], sizes = [1, 438], strides = [1, 1]} : vector<4x438xf32> to vector<1x438xf32>
    %204 = arith.mulf %151, %203 : vector<1x438xf32>
    %cst_22 = arith.constant dense<0xFF800000> : vector<1xf32>
    %205 = vector.multi_reduction <maximumf>, %204, %cst_22 [1] : vector<1x438xf32> to vector<1xf32>
    %206 = vector.shape_cast %205 : vector<1xf32> to vector<1x1xf32>
    %207 = vector.extract_strided_slice %153 {offsets = [6, 0], sizes = [1, 4], strides = [1, 1]} : vector<8x4xf32> to vector<1x4xf32>
    %208 = vector.broadcast %206 : vector<1x1xf32> to vector<1x4xf32>
    %209 = arith.mulf %208, %207 : vector<1x4xf32>
    %210 = arith.addf %202, %209 : vector<1x4xf32>
    %211 = vector.extract_strided_slice %152 {offsets = [3, 0], sizes = [1, 438], strides = [1, 1]} : vector<4x438xf32> to vector<1x438xf32>
    %212 = arith.mulf %151, %211 : vector<1x438xf32>
    %cst_23 = arith.constant dense<0xFF800000> : vector<1xf32>
    %213 = vector.multi_reduction <maximumf>, %212, %cst_23 [1] : vector<1x438xf32> to vector<1xf32>
    %214 = vector.shape_cast %213 : vector<1xf32> to vector<1x1xf32>
    %215 = vector.extract_strided_slice %153 {offsets = [7, 0], sizes = [1, 4], strides = [1, 1]} : vector<8x4xf32> to vector<1x4xf32>
    %216 = vector.broadcast %214 : vector<1x1xf32> to vector<1x4xf32>
    %217 = arith.mulf %216, %215 : vector<1x4xf32>
    %218 = arith.addf %210, %217 : vector<1x4xf32>
    %c0_24 = arith.constant 0 : index
    %c0_25 = arith.constant 0 : index
    %219 = vector.load %arg6[%c0_24, %c0_25] : memref<1x4xf32, #tpu.memory_space<vmem>>, vector<1x4xf32>
    tpu.vector_store %arg6[%c0_24, %c0_25], %218 {strides = array<i32>} : memref<1x4xf32, #tpu.memory_space<vmem>>, vector<1x4xf32>,
    return
  }
}

</mosaic_0001>

<bundles_post_ra>
// kernel: torch_cnn_forward.1
= control target key start
LH: loop header
LB: loop body
LE: loop exit
PB: predicated region body
PF: predicated region fallthrough
CT: control target
= control target key end

     0   :  { %12 = vsyncpa [#allocation5], 0  ;;  %s5055_s0 = inlined_call_operand.vmem [shape: f32[22,484], index: 0, kind: input, shape index: {}]   ;;  %s5056_s1 = inlined_call_operand.vmem [shape: f32[4,438], index: 1, kind: input, shape index: {}]   ;;  %s5057_s2 = inlined_call_operand.vmem [shape: f32[27], index: 2, kind: input, shape index: {}]   ;;  %s5058_s3 = inlined_call_operand.<no memory space> [shape: f32[1], index: 3, kind: input, shape index: {}]   ;;  %s5059_s4 = inlined_call_operand.vmem [shape: f32[8,4], index: 4, kind: input, shape index: {}]   ;;  %s5060_s5 = inlined_call_operand.vmem [shape: f32[1,4], index: 5, kind: input, shape index: {}]   ;;  %s5061_s6 = inlined_call_operand.hbm [shape: f32[1,4], index: 6, kind: output, shape index: {}]  }
   0x1   :  { %13 = vsyncpa [#allocation4], 0  ;;  %s23_s23 = sshll.u32 %s5057_s2, 4  ;;  %s2610_s24 = smov [#allocation3]   ;;  %s24_s23 = int_to_ptr.vmem [resolvable:$true] %s23_s23 }
   0x2   :  { %26 = dma.vmem_to_smem %s24_s23, 16, %s2610_s24, [#allocation5]  }
   0x3   :  { %2606 = dma.done.wait [#allocation5], 16  }
   0x4   :  { %2607 = vsyncadd [#allocation5], 4294967280 }
   0x5   :  { %37 = sfence }
   0x6   :  { %s2510_s25 = sld [smem:[#allocation3 + $0x1]]  ;;  %v2661_v0 = vld [vmem:[%s5055_s0 + $0x20] sm:$0xff]  ;;  %v2666_v1 = vld [vmem:[%s5055_s0 + $0x10] sm:$0xff]  ;;  %s2611_s2 = smov 127   ;;  %v2682_v7 = vld [vmem:[%s5055_s0 + $0x28] sm:$0xff]  ;;  %vm471_vm0 = vcmask 850944  }
   0x7   :  { %v2671_v2 = vld [vmem:[%s5055_s0] sm:$0xff]  ;;  %v2687_v8 = vld [vmem:[%s5055_s0 + $0x18] sm:$0xff]  ;;  %v2692_v9 = vld [vmem:[%s5055_s0 + $0x8] sm:$0xff]  ;;  %s2511_s24 = sld [smem:[#allocation3 + $0x2]]  ;;  %s2612_s27 = smov 126   ;;  %vm139_vm1 = vcmask 1039360  }
   0x8   :  { %v2703_v13 = vld [vmem:[%s5055_s0 + $0x40] sm:$0xf]  ;;  %v2708_v14 = vld [vmem:[%s5055_s0 + $0x38] sm:$0xff]  ;;  %v2713_v15 = vld [vmem:[%s5055_s0 + $0x30] sm:$0xff]  ;;  %s2518_s28 = sld [smem:[#allocation3 + $0x9]]  ;;  %s2613_s29 = smov 106  }
   0x9   :  { %v2724_v19 = vld [vmem:[%s5055_s0 + $0x58] sm:$0xf]  ;;  %v2729_v20 = vld [vmem:[%s5055_s0 + $0x50] sm:$0xf]  ;;  %v2734_v21 = vld [vmem:[%s5055_s0 + $0x48] sm:$0xf] }
   0xa   :  { %s2519_s30 = sld [smem:[#allocation3 + $0xa]]  ;;  %s2614_s7 = smov 105   ;;  %vm222_vm2 = vcmask 1031168   ;;  %vm305_vm3 = vcmask 867328   ;;  %vm388_vm4 = vcmask 859136   ;;  %vm554_vm5 = vcmask 687104  }
   0xb   :  { %s2520_s8 = sld [smem:[#allocation3 + $0xb]]  ;;  %s2615_s9 = smov 104   ;;  %vm637_vm6 = vcmask 678912   ;;  %vm720_vm7 = vcmask 670720   ;;  %vm1443_vm8 = vcmask 1046528   ;;  %vm2177_vm9 = vcmask 1045504  }
   0xc   :  { %v90_v3 = vstv %s2510_s25  ;;  %s2527_s10 = sld [smem:[#allocation3 + $0x12]]  ;;  %s2616_s11 = smov 84   ;;  %vm2223_vm10 = vcmask 1041408   ;;  %vm2268_vm11 = vcmask 1047554   ;;  %vm2270_vm12 = vcmask 1043456  }
   0xd   :  { %v95_v4 = vmul.f32 %v90_v3, %v2661_v0  ;;  %v93_v5 = vmul.f32 %v90_v3, %v2666_v1  ;;  %v91_v6 = vmul.f32 %v90_v3, %v2671_v2  ;;  %v96_v10 = vmul.f32 %v90_v3, %v2682_v7  ;;  %s2528_s12 = sld [smem:[#allocation3 + $0x13]]  ;;  %s2617_s13 = smov 83  }
   0xe   :  { %v94_v11 = vmul.f32 %v90_v3, %v2687_v8  ;;  %v92_v12 = vmul.f32 %v90_v3, %v2692_v9  ;;  %v99_v16 = vmul.f32 %v90_v3, %v2703_v13  ;;  %v98_v17 = vmul.f32 %v90_v3, %v2708_v14  ;;  %s2529_s14 = sld [smem:[#allocation3 + $0x14]]  ;;  %s2618_s15 = smov 82  }
   0xf   :  { %123 = vrot.lane.b32.xlu2 %v95_v4, %s2611_s2  ;;  %119 = vrot.lane.b32.xlu1 %v93_v5, %s2611_s2  ;;  %v97_v18 = vmul.f32 %v90_v3, %v2713_v15  ;;  %v102_v22 = vmul.f32 %v90_v3, %v2724_v19  ;;  %v101_v23 = vmul.f32 %v90_v3, %v2729_v20  ;;  %v173_v25 = vstv %s2511_s24  ;;  %s2513_s16 = sld [smem:[#allocation3 + $0x4]] }
  0x10   :  { %115 = vrot.lane.b32.xlu0 %v91_v6, %s2611_s2  ;;  %v100_v24 = vmul.f32 %v90_v3, %v2734_v21  ;;  %v176_v26 = vmul.f32 %v173_v25, %v2666_v1  ;;  %v175_v27 = vmul.f32 %v173_v25, %v2692_v9  ;;  %v174_v28 = vmul.f32 %v173_v25, %v2671_v2  ;;  %s2521_s17 = sld [smem:[#allocation3 + $0xc]] }
  0x11   :  { %v179_v29 = vmul.f32 %v173_v25, %v2682_v7  ;;  %v178_v30 = vmul.f32 %v173_v25, %v2661_v0  ;;  %v177_v31 = vmul.f32 %v173_v25, %v2687_v8  ;;  %v182_v32 = vmul.f32 %v173_v25, %v2703_v13  ;;  %s2522_s18 = sld [smem:[#allocation3 + $0xd]] }
  0x12   :  { %v181_v33 = vmul.f32 %v173_v25, %v2708_v14  ;;  %v180_v34 = vmul.f32 %v173_v25, %v2713_v15  ;;  %v185_v35 = vmul.f32 %v173_v25, %v2724_v19  ;;  %v184_v36 = vmul.f32 %v173_v25, %v2729_v20  ;;  %s2523_s19 = sld [smem:[#allocation3 + $0xe]] }
  0x13   :  { %v183_v37 = vmul.f32 %v173_v25, %v2734_v21  ;;  %v256_v38 = vstv %s2518_s28  ;;  %v339_v51 = vstv %s2519_s30  ;;  %s2530_s20 = sld [smem:[#allocation3 + $0x15]]  ;;  %vm2248_vm13 = vcmask 441344  }
  0x14   :  { %v259_v39 = vmul.f32 %v256_v38, %v2666_v1  ;;  %v258_v40 = vmul.f32 %v256_v38, %v2692_v9  ;;  %v257_v41 = vmul.f32 %v256_v38, %v2671_v2  ;;  %v262_v42 = vmul.f32 %v256_v38, %v2682_v7  ;;  %s2531_s21 = sld [smem:[#allocation3 + $0x16]] }
  0x15   :  { %v261_v43 = vmul.f32 %v256_v38, %v2661_v0  ;;  %v260_v44 = vmul.f32 %v256_v38, %v2687_v8  ;;  %v265_v45 = vmul.f32 %v256_v38, %v2703_v13  ;;  %v264_v46 = vmul.f32 %v256_v38, %v2708_v14  ;;  %s2534_s24 = sld [smem:[#allocation3 + $0x19]] }
  0x16   :  { %v263_v47 = vmul.f32 %v256_v38, %v2713_v15  ;;  %v268_v48 = vmul.f32 %v256_v38, %v2724_v19  ;;  %v267_v49 = vmul.f32 %v256_v38, %v2729_v20  ;;  %v266_v50 = vmul.f32 %v256_v38, %v2734_v21  ;;  %s2535_s26 = sld [smem:[#allocation3 + $0x1a]] }
  0x17   :  { %125 = vrot.lane.b32.xlu2 %v96_v10, %s2611_s2  ;;  %121 = vrot.lane.b32.xlu1 %v94_v11, %s2611_s2  ;;  %v342_v53 = vmul.f32 %v339_v51, %v2666_v1  ;;  %v341_v54 = vmul.f32 %v339_v51, %v2692_v9  ;;  %v340_v55 = vmul.f32 %v339_v51, %v2671_v2  ;;  %vm2299_vm14 = vcmask 437248  }
  0x18   :  { %117 = vrot.lane.b32.xlu0 %v92_v12, %s2611_s2  ;;  %v345_v57 = vmul.f32 %v339_v51, %v2682_v7  ;;  %v344_v58 = vmul.f32 %v339_v51, %v2661_v0  ;;  %v343_v59 = vmul.f32 %v339_v51, %v2687_v8  ;;  %v348_v61 = vmul.f32 %v339_v51, %v2703_v13 }
  0x19   :  { %v347_v62 = vmul.f32 %v339_v51, %v2708_v14  ;;  %v346_v63 = vmul.f32 %v339_v51, %v2713_v15  ;;  %v351_v6 = vmul.f32 %v339_v51, %v2724_v19  ;;  %v350_v10 = vmul.f32 %v339_v51, %v2729_v20 }
  0x1a   :  { %v349_v11 = vmul.f32 %v339_v51, %v2734_v21  ;;  %v422_v12 = vstv %s2520_s8  ;;  %vm2250_vm15 = vcmask 435200  }
  0x1f   :  { %131 = vrot.lane.b32.xlu2 %v99_v16, %s2611_s2  ;;  %129 = vrot.lane.b32.xlu1 %v98_v17, %s2611_s2 }
  0x20   :  { %127 = vrot.lane.b32.xlu0 %v97_v18, %s2611_s2 }
  0x27   :  { %137 = vrot.lane.b32.xlu2 %v102_v22, %s2611_s2  ;;  %135 = vrot.lane.b32.xlu1 %v101_v23, %s2611_s2  ;;  %v425_v22 = vmul.f32 %v422_v12, %v2666_v1  ;;  %v424_v23 = vmul.f32 %v422_v12, %v2692_v9 }
  0x28   :  { %133 = vrot.lane.b32.xlu0 %v100_v24, %s2611_s2  ;;  %v423_v24 = vmul.f32 %v422_v12, %v2671_v2 }
  0x2f   :  { %202 = vrot.lane.b32.xlu2 %v176_v26, %s2612_s27  ;;  %200 = vrot.lane.b32.xlu1 %v175_v27, %s2612_s27 }
  0x30   :  { %198 = vrot.lane.b32.xlu0 %v174_v28, %s2612_s27  ;;  %v428_v28 = vmul.f32 %v422_v12, %v2682_v7 }
  0x37   :  { %208 = vrot.lane.b32.xlu2 %v179_v29, %s2612_s27  ;;  %206 = vrot.lane.b32.xlu1 %v178_v30, %s2612_s27  ;;  %v427_v29 = vmul.f32 %v422_v12, %v2661_v0  ;;  %v426_v30 = vmul.f32 %v422_v12, %v2687_v8 }
  0x38   :  { %204 = vrot.lane.b32.xlu0 %v177_v31, %s2612_s27 }
  0x3f   :  { %214 = vrot.lane.b32.xlu2 %v182_v32, %s2612_s27  ;;  %212 = vrot.lane.b32.xlu1 %v181_v33, %s2612_s27 }
  0x40   :  { %210 = vrot.lane.b32.xlu0 %v180_v34, %s2612_s27  ;;  %v431_v34 = vmul.f32 %v422_v12, %v2703_v13 }
  0x47   :  { %220 = vrot.lane.b32.xlu2 %v185_v35, %s2612_s27  ;;  %218 = vrot.lane.b32.xlu1 %v184_v36, %s2612_s27  ;;  %v430_v35 = vmul.f32 %v422_v12, %v2708_v14  ;;  %v429_v36 = vmul.f32 %v422_v12, %v2713_v15 }
  0x48   :  { %216 = vrot.lane.b32.xlu0 %v183_v37, %s2612_s27 }
  0x4f   :  { %285 = vrot.lane.b32.xlu2 %v259_v39, %s2613_s29  ;;  %283 = vrot.lane.b32.xlu1 %v258_v40, %s2613_s29  ;;  %v434_v40 = vmul.f32 %v422_v12, %v2724_v19 }
  0x50   :  { %281 = vrot.lane.b32.xlu0 %v257_v41, %s2613_s29  ;;  %v433_v41 = vmul.f32 %v422_v12, %v2729_v20 }
  0x57   :  { %291 = vrot.lane.b32.xlu2 %v262_v42, %s2613_s29  ;;  %289 = vrot.lane.b32.xlu1 %v261_v43, %s2613_s29  ;;  %v432_v42 = vmul.f32 %v422_v12, %v2734_v21  ;;  %v505_v43 = vstv %s2527_s10  ;;  %s2532_s10 = sld [smem:[#allocation3 + $0x17]] }
  0x58   :  { %287 = vrot.lane.b32.xlu0 %v260_v44, %s2613_s29 }
  0x5f   :  { %297 = vrot.lane.b32.xlu2 %v265_v45, %s2613_s29  ;;  %295 = vrot.lane.b32.xlu1 %v264_v46, %s2613_s29 }
  0x60   :  { %293 = vrot.lane.b32.xlu0 %v263_v47, %s2613_s29  ;;  %v508_v47 = vmul.f32 %v505_v43, %v2666_v1 }
  0x67   :  { %303 = vrot.lane.b32.xlu2 %v268_v48, %s2613_s29  ;;  %301 = vrot.lane.b32.xlu1 %v267_v49, %s2613_s29  ;;  %v507_v48 = vmul.f32 %v505_v43, %v2692_v9  ;;  %v506_v49 = vmul.f32 %v505_v43, %v2671_v2 }
  0x68   :  { %299 = vrot.lane.b32.xlu0 %v266_v50, %s2613_s29 }
  0x69   :  { %v2790_v52 = vpop.permute.xlu2 %123 }
  0x6a   :  { %5179 = vst [vmem:[#allocation9_spill] sm:$0xff] %v2790_v52 }
  0x6f   :  { %368 = vrot.lane.b32.xlu2 %v342_v53, %s2614_s7  ;;  %366 = vrot.lane.b32.xlu1 %v341_v54, %s2614_s7  ;;  %v511_v54 = vmul.f32 %v505_v43, %v2682_v7 }
  0x70   :  { %364 = vrot.lane.b32.xlu0 %v340_v55, %s2614_s7  ;;  %v510_v55 = vmul.f32 %v505_v43, %v2661_v0 }
  0x71   :  { %v2798_v56 = vpop.permute.xlu2 %125 }
  0x72   :  { %5180 = vst [vmem:[#allocation10_spill] sm:$0xff] %v2798_v56 }
  0x77   :  { %374 = vrot.lane.b32.xlu2 %v345_v57, %s2614_s7  ;;  %372 = vrot.lane.b32.xlu1 %v344_v58, %s2614_s7  ;;  %v509_v57 = vmul.f32 %v505_v43, %v2687_v8 }
  0x78   :  { %370 = vrot.lane.b32.xlu0 %v343_v59, %s2614_s7 }
  0x79   :  { %v2806_v60 = vpop.permute.xlu2 %131 }
  0x7a   :  { %5181 = vst [vmem:[#allocation11_spill] sm:$0xff] %v2806_v60 }
  0x7f   :  { %380 = vrot.lane.b32.xlu2 %v348_v61, %s2614_s7  ;;  %378 = vrot.lane.b32.xlu1 %v347_v62, %s2614_s7  ;;  %v514_v62 = vmul.f32 %v505_v43, %v2703_v13 }
  0x80   :  { %376 = vrot.lane.b32.xlu0 %v346_v63, %s2614_s7  ;;  %v513_v63 = vmul.f32 %v505_v43, %v2708_v14 }
  0x81   :  { %v2814_v3 = vpop.permute.xlu2 %137  ;;  %v2816_v4 = vpop.permute.xlu1 %119 }
  0x82   :  { %5182 = vst [vmem:[#allocation12_spill] sm:$0xff] %v2814_v3  ;;  %v2818_v5 = vpop.permute.xlu0 %115 }
  0x83   :  { %5183 = vst [vmem:[#allocation13_spill] sm:$0xff] %v2816_v4 }
  0x84   :  { %5184 = vst [vmem:[#allocation14_spill] sm:$0xff] %v2818_v5 }
  0x87   :  { %386 = vrot.lane.b32.xlu2 %v351_v6, %s2614_s7  ;;  %384 = vrot.lane.b32.xlu1 %v350_v10, %s2614_s7  ;;  %v512_v6 = vmul.f32 %v505_v43, %v2713_v15 }
  0x88   :  { %382 = vrot.lane.b32.xlu0 %v349_v11, %s2614_s7 }
  0x89   :  { %v2826_v16 = vpop.permute.xlu2 %202  ;;  %v2828_v17 = vpop.permute.xlu1 %121 }
  0x8a   :  { %5185 = vst [vmem:[#allocation15_spill] sm:$0xff] %v2826_v16  ;;  %v2830_v18 = vpop.permute.xlu0 %117 }
  0x8b   :  { %5186 = vst [vmem:[#allocation16_spill] sm:$0xff] %v2828_v17 }
  0x8c   :  { %5187 = vst [vmem:[#allocation17_spill] sm:$0xff] %v2830_v18 }
  0x8f   :  { %451 = vrot.lane.b32.xlu2 %v425_v22, %s2615_s9  ;;  %449 = vrot.lane.b32.xlu1 %v424_v23, %s2615_s9  ;;  %v517_v22 = vmul.f32 %v505_v43, %v2724_v19  ;;  %v516_v23 = vmul.f32 %v505_v43, %v2729_v20 }
  0x90   :  { %447 = vrot.lane.b32.xlu0 %v423_v24, %s2615_s9  ;;  %v515_v24 = vmul.f32 %v505_v43, %v2734_v21 }
  0x91   :  { %v2838_v25 = vpop.permute.xlu2 %208  ;;  %v2840_v26 = vpop.permute.xlu1 %129 }
  0x92   :  { %5188 = vst [vmem:[#allocation18_spill] sm:$0xff] %v2838_v25  ;;  %v2842_v27 = vpop.permute.xlu0 %127 }
  0x93   :  { %5189 = vst [vmem:[#allocation19_spill] sm:$0xff] %v2840_v26 }
  0x94   :  { %5190 = vst [vmem:[#allocation20_spill] sm:$0xff] %v2842_v27 }
  0x97   :  { %457 = vrot.lane.b32.xlu2 %v428_v28, %s2615_s9  ;;  %455 = vrot.lane.b32.xlu1 %v427_v29, %s2615_s9  ;;  %v588_v28 = vstv %s2528_s12  ;;  %s2514_s12 = sld [smem:[#allocation3 + $0x5]] }
  0x98   :  { %453 = vrot.lane.b32.xlu0 %v426_v30, %s2615_s9 }
  0x99   :  { %v2850_v31 = vpop.permute.xlu2 %214  ;;  %v2852_v32 = vpop.permute.xlu1 %135 }
  0x9a   :  { %5191 = vst [vmem:[#allocation21_spill] sm:$0xff] %v2850_v31  ;;  %v2854_v33 = vpop.permute.xlu0 %133 }
  0x9b   :  { %5192 = vst [vmem:[#allocation22_spill] sm:$0xff] %v2852_v32  ;;  %v3390_v32 = vld [vmem:[%s5055_s0 + $0x38] sm:$0xff] }
  0x9c   :  { %5193 = vst [vmem:[#allocation23_spill] sm:$0xff] %v2854_v33 }
  0x9d   :  { %5288 = vst [vmem:[#allocation118_spill] sm:$0xff] %v3390_v32 }
  0x9f   :  { %463 = vrot.lane.b32.xlu2 %v431_v34, %s2615_s9  ;;  %461 = vrot.lane.b32.xlu1 %v430_v35, %s2615_s9  ;;  %v591_v35 = vmul.f32 %v588_v28, %v2666_v1 }
  0xa0   :  { %459 = vrot.lane.b32.xlu0 %v429_v36, %s2615_s9  ;;  %v590_v36 = vmul.f32 %v588_v28, %v2692_v9 }
  0xa1   :  { %v2862_v37 = vpop.permute.xlu2 %220  ;;  %v2864_v38 = vpop.permute.xlu1 %200 }
  0xa2   :  { %5194 = vst [vmem:[#allocation24_spill] sm:$0xff] %v2862_v37  ;;  %v2866_v39 = vpop.permute.xlu0 %198 }
  0xa3   :  { %5195 = vst [vmem:[#allocation25_spill] sm:$0xff] %v2864_v38 }
  0xa4   :  { %5196 = vst [vmem:[#allocation26_spill] sm:$0xff] %v2866_v39 }
  0xa7   :  { %469 = vrot.lane.b32.xlu2 %v434_v40, %s2615_s9  ;;  %467 = vrot.lane.b32.xlu1 %v433_v41, %s2615_s9  ;;  %v589_v40 = vmul.f32 %v588_v28, %v2671_v2 }
  0xa8   :  { %465 = vrot.lane.b32.xlu0 %v432_v42, %s2615_s9 }
  0xa9   :  { %v2874_v44 = vpop.permute.xlu2 %285  ;;  %v2876_v45 = vpop.permute.xlu1 %206 }
  0xaa   :  { %5197 = vst [vmem:[#allocation27_spill] sm:$0xff] %v2874_v44  ;;  %v2878_v46 = vpop.permute.xlu0 %204 }
  0xab   :  { %5198 = vst [vmem:[#allocation28_spill] sm:$0xff] %v2876_v45 }
  0xac   :  { %5199 = vst [vmem:[#allocation29_spill] sm:$0xff] %v2878_v46 }
  0xaf   :  { %534 = vrot.lane.b32.xlu2 %v508_v47, %s2616_s11  ;;  %532 = vrot.lane.b32.xlu1 %v507_v48, %s2616_s11  ;;  %v594_v47 = vmul.f32 %v588_v28, %v2682_v7  ;;  %v593_v48 = vmul.f32 %v588_v28, %v2661_v0 }
  0xb0   :  { %530 = vrot.lane.b32.xlu0 %v506_v49, %s2616_s11  ;;  %v592_v49 = vmul.f32 %v588_v28, %v2687_v8 }
  0xb1   :  { %v2886_v50 = vpop.permute.xlu2 %291  ;;  %v2888_v51 = vpop.permute.xlu1 %212 }
  0xb2   :  { %5200 = vst [vmem:[#allocation30_spill] sm:$0xff] %v2886_v50  ;;  %v2890_v53 = vpop.permute.xlu0 %210 }
  0xb3   :  { %5201 = vst [vmem:[#allocation31_spill] sm:$0xff] %v2888_v51 }
  0xb4   :  { %5202 = vst [vmem:[#allocation32_spill] sm:$0xff] %v2890_v53 }
  0xb7   :  { %540 = vrot.lane.b32.xlu2 %v511_v54, %s2616_s11  ;;  %538 = vrot.lane.b32.xlu1 %v510_v55, %s2616_s11 }
  0xb8   :  { %536 = vrot.lane.b32.xlu0 %v509_v57, %s2616_s11 }
  0xb9   :  { %v2898_v58 = vpop.permute.xlu2 %297  ;;  %v2900_v59 = vpop.permute.xlu1 %218 }
  0xba   :  { %5203 = vst [vmem:[#allocation33_spill] sm:$0xff] %v2898_v58  ;;  %v2902_v61 = vpop.permute.xlu0 %216 }
  0xbb   :  { %5204 = vst [vmem:[#allocation34_spill] sm:$0xff] %v2900_v59 }
  0xbc   :  { %5205 = vst [vmem:[#allocation35_spill] sm:$0xff] %v2902_v61 }
  0xbf   :  { %546 = vrot.lane.b32.xlu2 %v514_v62, %s2616_s11  ;;  %544 = vrot.lane.b32.xlu1 %v513_v63, %s2616_s11  ;;  %v597_v62 = vmul.f32 %v588_v28, %v2703_v13  ;;  %v596_v63 = vmul.f32 %v588_v28, %v2708_v14 }
  0xc0   :  { %542 = vrot.lane.b32.xlu0 %v512_v6, %s2616_s11  ;;  %v595_v6 = vmul.f32 %v588_v28, %v2713_v15 }
  0xc1   :  { %v2910_v10 = vpop.permute.xlu2 %303  ;;  %v2912_v11 = vpop.permute.xlu1 %283 }
  0xc2   :  { %5206 = vst [vmem:[#allocation36_spill] sm:$0xff] %v2910_v10  ;;  %v2914_v12 = vpop.permute.xlu0 %281 }
  0xc3   :  { %5207 = vst [vmem:[#allocation37_spill] sm:$0xff] %v2912_v11 }
  0xc4   :  { %5208 = vst [vmem:[#allocation38_spill] sm:$0xff] %v2914_v12 }
  0xc7   :  { %552 = vrot.lane.b32.xlu2 %v517_v22, %s2616_s11  ;;  %550 = vrot.lane.b32.xlu1 %v516_v23, %s2616_s11 }
  0xc8   :  { %548 = vrot.lane.b32.xlu0 %v515_v24, %s2616_s11 }
  0xc9   :  { %v2922_v29 = vpop.permute.xlu2 %368  ;;  %v2924_v30 = vpop.permute.xlu1 %289 }
  0xca   :  { %5209 = vst [vmem:[#allocation39_spill] sm:$0xff] %v2922_v29  ;;  %v2926_v34 = vpop.permute.xlu0 %287 }
  0xcb   :  { %5210 = vst [vmem:[#allocation40_spill] sm:$0xff] %v2924_v30 }
  0xcc   :  { %5211 = vst [vmem:[#allocation41_spill] sm:$0xff] %v2926_v34 }
  0xcf   :  { %617 = vrot.lane.b32.xlu2 %v591_v35, %s2617_s13  ;;  %615 = vrot.lane.b32.xlu1 %v590_v36, %s2617_s13  ;;  %v600_v35 = vmul.f32 %v588_v28, %v2724_v19  ;;  %v599_v36 = vmul.f32 %v588_v28, %v2729_v20 }
  0xd0   :  { %613 = vrot.lane.b32.xlu0 %v589_v40, %s2617_s13  ;;  %v598_v40 = vmul.f32 %v588_v28, %v2734_v21 }
  0xd1   :  { %v2934_v41 = vpop.permute.xlu2 %374  ;;  %v2936_v42 = vpop.permute.xlu1 %295 }
  0xd2   :  { %5212 = vst [vmem:[#allocation42_spill] sm:$0xff] %v2934_v41  ;;  %v2938_v43 = vpop.permute.xlu0 %293 }
  0xd3   :  { %5213 = vst [vmem:[#allocation43_spill] sm:$0xff] %v2936_v42 }
  0xd4   :  { %5214 = vst [vmem:[#allocation44_spill] sm:$0xff] %v2938_v43 }
  0xd7   :  { %623 = vrot.lane.b32.xlu2 %v594_v47, %s2617_s13  ;;  %621 = vrot.lane.b32.xlu1 %v593_v48, %s2617_s13  ;;  %v671_v47 = vstv %s2529_s14 }
  0xd8   :  { %619 = vrot.lane.b32.xlu0 %v592_v49, %s2617_s13 }
  0xd9   :  { %v2946_v54 = vpop.permute.xlu2 %380  ;;  %v2948_v55 = vpop.permute.xlu1 %301 }
  0xda   :  { %5215 = vst [vmem:[#allocation45_spill] sm:$0xff] %v2946_v54  ;;  %v2950_v57 = vpop.permute.xlu0 %299  ;;  %v672_v54 = vmul.f32 %v671_v47, %v2671_v2 }
  0xdb   :  { %5216 = vst [vmem:[#allocation46_spill] sm:$0xff] %v2948_v55 }
  0xdc   :  { %5217 = vst [vmem:[#allocation47_spill] sm:$0xff] %v2950_v57 }
  0xdf   :  { %629 = vrot.lane.b32.xlu2 %v597_v62, %s2617_s13  ;;  %627 = vrot.lane.b32.xlu1 %v596_v63, %s2617_s13  ;;  %v674_v63 = vmul.f32 %v671_v47, %v2666_v1  ;;  %v676_v1 = vmul.f32 %v671_v47, %v2661_v0 }
  0xe0   :  { %625 = vrot.lane.b32.xlu0 %v595_v6, %s2617_s13  ;;  %v673_v6 = vmul.f32 %v671_v47, %v2692_v9  ;;  %v675_v9 = vmul.f32 %v671_v47, %v2687_v8 }
  0xe1   :  { %v2958_v22 = vpop.permute.xlu2 %386  ;;  %v2960_v23 = vpop.permute.xlu1 %366 }
  0xe2   :  { %5218 = vst [vmem:[#allocation48_spill] sm:$0xff] %v2958_v22  ;;  %v2962_v24 = vpop.permute.xlu0 %364 }
  0xe3   :  { %5219 = vst [vmem:[#allocation49_spill] sm:$0xff] %v2960_v23 }
  0xe4   :  { %5220 = vst [vmem:[#allocation50_spill] sm:$0xff] %v2962_v24 }
  0xe7   :  { %635 = vrot.lane.b32.xlu2 %v600_v35, %s2617_s13  ;;  %633 = vrot.lane.b32.xlu1 %v599_v36, %s2617_s13 }
  0xe8   :  { %631 = vrot.lane.b32.xlu0 %v598_v40, %s2617_s13  ;;  %v677_v40 = vmul.f32 %v671_v47, %v2682_v7 }
  0xe9   :  { %v2970_v48 = vpop.permute.xlu2 %451  ;;  %v2972_v49 = vpop.permute.xlu1 %372 }
  0xea   :  { %5221 = vst [vmem:[#allocation51_spill] sm:$0xff] %v2970_v48  ;;  %v2974_v62 = vpop.permute.xlu0 %370  ;;  %v678_v48 = vmul.f32 %v671_v47, %v2713_v15 }
  0xeb   :  { %5222 = vst [vmem:[#allocation52_spill] sm:$0xff] %v2972_v49 }
  0xec   :  { %5223 = vst [vmem:[#allocation53_spill] sm:$0xff] %v2974_v62 }
  0xef   :  { %700 = vrot.lane.b32.xlu2 %v674_v63, %s2618_s15  ;;  %698 = vrot.lane.b32.xlu1 %v673_v6, %s2618_s15  ;;  %v680_v6 = vmul.f32 %v671_v47, %v2703_v13  ;;  %v682_v13 = vmul.f32 %v671_v47, %v2729_v20 }
  0xf0   :  { %696 = vrot.lane.b32.xlu0 %v672_v54, %s2618_s15 }
  0xf1   :  { %v2982_v28 = vpop.permute.xlu2 %457  ;;  %v2984_v35 = vpop.permute.xlu1 %378 }
  0xf2   :  { %5224 = vst [vmem:[#allocation54_spill] sm:$0xff] %v2982_v28  ;;  %v2986_v36 = vpop.permute.xlu0 %376  ;;  %v679_v28 = vmul.f32 %v671_v47, %v2708_v14 }
  0xf3   :  { %5225 = vst [vmem:[#allocation55_spill] sm:$0xff] %v2984_v35 }
  0xf4   :  { %5226 = vst [vmem:[#allocation56_spill] sm:$0xff] %v2986_v36 }
  0xf7   :  { %706 = vrot.lane.b32.xlu2 %v677_v40, %s2618_s15  ;;  %704 = vrot.lane.b32.xlu1 %v676_v1, %s2618_s15 }
  0xf8   :  { %702 = vrot.lane.b32.xlu0 %v675_v9, %s2618_s15  ;;  %v683_v9 = vmul.f32 %v671_v47, %v2724_v19  ;;  %v3026_v19 = vld [vmem:[%s5055_s0 + $0x8] sm:$0xfe] }
  0xf9   :  { %v2994_v2 = vpop.permute.xlu2 %463  ;;  %v2996_v54 = vpop.permute.xlu1 %384 }
  0xfa   :  { %5227 = vst [vmem:[#allocation57_spill] sm:$0xff] %v2994_v2  ;;  %v2998_v63 = vpop.permute.xlu0 %382  ;;  %v681_v2 = vmul.f32 %v671_v47, %v2734_v21  ;;  %v3035_v47 = vld [vmem:[%s5055_s0] sm:$0xfe] }
  0xfb   :  { %5228 = vst [vmem:[#allocation58_spill] sm:$0xff] %v2996_v54 }
  0xfc   :  { %5229 = vst [vmem:[#allocation59_spill] sm:$0xff] %v2998_v63 }
  0xff   :  { %712 = vrot.lane.b32.xlu2 %v680_v6, %s2618_s15  ;;  %710 = vrot.lane.b32.xlu1 %v679_v28, %s2618_s15  ;;  %v775_v28 = vstv %s2513_s16  ;;  %s2533_s16 = sld [smem:[#allocation3 + $0x18]] }
 0x100   :  { %708 = vrot.lane.b32.xlu0 %v678_v48, %s2618_s15  ;;  %v3021_v48 = vld [vmem:[%s5055_s0 + $0x10] sm:$0xfe]  ;;  %v783_v63 = vmul.f32 %v775_v28, %v2708_v14 }
 0x101   :  { %v3006_v8 = vpop.permute.xlu2 %469  ;;  %v3008_v40 = vpop.permute.xlu1 %449  ;;  %5233 = vst [vmem:[#allocation63_spill] sm:$0xff] %v3021_v48  ;;  %v778_v6 = vmul.f32 %v775_v28, %v3021_v48 }
 0x102   :  { %5230 = vst [vmem:[#allocation60_spill] sm:$0xff] %v3006_v8  ;;  %v3010_v1 = vpop.permute.xlu0 %447 }
 0x103   :  { %5231 = vst [vmem:[#allocation61_spill] sm:$0xff] %v3008_v40  ;;  %v780_v40 = vmul.f32 %v775_v28, %v2661_v0 }
 0x104   :  { %5232 = vst [vmem:[#allocation62_spill] sm:$0xff] %v3010_v1  ;;  %v781_v1 = vmul.f32 %v775_v28, %v2682_v7 }
 0x107   :  { %718 = vrot.lane.b32.xlu2 %v683_v9, %s2618_s15  ;;  %716 = vrot.lane.b32.xlu1 %v682_v13, %s2618_s15  ;;  %v777_v9 = vmul.f32 %v775_v28, %v3026_v19  ;;  %v776_v13 = vmul.f32 %v775_v28, %v3035_v47 }
 0x108   :  { %714 = vrot.lane.b32.xlu0 %v681_v2, %s2618_s15 }
 0x109   :  { %v3028_v20 = vpop.permute.xlu2 %534  ;;  %v3030_v21 = vpop.permute.xlu1 %455 }
 0x10a   :  { %5234 = vst [vmem:[#allocation64_spill] sm:$0xff] %v3028_v20  ;;  %v3037_v2 = vpop.permute.xlu0 %453 }
 0x10b   :  { %5235 = vst [vmem:[#allocation65_spill] sm:$0xff] %v3030_v21 }
 0x10c   :  { %5236 = vst [vmem:[#allocation66_spill] sm:$0xff] %v3037_v2  ;;  %v3052_v2 = vld [vmem:[%s5055_s0 + $0x18] sm:$0xfe] }
 0x10f   :  { %804 = vrot.lane.b32.xlu2 %v778_v6, %s2611_s2  ;;  %802 = vrot.lane.b32.xlu1 %v777_v9, %s2611_s2  ;;  %v779_v6 = vmul.f32 %v775_v28, %v3052_v2  ;;  %v3065_v9 = vld [vmem:[%s5055_s0 + $0x40] sm:$0x1f] }
 0x110   :  { %800 = vrot.lane.b32.xlu0 %v776_v13, %s2611_s2 }
 0x111   :  { %v3045_v20 = vpop.permute.xlu2 %540  ;;  %v3047_v8 = vpop.permute.xlu1 %461 }
 0x112   :  { %5237 = vst [vmem:[#allocation67_spill] sm:$0xff] %v3045_v20  ;;  %v3054_v21 = vpop.permute.xlu0 %459 }
 0x113   :  { %5238 = vst [vmem:[#allocation68_spill] sm:$0xff] %v3047_v8 }
 0x114   :  { %5239 = vst [vmem:[#allocation69_spill] sm:$0xff] %v3054_v21  ;;  %v784_v21 = vmul.f32 %v775_v28, %v3065_v9 }
 0x117   :  { %810 = vrot.lane.b32.xlu2 %v781_v1, %s2611_s2  ;;  %808 = vrot.lane.b32.xlu1 %v780_v40, %s2611_s2  ;;  %v782_v1 = vmul.f32 %v775_v28, %v2713_v15  ;;  %v3082_v40 = vld [vmem:[%s5055_s0 + $0x58] sm:$0x1f] }
 0x118   :  { %806 = vrot.lane.b32.xlu0 %v779_v6, %s2611_s2  ;;  %v3087_v6 = vld [vmem:[%s5055_s0 + $0x50] sm:$0x1f] }
 0x119   :  { %v3067_v13 = vpop.permute.xlu2 %546  ;;  %v3069_v20 = vpop.permute.xlu1 %467 }
 0x11a   :  { %5240 = vst [vmem:[#allocation70_spill] sm:$0xff] %v3067_v13  ;;  %v3071_v8 = vpop.permute.xlu0 %465 }
 0x11b   :  { %5241 = vst [vmem:[#allocation71_spill] sm:$0xff] %v3069_v20  ;;  %v786_v20 = vmul.f32 %v775_v28, %v3087_v6 }
 0x11c   :  { %5242 = vst [vmem:[#allocation72_spill] sm:$0xff] %v3071_v8 }
 0x11f   :  { %816 = vrot.lane.b32.xlu2 %v784_v21, %s2611_s2  ;;  %814 = vrot.lane.b32.xlu1 %v783_v63, %s2611_s2  ;;  %v3096_v63 = vld [vmem:[%s5055_s0 + $0x48] sm:$0x1f] }
 0x120   :  { %812 = vrot.lane.b32.xlu0 %v782_v1, %s2611_s2  ;;  %v787_v1 = vmul.f32 %v775_v28, %v3082_v40  ;;  %v785_v54 = vmul.f32 %v775_v28, %v3096_v63 }
 0x121   :  { %v3089_v13 = vpop.permute.xlu2 %552  ;;  %v3091_v8 = vpop.permute.xlu1 %532 }
 0x122   :  { %5243 = vst [vmem:[#allocation73_spill] sm:$0xff] %v3089_v13  ;;  %v3098_v21 = vpop.permute.xlu0 %530  ;;  %v857_v13 = vstv %s2514_s12  ;;  %s2516_s12 = sld [smem:[#allocation3 + $0x7]] }
 0x123   :  { %5244 = vst [vmem:[#allocation74_spill] sm:$0xff] %v3091_v8  ;;  %v859_v62 = vmul.f32 %v857_v13, %v3026_v19  ;;  %v858_v22 = vmul.f32 %v857_v13, %v3035_v47 }
 0x124   :  { %5245 = vst [vmem:[#allocation75_spill] sm:$0xff] %v3098_v21  ;;  %v860_v21 = vmul.f32 %v857_v13, %v3021_v48 }
 0x127   :  { %822 = vrot.lane.b32.xlu2 %v787_v1, %s2611_s2  ;;  %820 = vrot.lane.b32.xlu1 %v786_v20, %s2611_s2  ;;  %v863_v1 = vmul.f32 %v857_v13, %v2682_v7 }
 0x128   :  { %818 = vrot.lane.b32.xlu0 %v785_v54, %s2611_s2 }
 0x129   :  { %v3106_v8 = vpop.permute.xlu2 %617  ;;  %v3108_v35 = vpop.permute.xlu1 %538 }
 0x12a   :  { %5246 = vst [vmem:[#allocation76_spill] sm:$0xff] %v3106_v8  ;;  %v3110_v36 = vpop.permute.xlu0 %536  ;;  %v862_v8 = vmul.f32 %v857_v13, %v2661_v0 }
 0x12b   :  { %5247 = vst [vmem:[#allocation77_spill] sm:$0xff] %v3108_v35 }
 0x12c   :  { %5248 = vst [vmem:[#allocation78_spill] sm:$0xff] %v3110_v36  ;;  %v861_v36 = vmul.f32 %v857_v13, %v3052_v2 }
 0x12f   :  { %886 = vrot.lane.b32.xlu2 %v860_v21, %s2612_s27  ;;  %884 = vrot.lane.b32.xlu1 %v859_v62, %s2612_s27 }
 0x130   :  { %882 = vrot.lane.b32.xlu0 %v858_v22, %s2612_s27 }
 0x131   :  { %v3118_v54 = vpop.permute.xlu2 %623  ;;  %v3120_v28 = vpop.permute.xlu1 %544 }
 0x132   :  { %5249 = vst [vmem:[#allocation79_spill] sm:$0xff] %v3118_v54  ;;  %v3122_v20 = vpop.permute.xlu0 %542  ;;  %v866_v54 = vmul.f32 %v857_v13, %v3065_v9 }
 0x133   :  { %5250 = vst [vmem:[#allocation80_spill] sm:$0xff] %v3120_v28  ;;  %v865_v28 = vmul.f32 %v857_v13, %v2708_v14 }
 0x134   :  { %5251 = vst [vmem:[#allocation81_spill] sm:$0xff] %v3122_v20  ;;  %v864_v20 = vmul.f32 %v857_v13, %v2713_v15 }
 0x137   :  { %892 = vrot.lane.b32.xlu2 %v863_v1, %s2612_s27  ;;  %890 = vrot.lane.b32.xlu1 %v862_v8, %s2612_s27 }
 0x138   :  { %888 = vrot.lane.b32.xlu0 %v861_v36, %s2612_s27 }
 0x139   :  { %v3130_v62 = vpop.permute.xlu2 %629  ;;  %v3132_v22 = vpop.permute.xlu1 %550 }
 0x13a   :  { %5252 = vst [vmem:[#allocation82_spill] sm:$0xff] %v3130_v62  ;;  %v3134_v21 = vpop.permute.xlu0 %548  ;;  %v869_v62 = vmul.f32 %v857_v13, %v3082_v40 }
 0x13b   :  { %5253 = vst [vmem:[#allocation83_spill] sm:$0xff] %v3132_v22  ;;  %v867_v22 = vmul.f32 %v857_v13, %v3096_v63 }
 0x13c   :  { %5254 = vst [vmem:[#allocation84_spill] sm:$0xff] %v3134_v21  ;;  %v868_v21 = vmul.f32 %v857_v13, %v3087_v6 }
 0x13f   :  { %898 = vrot.lane.b32.xlu2 %v866_v54, %s2612_s27  ;;  %896 = vrot.lane.b32.xlu1 %v865_v28, %s2612_s27  ;;  %v939_v54 = vstv %s2521_s17 }
 0x140   :  { %894 = vrot.lane.b32.xlu0 %v864_v20, %s2612_s27  ;;  %v940_v35 = vmul.f32 %v939_v54, %v3035_v47 }
 0x141   :  { %v3142_v36 = vpop.permute.xlu2 %635  ;;  %v3144_v8 = vpop.permute.xlu1 %615 }
 0x142   :  { %5255 = vst [vmem:[#allocation85_spill] sm:$0xff] %v3142_v36  ;;  %v3146_v1 = vpop.permute.xlu0 %613 }
 0x143   :  { %5256 = vst [vmem:[#allocation86_spill] sm:$0xff] %v3144_v8  ;;  %v941_v8 = vmul.f32 %v939_v54, %v3026_v19 }
 0x144   :  { %5257 = vst [vmem:[#allocation87_spill] sm:$0xff] %v3146_v1  ;;  %v942_v1 = vmul.f32 %v939_v54, %v3021_v48 }
 0x147   :  { %904 = vrot.lane.b32.xlu2 %v869_v62, %s2612_s27  ;;  %902 = vrot.lane.b32.xlu1 %v868_v21, %s2612_s27  ;;  %v945_v21 = vmul.f32 %v939_v54, %v2682_v7 }
 0x148   :  { %900 = vrot.lane.b32.xlu0 %v867_v22, %s2612_s27 }
 0x149   :  { %v3154_v28 = vpop.permute.xlu2 %700  ;;  %v3156_v20 = vpop.permute.xlu1 %621 }
 0x14a   :  { %5258 = vst [vmem:[#allocation88_spill] sm:$0xff] %v3154_v28  ;;  %v3158_v36 = vpop.permute.xlu0 %619  ;;  %v944_v28 = vmul.f32 %v939_v54, %v2661_v0 }
 0x14b   :  { %5259 = vst [vmem:[#allocation89_spill] sm:$0xff] %v3156_v20 }
 0x14c   :  { %5260 = vst [vmem:[#allocation90_spill] sm:$0xff] %v3158_v36  ;;  %v943_v36 = vmul.f32 %v939_v54, %v3052_v2 }
 0x14f   :  { %968 = vrot.lane.b32.xlu2 %v942_v1, %s2613_s29  ;;  %966 = vrot.lane.b32.xlu1 %v941_v8, %s2613_s29 }
 0x150   :  { %964 = vrot.lane.b32.xlu0 %v940_v35, %s2613_s29 }
 0x151   :  { %v3166_v13 = vpop.permute.xlu2 %706  ;;  %v3168_v62 = vpop.permute.xlu1 %627 }
 0x152   :  { %5261 = vst [vmem:[#allocation91_spill] sm:$0xff] %v3166_v13  ;;  %v3170_v22 = vpop.permute.xlu0 %625  ;;  %v948_v13 = vmul.f32 %v939_v54, %v3065_v9 }
 0x153   :  { %5262 = vst [vmem:[#allocation92_spill] sm:$0xff] %v3168_v62  ;;  %v947_v62 = vmul.f32 %v939_v54, %v2708_v14 }
 0x154   :  { %5263 = vst [vmem:[#allocation93_spill] sm:$0xff] %v3170_v22  ;;  %v946_v22 = vmul.f32 %v939_v54, %v2713_v15 }
 0x157   :  { %974 = vrot.lane.b32.xlu2 %v945_v21, %s2613_s29  ;;  %972 = vrot.lane.b32.xlu1 %v944_v28, %s2613_s29 }
 0x158   :  { %970 = vrot.lane.b32.xlu0 %v943_v36, %s2613_s29 }
 0x159   :  { %v3178_v8 = vpop.permute.xlu2 %712  ;;  %v3180_v35 = vpop.permute.xlu1 %633 }
 0x15a   :  { %5264 = vst [vmem:[#allocation94_spill] sm:$0xff] %v3178_v8  ;;  %v3182_v1 = vpop.permute.xlu0 %631  ;;  %v951_v8 = vmul.f32 %v939_v54, %v3082_v40 }
 0x15b   :  { %5265 = vst [vmem:[#allocation95_spill] sm:$0xff] %v3180_v35  ;;  %v949_v35 = vmul.f32 %v939_v54, %v3096_v63 }
 0x15c   :  { %5266 = vst [vmem:[#allocation96_spill] sm:$0xff] %v3182_v1  ;;  %v950_v1 = vmul.f32 %v939_v54, %v3087_v6 }
 0x15f   :  { %980 = vrot.lane.b32.xlu2 %v948_v13, %s2613_s29  ;;  %978 = vrot.lane.b32.xlu1 %v947_v62, %s2613_s29  ;;  %v1021_v13 = vstv %s2522_s18  ;;  %s2500_s18 = sshll.u32 %s5061_s6, 4  ;;  %s2501_s18 = int_to_ptr.hbm [resolvable:$true] %s2500_s18 }
 0x160   :  { %976 = vrot.lane.b32.xlu0 %v946_v22, %s2613_s29  ;;  %v1022_v20 = vmul.f32 %v1021_v13, %v3035_v47  ;;  %v1028_v49 = vmul.f32 %v1021_v13, %v2713_v15  ;;  %v1031_v41 = vmul.f32 %v1021_v13, %v3096_v63 }
 0x161   :  { %v3190_v36 = vpop.permute.xlu2 %718  ;;  %v3192_v28 = vpop.permute.xlu1 %698 }
 0x162   :  { %5267 = vst [vmem:[#allocation97_spill] sm:$0xff] %v3190_v36  ;;  %v3194_v21 = vpop.permute.xlu0 %696 }
 0x163   :  { %5268 = vst [vmem:[#allocation98_spill] sm:$0xff] %v3192_v28  ;;  %v1023_v28 = vmul.f32 %v1021_v13, %v3026_v19 }
 0x164   :  { %5269 = vst [vmem:[#allocation99_spill] sm:$0xff] %v3194_v21  ;;  %v1024_v21 = vmul.f32 %v1021_v13, %v3021_v48 }
 0x167   :  { %986 = vrot.lane.b32.xlu2 %v951_v8, %s2613_s29  ;;  %984 = vrot.lane.b32.xlu1 %v950_v1, %s2613_s29  ;;  %v1027_v1 = vmul.f32 %v1021_v13, %v2682_v7 }
 0x168   :  { %982 = vrot.lane.b32.xlu0 %v949_v35, %s2613_s29 }
 0x169   :  { %v3202_v62 = vpop.permute.xlu2 %804  ;;  %v3204_v22 = vpop.permute.xlu1 %704 }
 0x16a   :  { %5270 = vst [vmem:[#allocation100_spill] sm:$0xff] %v3202_v62  ;;  %v3206_v36 = vpop.permute.xlu0 %702 }
 0x16b   :  { %5271 = vst [vmem:[#allocation101_spill] sm:$0xff] %v3204_v22  ;;  %v1025_v22 = vmul.f32 %v1021_v13, %v3052_v2 }
 0x16c   :  { %5272 = vst [vmem:[#allocation102_spill] sm:$0xff] %v3206_v36  ;;  %v1026_v36 = vmul.f32 %v1021_v13, %v2661_v0 }
 0x16f   :  { %1050 = vrot.lane.b32.xlu2 %v1024_v21, %s2614_s7  ;;  %1048 = vrot.lane.b32.xlu1 %v1023_v28, %s2614_s7 }
 0x170   :  { %1046 = vrot.lane.b32.xlu0 %v1022_v20, %s2614_s7 }
 0x171   :  { %v3214_v54 = vpop.permute.xlu2 %810  ;;  %v3216_v8 = vpop.permute.xlu1 %710 }
 0x172   :  { %5273 = vst [vmem:[#allocation103_spill] sm:$0xff] %v3216_v8  ;;  %v3218_v35 = vpop.permute.xlu0 %708  ;;  %v1030_v8 = vmul.f32 %v1021_v13, %v3065_v9 }
 0x173   :  { %5274 = vst [vmem:[#allocation104_spill] sm:$0xff] %v3218_v35  ;;  %v1029_v35 = vmul.f32 %v1021_v13, %v2708_v14 }
 0x177   :  { %1056 = vrot.lane.b32.xlu2 %v1027_v1, %s2614_s7  ;;  %1054 = vrot.lane.b32.xlu1 %v1026_v36, %s2614_s7 }
 0x178   :  { %1052 = vrot.lane.b32.xlu0 %v1025_v22, %s2614_s7 }
 0x179   :  { %v3226_v28 = vpop.permute.xlu2 %816  ;;  %v3228_v20 = vpop.permute.xlu1 %716 }
 0x17a   :  { %5275 = vst [vmem:[#allocation105_spill] sm:$0xff] %v3228_v20  ;;  %v3230_v21 = vpop.permute.xlu0 %714  ;;  %v1032_v20 = vmul.f32 %v1021_v13, %v3087_v6 }
 0x17b   :  { %5276 = vst [vmem:[#allocation106_spill] sm:$0xff] %v3230_v21  ;;  %v1033_v21 = vmul.f32 %v1021_v13, %v3082_v40 }
 0x17f   :  { %1062 = vrot.lane.b32.xlu2 %v1030_v8, %s2614_s7  ;;  %1060 = vrot.lane.b32.xlu1 %v1029_v35, %s2614_s7 }
 0x180   :  { %1058 = vrot.lane.b32.xlu0 %v1028_v49, %s2614_s7  ;;  %v1103_v49 = vstv %s2523_s19 }
 0x181   :  { %v3238_v36 = vpop.permute.xlu2 %822  ;;  %v3240_v22 = vpop.permute.xlu1 %802  ;;  %v1106_v23 = vmul.f32 %v1103_v49, %v3021_v48  ;;  %v1105_v29 = vmul.f32 %v1103_v49, %v3026_v19  ;;  %v1104_v58 = vmul.f32 %v1103_v49, %v3035_v47  ;;  %v1108_v57 = vmul.f32 %v1103_v49, %v2661_v0 }
 0x182   :  { %v3242_v1 = vpop.permute.xlu0 %800  ;;  %v1107_v55 = vmul.f32 %v1103_v49, %v3052_v2  ;;  %v1112_v42 = vmul.f32 %v1103_v49, %v3065_v9  ;;  %v1111_v43 = vmul.f32 %v1103_v49, %v2708_v14  ;;  %v1110_v10 = vmul.f32 %v1103_v49, %v2713_v15 }
 0x183   :  { %v1115_v34 = vmul.f32 %v1103_v49, %v3082_v40  ;;  %v1114_v30 = vmul.f32 %v1103_v49, %v3087_v6  ;;  %v1113_v50 = vmul.f32 %v1103_v49, %v3096_v63 }
 0x187   :  { %1068 = vrot.lane.b32.xlu2 %v1033_v21, %s2614_s7  ;;  %1066 = vrot.lane.b32.xlu1 %v1032_v20, %s2614_s7  ;;  %v1109_v21 = vmul.f32 %v1103_v49, %v2682_v7 }
 0x188   :  { %1064 = vrot.lane.b32.xlu0 %v1031_v41, %s2614_s7 }
 0x189   :  { %v3250_v8 = vpop.permute.xlu2 %886  ;;  %v3252_v35 = vpop.permute.xlu1 %808 }
 0x18a   :  { %v3254_v24 = vpop.permute.xlu0 %806 }
 0x18b   :  { %5277 = vst [vmem:[#allocation107_spill] sm:$0xff] %v3254_v24 }
 0x18f   :  { %1132 = vrot.lane.b32.xlu2 %v1106_v23, %s2615_s9  ;;  %1130 = vrot.lane.b32.xlu1 %v1105_v29, %s2615_s9 }
 0x190   :  { %1128 = vrot.lane.b32.xlu0 %v1104_v58, %s2615_s9 }
 0x191   :  { %v3262_v41 = vpop.permute.xlu2 %892  ;;  %v3264_v13 = vpop.permute.xlu1 %814 }
 0x192   :  { %v3266_v20 = vpop.permute.xlu0 %812 }
 0x197   :  { %1138 = vrot.lane.b32.xlu2 %v1109_v21, %s2615_s9  ;;  %1136 = vrot.lane.b32.xlu1 %v1108_v57, %s2615_s9 }
 0x198   :  { %1134 = vrot.lane.b32.xlu0 %v1107_v55, %s2615_s9 }
 0x199   :  { %v3274_v29 = vpop.permute.xlu2 %898  ;;  %v3276_v58 = vpop.permute.xlu1 %820 }
 0x19a   :  { %v3278_v23 = vpop.permute.xlu0 %818 }
 0x19f   :  { %1144 = vrot.lane.b32.xlu2 %v1112_v42, %s2615_s9  ;;  %1142 = vrot.lane.b32.xlu1 %v1111_v43, %s2615_s9 }
 0x1a0   :  { %1140 = vrot.lane.b32.xlu0 %v1110_v10, %s2615_s9  ;;  %v1185_v10 = vstv %s2530_s20 }
 0x1a1   :  { %v3286_v55 = vpop.permute.xlu2 %904  ;;  %v3288_v57 = vpop.permute.xlu1 %884  ;;  %v1188_v11 = vmul.f32 %v1185_v10, %v3021_v48  ;;  %v1187_v44 = vmul.f32 %v1185_v10, %v3026_v19  ;;  %v1186_v31 = vmul.f32 %v1185_v10, %v3035_v47  ;;  %v1191_v49 = vmul.f32 %v1185_v10, %v2682_v7 }
 0x1a2   :  { %v3290_v21 = vpop.permute.xlu0 %882  ;;  %v1190_v61 = vmul.f32 %v1185_v10, %v2661_v0  ;;  %v1189_v59 = vmul.f32 %v1185_v10, %v3052_v2  ;;  %v1194_v51 = vmul.f32 %v1185_v10, %v3065_v9  ;;  %v1193_v7 = vmul.f32 %v1185_v10, %v2708_v14 }
 0x1a3   :  { %v1192_v0 = vmul.f32 %v1185_v10, %v2713_v15  ;;  %v1197_v53 = vmul.f32 %v1185_v10, %v3082_v40  ;;  %v1196_v46 = vmul.f32 %v1185_v10, %v3087_v6  ;;  %v1195_v14 = vmul.f32 %v1185_v10, %v3096_v63 }
 0x1a4   :  { %v1267_v15 = vstv %s2531_s21  ;;  %s2512_s21 = sld [smem:[#allocation3 + $0x3]] }
 0x1a5   :  { %v1270_v37 = vmul.f32 %v1267_v15, %v3021_v48  ;;  %v1269_v45 = vmul.f32 %v1267_v15, %v3026_v19  ;;  %v1268_v25 = vmul.f32 %v1267_v15, %v3035_v47  ;;  %v1276_v33 = vmul.f32 %v1267_v15, %v3065_v9 }
 0x1a6   :  { %v1275_v26 = vmul.f32 %v3390_v32, %v1267_v15  ;;  %v1279_v5 = vmul.f32 %v1267_v15, %v3082_v40  ;;  %v1278_v18 = vmul.f32 %v1267_v15, %v3087_v6  ;;  %v1277_v4 = vmul.f32 %v1267_v15, %v3096_v63 }
 0x1a7   :  { %1150 = vrot.lane.b32.xlu2 %v1115_v34, %s2615_s9  ;;  %1148 = vrot.lane.b32.xlu1 %v1114_v30, %s2615_s9 }
 0x1a8   :  { %1146 = vrot.lane.b32.xlu0 %v1113_v50, %s2615_s9 }
 0x1a9   :  { %v3298_v42 = vpop.permute.xlu2 %968  ;;  %v3300_v43 = vpop.permute.xlu1 %890 }
 0x1aa   :  { %5278 = vst [vmem:[#allocation108_spill] sm:$0xff] %v3298_v42  ;;  %v3302_v12 = vpop.permute.xlu0 %888  ;;  %v3503_v42 = vstv %s2512_s21 }
 0x1ab   :  { %5279 = vst [vmem:[#allocation109_spill] sm:$0xff] %v3302_v12 }
 0x1af   :  { %1214 = vrot.lane.b32.xlu2 %v1188_v11, %s2616_s11  ;;  %1212 = vrot.lane.b32.xlu1 %v1187_v44, %s2616_s11 }
 0x1b0   :  { %1210 = vrot.lane.b32.xlu0 %v1186_v31, %s2616_s11 }
 0x1b1   :  { %v3310_v50 = vpop.permute.xlu2 %974  ;;  %v3312_v30 = vpop.permute.xlu1 %896 }
 0x1b2   :  { %v3314_v34 = vpop.permute.xlu0 %894 }
 0x1b7   :  { %1220 = vrot.lane.b32.xlu2 %v1191_v49, %s2616_s11  ;;  %1218 = vrot.lane.b32.xlu1 %v1190_v61, %s2616_s11 }
 0x1b8   :  { %1216 = vrot.lane.b32.xlu0 %v1189_v59, %s2616_s11 }
 0x1b9   :  { %v3322_v44 = vpop.permute.xlu2 %980  ;;  %v3324_v31 = vpop.permute.xlu1 %902 }
 0x1ba   :  { %5280 = vst [vmem:[#allocation110_spill] sm:$0xff] %v3322_v44  ;;  %v3326_v11 = vpop.permute.xlu0 %900 }
 0x1bf   :  { %1226 = vrot.lane.b32.xlu2 %v1194_v51, %s2616_s11  ;;  %1224 = vrot.lane.b32.xlu1 %v1193_v7, %s2616_s11 }
 0x1c0   :  { %1222 = vrot.lane.b32.xlu0 %v1192_v0, %s2616_s11 }
 0x1c1   :  { %v3334_v59 = vpop.permute.xlu2 %986  ;;  %v3336_v61 = vpop.permute.xlu1 %966 }
 0x1c2   :  { %5281 = vst [vmem:[#allocation111_spill] sm:$0xff] %v3336_v61  ;;  %v3338_v49 = vpop.permute.xlu0 %964 }
 0x1c3   :  { %5282 = vst [vmem:[#allocation112_spill] sm:$0xff] %v3338_v49 }
 0x1c7   :  { %1232 = vrot.lane.b32.xlu2 %v1197_v53, %s2616_s11  ;;  %1230 = vrot.lane.b32.xlu1 %v1196_v46, %s2616_s11 }
 0x1c8   :  { %1228 = vrot.lane.b32.xlu0 %v1195_v14, %s2616_s11  ;;  %v3367_v14 = vld [vmem:[%s5055_s0 + $0x28] sm:$0xff] }
 0x1c9   :  { %v3346_v51 = vpop.permute.xlu2 %1050  ;;  %v3348_v7 = vpop.permute.xlu1 %972  ;;  %v1273_v39 = vmul.f32 %v3367_v14, %v1267_v15 }
 0x1ca   :  { %5283 = vst [vmem:[#allocation113_spill] sm:$0xff] %v3346_v51  ;;  %v3350_v0 = vpop.permute.xlu0 %970 }
 0x1cb   :  { %5284 = vst [vmem:[#allocation114_spill] sm:$0xff] %v3350_v0 }
 0x1cf   :  { %1296 = vrot.lane.b32.xlu2 %v1270_v37, %s2617_s13  ;;  %1294 = vrot.lane.b32.xlu1 %v1269_v45, %s2617_s13  ;;  %v3373_v37 = vld [vmem:[%s5055_s0 + $0x20] sm:$0xff]  ;;  %v1271_v45 = vmul.f32 %v1267_v15, %v3052_v2 }
 0x1d0   :  { %1292 = vrot.lane.b32.xlu0 %v1268_v25, %s2617_s13  ;;  %v1272_v25 = vmul.f32 %v3373_v37, %v1267_v15 }
 0x1d1   :  { %v3358_v46 = vpop.permute.xlu2 %1056  ;;  %v3360_v53 = vpop.permute.xlu1 %978 }
 0x1d2   :  { %v3362_v10 = vpop.permute.xlu0 %976 }
 0x1d7   :  { %1302 = vrot.lane.b32.xlu2 %v1273_v39, %s2617_s13  ;;  %1300 = vrot.lane.b32.xlu1 %v1272_v25, %s2617_s13  ;;  %v3396_v39 = vld [vmem:[%s5055_s0 + $0x30] sm:$0xff] }
 0x1d8   :  { %1298 = vrot.lane.b32.xlu0 %v1271_v45, %s2617_s13  ;;  %5289 = vst [vmem:[#allocation119_spill] sm:$0xff] %v3396_v39  ;;  %v1274_v25 = vmul.f32 %v3396_v39, %v1267_v15 }
 0x1d9   :  { %v3380_v38 = vpop.permute.xlu2 %1062  ;;  %v3382_v16 = vpop.permute.xlu1 %984 }
 0x1da   :  { %5285 = vst [vmem:[#allocation115_spill] sm:$0xff] %v3380_v38  ;;  %v3384_v60 = vpop.permute.xlu0 %982 }
 0x1db   :  { %5286 = vst [vmem:[#allocation116_spill] sm:$0xff] %v3382_v16 }
 0x1dc   :  { %5287 = vst [vmem:[#allocation117_spill] sm:$0xff] %v3384_v60 }
 0x1df   :  { %1308 = vrot.lane.b32.xlu2 %v1276_v33, %s2617_s13  ;;  %1306 = vrot.lane.b32.xlu1 %v1275_v26, %s2617_s13  ;;  %v1349_v26 = vstv %s2532_s10  ;;  %s3584_s10 = sld [smem:[#allocation3 + $0x8]] }
 0x1e0   :  { %1304 = vrot.lane.b32.xlu0 %v1274_v25, %s2617_s13  ;;  %v1352_v52 = vmul.f32 %v1349_v26, %v3021_v48  ;;  %v1351_v56 = vmul.f32 %v1349_v26, %v3026_v19  ;;  %v1350_v0 = vmul.f32 %v1349_v26, %v3035_v47  ;;  %v1355_v15 = vmul.f32 %v3367_v14, %v1349_v26 }
 0x1e1   :  { %v3402_v45 = vpop.permute.xlu2 %1068  ;;  %v3404_v3 = vpop.permute.xlu1 %1048  ;;  %v1353_v12 = vmul.f32 %v1349_v26, %v3052_v2  ;;  %v1361_v51 = vmul.f32 %v1349_v26, %v3082_v40  ;;  %v1360_v24 = vmul.f32 %v1349_v26, %v3087_v6  ;;  %v1359_v48 = vmul.f32 %v1349_v26, %v3096_v63 }
 0x1e2   :  { %5290 = vst [vmem:[#allocation120_spill] sm:$0xff] %v3402_v45  ;;  %v3406_v27 = vpop.permute.xlu0 %1046 }
 0x1e3   :  { %5291 = vst [vmem:[#allocation121_spill] sm:$0xff] %v3404_v3  ;;  %v1356_v3 = vmul.f32 %v3396_v39, %v1349_v26 }
 0x1e4   :  { %5292 = vst [vmem:[#allocation122_spill] sm:$0xff] %v3406_v27  ;;  %v1357_v27 = vmul.f32 %v3390_v32, %v1349_v26 }
 0x1e7   :  { %1314 = vrot.lane.b32.xlu2 %v1279_v5, %s2617_s13  ;;  %1312 = vrot.lane.b32.xlu1 %v1278_v18, %s2617_s13 }
 0x1e8   :  { %1310 = vrot.lane.b32.xlu0 %v1277_v4, %s2617_s13 }
 0x1e9   :  { %v3414_v33 = vpop.permute.xlu2 %1132  ;;  %v3416_v25 = vpop.permute.xlu1 %1054 }
 0x1ea   :  { %5293 = vst [vmem:[#allocation123_spill] sm:$0xff] %v3414_v33  ;;  %v3418_v17 = vpop.permute.xlu0 %1052  ;;  %v1358_v33 = vmul.f32 %v1349_v26, %v3065_v9 }
 0x1eb   :  { %5294 = vst [vmem:[#allocation124_spill] sm:$0xff] %v3418_v17  ;;  %v1354_v17 = vmul.f32 %v3373_v37, %v1349_v26 }
 0x1ef   :  { %1378 = vrot.lane.b32.xlu2 %v1352_v52, %s2618_s15  ;;  %1376 = vrot.lane.b32.xlu1 %v1351_v56, %s2618_s15 }
 0x1f0   :  { %1374 = vrot.lane.b32.xlu0 %v1350_v0, %s2618_s15 }
 0x1f1   :  { %v3426_v4 = vpop.permute.xlu2 %1138  ;;  %v3428_v5 = vpop.permute.xlu1 %1060 }
 0x1f2   :  { %v3430_v18 = vpop.permute.xlu0 %1058 }
 0x1f7   :  { %1384 = vrot.lane.b32.xlu2 %v1355_v15, %s2618_s15  ;;  %1382 = vrot.lane.b32.xlu1 %v1354_v17, %s2618_s15 }
 0x1f8   :  { %1380 = vrot.lane.b32.xlu0 %v1353_v12, %s2618_s15 }
 0x1f9   :  { %v1145_v52 = vpop.permute.xlu2 %1144  ;;  %v3438_v56 = vpop.permute.xlu1 %1066 }
 0x1fa   :  { %5295 = vst [vmem:[#allocation125_spill] sm:$0xff] %v3438_v56  ;;  %v3440_v0 = vpop.permute.xlu0 %1064  ;;  %v774_v56 = vmul.f32 %v3503_v42, %v3082_v40 }
 0x1fb   :  { %5296 = vst [vmem:[#allocation126_spill] sm:$0xff] %v3440_v0 }
 0x1fc   :  { %v856_v60 = vadd.f32 %v3238_v36, %v774_v56 }
 0x1fe   :  { %v938_v40 = vadd.f32 %v3286_v55, %v856_v60 }
 0x1ff   :  { %1390 = vrot.lane.b32.xlu2 %v1358_v33, %s2618_s15  ;;  %1388 = vrot.lane.b32.xlu1 %v1357_v27, %s2618_s15  ;;  %v3465_v27 = vstv %s2516_s12  ;;  %v3470_v33 = vld [vmem:[%s5055_s0 + $0x8] sm:$0xfc] }
 0x200   :  { %1386 = vrot.lane.b32.xlu0 %v1356_v3, %s2618_s15  ;;  %v3463_v3 = vld [vmem:[%s5055_s0 + $0x10] sm:$0xfc]  ;;  %v1516_v60 = vmul.f32 %v3396_v39, %v3465_v27 }
 0x201   :  { %v3448_v17 = vpop.permute.xlu2 %1150  ;;  %v3450_v12 = vpop.permute.xlu1 %1130 }
 0x202   :  { %5297 = vst [vmem:[#allocation127_spill] sm:$0xff] %v3450_v12  ;;  %v3452_v15 = vpop.permute.xlu0 %1128  ;;  %v1511_v12 = vmul.f32 %v3465_v27, %v3470_v33 }
 0x203   :  { %5298 = vst [vmem:[#allocation128_spill] sm:$0xff] %v3452_v15 }
 0x207   :  { %1396 = vrot.lane.b32.xlu2 %v1361_v51, %s2618_s15  ;;  %1394 = vrot.lane.b32.xlu1 %v1360_v24, %s2618_s15  ;;  %v3479_v24 = vld [vmem:[%s5055_s0] sm:$0xfc]  ;;  %v1512_v51 = vmul.f32 %v3465_v27, %v3463_v3 }
 0x208   :  { %1392 = vrot.lane.b32.xlu0 %v1359_v48, %s2618_s15  ;;  %v1510_v49 = vmul.f32 %v3465_v27, %v3479_v24 }
 0x209   :  { %v3472_v15 = vpop.permute.xlu2 %1214  ;;  %v3474_v26 = vpop.permute.xlu1 %1136 }
 0x20a   :  { %v3481_v48 = vpop.permute.xlu0 %1134 }
 0x20b   :  { %5299 = vst [vmem:[#allocation129_spill] sm:$0xff] %v3481_v48  ;;  %v3499_v48 = vld [vmem:[%s5055_s0 + $0x18] sm:$0xfc] }
 0x20c   :  { %5301 = vst [vmem:[#allocation131_spill] sm:$0xff] %v3499_v48  ;;  %v1513_v44 = vmul.f32 %v3465_v27, %v3499_v48 }
 0x20f   :  { %1538 = vrot.lane.b32.xlu2 %v1512_v51, %s2611_s2  ;;  %1536 = vrot.lane.b32.xlu1 %v1511_v12, %s2611_s2  ;;  %v1514_v51 = vmul.f32 %v3373_v37, %v3465_v27 }
 0x210   :  { %1534 = vrot.lane.b32.xlu0 %v1510_v49, %s2611_s2  ;;  %v1515_v49 = vmul.f32 %v3367_v14, %v3465_v27 }
 0x211   :  { %v3492_v38 = vpop.permute.xlu2 %1220  ;;  %v3494_v0 = vpop.permute.xlu1 %1142 }
 0x212   :  { %5300 = vst [vmem:[#allocation130_spill] sm:$0xff] %v3494_v0  ;;  %v3501_v61 = vpop.permute.xlu0 %1140 }
 0x213   :  { %5302 = vst [vmem:[#allocation132_spill] sm:$0xff] %v3501_v61  ;;  %v3508_v12 = vsel %vm471_vm0, %v3501_v61, %v3494_v0  ;;  %v1020_v61 = vadd.f32 %v3334_v59, %v938_v40  ;;  %v763_v40 = vmul.f32 %v3503_v42, %v3035_v47  ;;  %v909_v47 = vsel %vm222_vm2, %v3300_v43, %v3262_v41 }
 0x214   :  { %5303 = vst [vmem:[#allocation133_spill] sm:$0xff] %v3508_v12  ;;  %v3525_v12 = vld [vmem:[%s5055_s0 + $0x40] sm:$0x3f]  ;;  %v825_v43 = vsel %vm139_vm1, %v3240_v22, %v3202_v62 }
 0x215   :  { %5304 = vst [vmem:[#allocation134_spill] sm:$0xff] %v3525_v12  ;;  %v1518_v56 = vmul.f32 %v3465_v27, %v3525_v12  ;;  %v1102_v12 = vadd.f32 %v3402_v45, %v1020_v61  ;;  %v3577_v61 = vld [vmem:[%s5055_s0 + $0x58] sm:$0x3f] }
 0x216   :  { %v1521_v45 = vmul.f32 %v3465_v27, %v3577_v61 }
 0x217   :  { %1544 = vrot.lane.b32.xlu2 %v1515_v49, %s2611_s2  ;;  %1542 = vrot.lane.b32.xlu1 %v1514_v51, %s2611_s2 }
 0x218   :  { %1540 = vrot.lane.b32.xlu0 %v1513_v44, %s2611_s2 }
 0x219   :  { %v3527_v16 = vpop.permute.xlu2 %1226  ;;  %v1149_v0 = vpop.permute.xlu1 %1148 }
 0x21a   :  { %5305 = vst [vmem:[#allocation135_spill] sm:$0xff] %v3527_v16  ;;  %v3532_v48 = vsel %vm471_vm0, %v1149_v0, %v3448_v17  ;;  %v1147_v49 = vpop.permute.xlu0 %1146  ;;  %v1517_v16 = vmul.f32 %v3390_v32, %v3465_v27 }
 0x21b   :  { %5306 = vst [vmem:[#allocation136_spill] sm:$0xff] %v3532_v48  ;;  %v3535_v51 = vsel %vm471_vm0, %v1145_v52, %v1147_v49  ;;  %v3538_v44 = vsel %vm471_vm0, %v1147_v49, %v1149_v0  ;;  %v767_v52 = vmul.f32 %v3373_v37, %v3503_v42  ;;  %v764_v0 = vmul.f32 %v3503_v42, %v3026_v19 }
 0x21c   :  { %5307 = vst [vmem:[#allocation137_spill] sm:$0xff] %v3535_v51  ;;  %v827_v49 = vsel %vm139_vm1, %v3252_v35, %v3214_v54  ;;  %v770_v51 = vmul.f32 %v3390_v32, %v3503_v42  ;;  %v768_v19 = vmul.f32 %v3367_v14, %v3503_v42  ;;  %v769_v35 = vmul.f32 %v3396_v39, %v3503_v42  ;;  %v3598_v39 = vld [vmem:[%s5055_s0 + $0x48] sm:$0x3f] }
 0x21d   :  { %5308 = vst [vmem:[#allocation138_spill] sm:$0xff] %v3538_v44  ;;  %v3559_v44 = vmul.f32 %v3503_v42, %v3052_v2  ;;  %v1184_v2 = vadd.f32 %v3448_v17, %v1102_v12  ;;  %v773_v17 = vmul.f32 %v3503_v42, %v3087_v6  ;;  %v771_v12 = vmul.f32 %v3503_v42, %v3065_v9 }
 0x21e   :  { %5311 = vst [vmem:[#allocation141_spill] sm:$0xff] %v3598_v39  ;;  %v824_v32 = vsel %vm139_vm1, %v3242_v1, %v3240_v22  ;;  %v828_v1 = vsel %vm139_vm1, %v3214_v54, %v3266_v20 }
 0x21f   :  { %5309 = vst [vmem:[#allocation139_spill] sm:$0xff] %v3559_v44  ;;  %1550 = vrot.lane.b32.xlu2 %v1518_v56, %s2611_s2  ;;  %1548 = vrot.lane.b32.xlu1 %v1517_v16, %s2611_s2  ;;  %v3582_v16 = vld [vmem:[%s5055_s0 + $0x50] sm:$0x3f]  ;;  %v849_v56 = vadd.f32 %v827_v49, %v767_v52  ;;  %v991_v52 = vsel %vm305_vm3, %v3348_v7, %v3310_v50 }
 0x220   :  { %1546 = vrot.lane.b32.xlu0 %v1516_v60, %s2611_s2  ;;  %5310 = vst [vmem:[#allocation140_spill] sm:$0xff] %v3582_v16  ;;  %v1520_v22 = vmul.f32 %v3465_v27, %v3582_v16  ;;  %v772_v7 = vmul.f32 %v3503_v42, %v3096_v63  ;;  %v830_v63 = vsel %vm139_vm1, %v3226_v28, %v3278_v23 }
 0x221   :  { %v3593_v60 = vpop.permute.xlu2 %1232  ;;  %v1213_v44 = vpop.permute.xlu1 %1212  ;;  %v931_v48 = vadd.f32 %v909_v47, %v849_v56  ;;  %v1073_v47 = vsel %vm388_vm4, %v3416_v25, %v3358_v46  ;;  %v832_v56 = vsel %vm139_vm1, %v3276_v58, %v3238_v36  ;;  %v3641_v25 = vadd.f32 %v824_v32, %v763_v40 }
 0x222   :  { %v3607_v6 = vadd.f32 %v3593_v60, %v1184_v2  ;;  %v3611_v9 = vsel %vm554_vm5, %v1213_v44, %v3472_v15  ;;  %v1211_v49 = vpop.permute.xlu0 %1210  ;;  %v829_v2 = vsel %vm139_vm1, %v3266_v20, %v3264_v13  ;;  %v1155_v20 = vsel %vm471_vm0, %v3474_v26, %v3426_v4 }
 0x223   :  { %v3614_v62 = vsel %vm554_vm5, %v1211_v49, %v1213_v44  ;;  %v1519_v44 = vmul.f32 %v3465_v27, %v3598_v39  ;;  %v1013_v54 = vadd.f32 %v991_v52, %v931_v48  ;;  %v3639_v49 = vadd.f32 %v825_v43, %v764_v0 }
 0x224   :  { %v831_v27 = vsel %vm139_vm1, %v3278_v23, %v3276_v58  ;;  %v852_v36 = vadd.f32 %v3264_v13, %v770_v51  ;;  %v850_v39 = vadd.f32 %v828_v1, %v768_v19  ;;  %v851_v28 = vadd.f32 %v829_v2, %v769_v35 }
 0x225   :  { %v1095_v16 = vadd.f32 %v1073_v47, %v1013_v54  ;;  %v855_v48 = vadd.f32 %v832_v56, %v773_v17  ;;  %v853_v32 = vadd.f32 %v830_v63, %v771_v12  ;;  %v3654_v0 = vstv %s3584_s10 }
 0x226   :  { %v854_v58 = vadd.f32 %v831_v27, %v772_v7  ;;  %v910_v23 = vsel %vm222_vm2, %v3262_v41, %v3314_v34  ;;  %v911_v13 = vsel %vm222_vm2, %v3314_v34, %v3312_v30  ;;  %v934_v40 = vadd.f32 %v3312_v30, %v852_v36  ;;  %v5314_v27 = vld [vmem:[#allocation116_spill] sm:$0xff] }
 0x227   :  { %1556 = vrot.lane.b32.xlu2 %v1521_v45, %s2611_s2  ;;  %1554 = vrot.lane.b32.xlu1 %v1520_v22, %s2611_s2  ;;  %v1177_v26 = vadd.f32 %v1155_v20, %v1095_v16  ;;  %v992_v19 = vsel %vm305_vm3, %v3310_v50, %v3362_v10  ;;  %v993_v35 = vsel %vm305_vm3, %v3362_v10, %v3360_v53  ;;  %v5316_v20 = vld [vmem:[#allocation110_spill] sm:$0xff] }
 0x228   :  { %1552 = vrot.lane.b32.xlu0 %v1519_v44, %s2611_s2  ;;  %v1594_v30 = vmul.f32 %v3654_v0, %v3463_v3  ;;  %v1593_v50 = vmul.f32 %v3654_v0, %v3470_v33  ;;  %v932_v17 = vadd.f32 %v910_v23, %v850_v39  ;;  %v933_v10 = vadd.f32 %v911_v13, %v851_v28  ;;  %v5312_v44 = vld [vmem:[#allocation132_spill] sm:$0xff]  ;;  %v5317_v13 = vld [vmem:[#allocation133_spill] sm:$0xff]  ;;  %s2524_s2 = sld [smem:[#allocation3 + $0xf]] }
 0x229   :  { %v3662_v45 = vpop.permute.xlu2 %1296  ;;  %v1219_v51 = vpop.permute.xlu1 %1218  ;;  %v1016_v12 = vadd.f32 %v3360_v53, %v934_v40  ;;  %v1592_v52 = vmul.f32 %v3654_v0, %v3479_v24  ;;  %v914_v22 = vsel %vm222_vm2, %v3324_v31, %v3286_v55  ;;  %v1074_v1 = vsel %vm388_vm4, %v3358_v46, %v3430_v18 }
 0x22a   :  { %v1237_v41 = vsel %vm554_vm5, %v1219_v51, %v3492_v38  ;;  %v3673_v43 = vpop.permute.xlu0 %1216  ;;  %v1075_v39 = vsel %vm388_vm4, %v3430_v18, %v3428_v5  ;;  %v913_v53 = vsel %vm222_vm2, %v3326_v11, %v3324_v31  ;;  %v1014_v7 = vadd.f32 %v992_v19, %v932_v17 }
 0x22b   :  { %v3675_v34 = vadd.f32 %v1237_v41, %v1177_v26  ;;  %v3680_v16 = vsel %vm554_vm5, %v3472_v15, %v3673_v43  ;;  %v912_v15 = vsel %vm222_vm2, %v3274_v29, %v3326_v11  ;;  %v1015_v47 = vadd.f32 %v993_v35, %v933_v10  ;;  %v5318_v35 = vld [vmem:[#allocation120_spill] sm:$0xff]  ;;  %v5319_v41 = vld [vmem:[#allocation125_spill] sm:$0xff]  ;;  %v5320_v10 = vld [vmem:[#allocation131_spill] sm:$0xff] }
 0x22c   :  { %v1098_v55 = vadd.f32 %v3428_v5, %v1016_v12  ;;  %v907_v29 = vsel %vm222_vm2, %v3288_v57, %v3250_v8  ;;  %v906_v46 = vsel %vm222_vm2, %v3290_v21, %v3288_v57  ;;  %v1156_v18 = vsel %vm471_vm0, %v3426_v4, %v5312_v44  ;;  %v5313_v5 = vld [vmem:[#allocation130_spill] sm:$0xff]  ;;  %v5315_v21 = vld [vmem:[#allocation117_spill] sm:$0xff] }
 0x22d   :  { %v937_v31 = vadd.f32 %v914_v22, %v855_v48  ;;  %v1096_v11 = vadd.f32 %v1074_v1, %v1014_v7  ;;  %v1097_v2 = vadd.f32 %v1075_v39, %v1015_v47  ;;  %v935_v63 = vadd.f32 %v912_v15, %v853_v32  ;;  %v5323_v1 = vld [vmem:[#allocation126_spill] sm:$0xff]  ;;  %v5324_v39 = vld [vmem:[#allocation115_spill] sm:$0xff] }
 0x22e   :  { %v1180_v56 = vadd.f32 %v5313_v5, %v1098_v55  ;;  %v936_v54 = vadd.f32 %v913_v53, %v854_v58  ;;  %v996_v57 = vsel %vm305_vm3, %v5314_v27, %v3334_v59  ;;  %v994_v4 = vsel %vm305_vm3, %v5316_v20, %v5315_v21  ;;  %v5325_v55 = vld [vmem:[#allocation112_spill] sm:$0xff] }
 0x22f   :  { %1620 = vrot.lane.b32.xlu2 %v1594_v30, %s2612_s27  ;;  %1618 = vrot.lane.b32.xlu1 %v1593_v50, %s2612_s27  ;;  %v995_v48 = vsel %vm305_vm3, %v5315_v21, %v5314_v27  ;;  %v1178_v23 = vadd.f32 %v1156_v18, %v1096_v11  ;;  %v1179_v26 = vadd.f32 %v5317_v13, %v1097_v2  ;;  %v5326_v2 = vld [vmem:[#allocation63_spill] sm:$0xff] }
 0x230   :  { %1616 = vrot.lane.b32.xlu0 %v1592_v52, %s2612_s27  ;;  %v1597_v40 = vmul.f32 %v3367_v14, %v3654_v0  ;;  %v1596_v19 = vmul.f32 %v3373_v37, %v3654_v0  ;;  %v1078_v30 = vsel %vm388_vm4, %v5319_v41, %v5318_v35  ;;  %v1595_v12 = vmul.f32 %v3654_v0, %v5320_v10  ;;  %v5322_v52 = vld [vmem:[#allocation111_spill] sm:$0xff]  ;;  %v5335_v35 = vld [vmem:[#allocation134_spill] sm:$0xff] }
 0x231   :  { %v3724_v36 = vpop.permute.xlu2 %1302  ;;  %v1225_v28 = vpop.permute.xlu1 %1224  ;;  %v1019_v15 = vadd.f32 %v996_v57, %v937_v31  ;;  %v1076_v53 = vsel %vm388_vm4, %v5324_v39, %v5323_v1  ;;  %v1077_v7 = vsel %vm388_vm4, %v5323_v1, %v5319_v41  ;;  %v928_v47 = vadd.f32 %v907_v29, %v3639_v49  ;;  %v5327_v27 = vld [vmem:[#allocation107_spill] sm:$0xff]  ;;  %v5328_v57 = vld [vmem:[#allocation100_spill] sm:$0xff] }
 0x232   :  { %v3730_v32 = vadd.f32 %v1225_v28, %v1180_v56  ;;  %v1223_v58 = vpop.permute.xlu0 %1222  ;;  %v988_v44 = vsel %vm305_vm3, %v5325_v55, %v5322_v52  ;;  %v1017_v18 = vadd.f32 %v994_v4, %v935_v63  ;;  %v1018_v11 = vadd.f32 %v995_v48, %v936_v54  ;;  %v5329_v54 = vld [vmem:[#allocation113_spill] sm:$0xff]  ;;  %v5338_v39 = vld [vmem:[#allocation123_spill] sm:$0xff] }
 0x233   :  { %v1238_v59 = vsel %vm554_vm5, %v3492_v38, %v1223_v58  ;;  %v1239_v51 = vsel %vm554_vm5, %v1223_v58, %v1225_v28  ;;  %v5321_v38 = vld [vmem:[#allocation108_spill] sm:$0xff]  ;;  %v765_v5 = vmul.f32 %v3503_v42, %v5326_v2  ;;  %v927_v31 = vadd.f32 %v906_v46, %v3641_v25  ;;  %v5330_v4 = vld [vmem:[#allocation121_spill] sm:$0xff]  ;;  %v5331_v25 = vld [vmem:[#allocation122_spill] sm:$0xff] }
 0x234   :  { %v3742_v50 = vadd.f32 %v1238_v59, %v1178_v23  ;;  %v3744_v17 = vadd.f32 %v1239_v51, %v1179_v26  ;;  %v989_v22 = vsel %vm305_vm3, %v5322_v52, %v5321_v38  ;;  %v1101_v56 = vadd.f32 %v1078_v30, %v1019_v15  ;;  %v5332_v28 = vld [vmem:[#allocation136_spill] sm:$0xff]  ;;  %v5333_v26 = vld [vmem:[#allocation137_spill] sm:$0xff]  ;;  %v5334_v59 = vld [vmem:[#allocation138_spill] sm:$0xff] }
 0x235   :  { %v826_v49 = vsel %vm139_vm1, %v5328_v57, %v5327_v27  ;;  %v1010_v29 = vadd.f32 %v989_v22, %v928_v47  ;;  %v1099_v21 = vadd.f32 %v1076_v53, %v1017_v18  ;;  %v1100_v20 = vadd.f32 %v1077_v7, %v1018_v11  ;;  %v5337_v15 = vld [vmem:[#allocation118_spill] sm:$0xff]  ;;  %v5339_v53 = vld [vmem:[#allocation127_spill] sm:$0xff]  ;;  %v5343_v57 = vld [vmem:[#allocation109_spill] sm:$0xff] }
 0x236   :  { %v1009_v63 = vadd.f32 %v988_v44, %v927_v31  ;;  %v1071_v42 = vsel %vm388_vm4, %v5330_v4, %v5329_v54  ;;  %v1070_v46 = vsel %vm388_vm4, %v5331_v25, %v5330_v4  ;;  %v1183_v48 = vadd.f32 %v5332_v28, %v1101_v56  ;;  %v5340_v55 = vld [vmem:[#allocation119_spill] sm:$0xff]  ;;  %v5342_v31 = vld [vmem:[#allocation128_spill] sm:$0xff] }
 0x237   :  { %1626 = vrot.lane.b32.xlu2 %v1597_v40, %s2612_s27  ;;  %1624 = vrot.lane.b32.xlu1 %v1596_v19, %s2612_s27  ;;  %v1181_v58 = vadd.f32 %v5333_v26, %v1099_v21  ;;  %v1182_v51 = vadd.f32 %v5334_v59, %v1100_v20  ;;  %v1600_v41 = vmul.f32 %v3654_v0, %v5335_v35  ;;  %v5341_v18 = vld [vmem:[#allocation139_spill] sm:$0xff] }
 0x238   :  { %1622 = vrot.lane.b32.xlu0 %v1595_v12, %s2612_s27  ;;  %v5336_v12 = vld [vmem:[#allocation135_spill] sm:$0xff]  ;;  %v1599_v1 = vmul.f32 %v5337_v15, %v3654_v0  ;;  %v1153_v7 = vsel %vm471_vm0, %v5339_v53, %v5338_v39  ;;  %v1598_v44 = vmul.f32 %v5340_v55, %v3654_v0  ;;  %v848_v11 = vadd.f32 %v5327_v27, %v5341_v18 }
 0x239   :  { %v3777_v23 = vpop.permute.xlu2 %1308  ;;  %v1231_v13 = vpop.permute.xlu1 %1230  ;;  %v1092_v2 = vadd.f32 %v1071_v42, %v1010_v29  ;;  %v1152_v56 = vsel %vm471_vm0, %v5342_v31, %v5339_v53  ;;  %v908_v21 = vsel %vm222_vm2, %v3250_v8, %v5343_v57  ;;  %v1091_v20 = vadd.f32 %v1070_v46, %v1009_v63  ;;  %v5344_v42 = vld [vmem:[#allocation114_spill] sm:$0xff]  ;;  %v5345_v46 = vld [vmem:[#allocation124_spill] sm:$0xff] }
 0x23a   :  { %v1242_v40 = vsel %vm554_vm5, %v1231_v13, %v3593_v60  ;;  %v1229_v19 = vpop.permute.xlu0 %1228  ;;  %v847_v4 = vadd.f32 %v826_v49, %v765_v5  ;;  %v930_v25 = vadd.f32 %v5343_v57, %v848_v11 }
 0x23b   :  { %v3785_v30 = vadd.f32 %v1242_v40, %v1183_v48  ;;  %v1240_v52 = vsel %vm554_vm5, %v5336_v12, %v1229_v19  ;;  %v1241_v22 = vsel %vm554_vm5, %v1229_v19, %v1231_v13  ;;  %v1174_v28 = vadd.f32 %v1153_v7, %v1092_v2  ;;  %v5346_v19 = vld [vmem:[#allocation140_spill] sm:$0xff] }
 0x23c   :  { %v3795_v47 = vadd.f32 %v1240_v52, %v1181_v58  ;;  %v3797_v60 = vadd.f32 %v1241_v22, %v1182_v51  ;;  %v1173_v27 = vadd.f32 %v1152_v56, %v1091_v20  ;;  %v929_v29 = vadd.f32 %v908_v21, %v847_v4  ;;  %v5348_v22 = vld [vmem:[#allocation129_spill] sm:$0xff] }
 0x23d   :  { %v990_v48 = vsel %vm305_vm3, %v5321_v38, %v5344_v42  ;;  %v1012_v8 = vadd.f32 %v5344_v42, %v930_v25  ;;  %v1256_v5 = vadd.f32 %v3611_v9, %v1174_v28  ;;  %v1072_v13 = vsel %vm388_vm4, %v5329_v54, %v5345_v46 }
 0x23e   :  { %v1255_v26 = vadd.f32 %v3614_v62, %v1173_v27  ;;  %v1603_v9 = vmul.f32 %v3654_v0, %v3577_v61  ;;  %v1011_v54 = vadd.f32 %v990_v48, %v929_v29  ;;  %v5347_v62 = vld [vmem:[#allocation141_spill] sm:$0xff] }
 0x23f   :  { %1632 = vrot.lane.b32.xlu2 %v1600_v41, %s2612_s27  ;;  %1630 = vrot.lane.b32.xlu1 %v1599_v1, %s2612_s27  ;;  %v1602_v41 = vmul.f32 %v3654_v0, %v5346_v19  ;;  %v1094_v52 = vadd.f32 %v5345_v46, %v1012_v8  ;;  %v1154_v1 = vsel %vm471_vm0, %v5338_v39, %v5348_v22 }
 0x240   :  { %1628 = vrot.lane.b32.xlu0 %v1598_v44, %s2612_s27  ;;  %v1093_v53 = vadd.f32 %v1072_v13, %v1011_v54  ;;  %v1673_v44 = vstv %s2524_s2 }
 0x241   :  { %v1315_v49 = vpop.permute.xlu2 %1314  ;;  %v1295_v63 = vpop.permute.xlu1 %1294  ;;  %v1176_v7 = vadd.f32 %v5348_v22, %v1094_v52  ;;  %v1676_v57 = vmul.f32 %v1673_v44, %v3463_v3  ;;  %v1675_v25 = vmul.f32 %v1673_v44, %v3470_v33  ;;  %v1674_v28 = vmul.f32 %v1673_v44, %v3479_v24 }
 0x242   :  { %v3823_v58 = vadd.f32 %v1315_v49, %v3607_v6  ;;  %v1317_v59 = vsel %vm637_vm6, %v1295_v63, %v3662_v45  ;;  %v1293_v51 = vpop.permute.xlu0 %1292  ;;  %v1601_v6 = vmul.f32 %v3654_v0, %v5347_v62  ;;  %v1175_v18 = vadd.f32 %v1154_v1, %v1093_v53 }
 0x243   :  { %v3827_v38 = vadd.f32 %v1317_v59, %v1256_v5  ;;  %v1316_v40 = vsel %vm637_vm6, %v1293_v51, %v1295_v63  ;;  %v1258_v11 = vadd.f32 %v3673_v43, %v1176_v7  ;;  %v1679_v48 = vmul.f32 %v3367_v14, %v1673_v44 }
 0x244   :  { %v3834_v12 = vadd.f32 %v1316_v40, %v1255_v26  ;;  %v1257_v31 = vadd.f32 %v3680_v16, %v1175_v18  ;;  %v1678_v8 = vmul.f32 %v3373_v37, %v1673_v44  ;;  %v1677_v46 = vmul.f32 %v1673_v44, %v5320_v10 }
 0x245   :  { %v1681_v40 = vmul.f32 %v5337_v15, %v1673_v44  ;;  %v1685_v22 = vmul.f32 %v1673_v44, %v3577_v61  ;;  %v1684_v1 = vmul.f32 %v1673_v44, %v5346_v19  ;;  %v1683_v7 = vmul.f32 %v1673_v44, %v5347_v62 }
 0x247   :  { %1638 = vrot.lane.b32.xlu2 %v1603_v9, %s2612_s27  ;;  %1636 = vrot.lane.b32.xlu1 %v1602_v41, %s2612_s27 }
 0x248   :  { %1634 = vrot.lane.b32.xlu0 %v1601_v6, %s2612_s27  ;;  %s2525_s27 = sld [smem:[#allocation3 + $0x10]] }
 0x249   :  { %v3847_v0 = vpop.permute.xlu2 %1378  ;;  %v1301_v2 = vpop.permute.xlu1 %1300 }
 0x24a   :  { %v1319_v39 = vsel %vm637_vm6, %v1301_v2, %v3724_v36  ;;  %v1299_v56 = vpop.permute.xlu0 %1298 }
 0x24b   :  { %v1341_v21 = vadd.f32 %v1319_v39, %v3675_v34  ;;  %v1318_v20 = vsel %vm637_vm6, %v3662_v45, %v1299_v56  ;;  %v1340_v4 = vadd.f32 %v1299_v56, %v1258_v11 }
 0x24c   :  { %v1339_v43 = vadd.f32 %v1318_v20, %v1257_v31 }
 0x24f   :  { %1702 = vrot.lane.b32.xlu2 %v1676_v57, %s2613_s29  ;;  %1700 = vrot.lane.b32.xlu1 %v1675_v25, %s2613_s29 }
 0x250   :  { %1698 = vrot.lane.b32.xlu0 %v1674_v28, %s2613_s29 }
 0x251   :  { %v3861_v16 = vpop.permute.xlu2 %1384  ;;  %v1307_v27 = vpop.permute.xlu1 %1306 }
 0x252   :  { %v3864_v34 = vadd.f32 %v1307_v27, %v3730_v32  ;;  %v1305_v29 = vpop.permute.xlu0 %1304 }
 0x253   :  { %v1320_v45 = vsel %vm637_vm6, %v3724_v36, %v1305_v29  ;;  %v1321_v42 = vsel %vm637_vm6, %v1305_v29, %v1307_v27 }
 0x254   :  { %v3872_v5 = vadd.f32 %v1320_v45, %v3742_v50  ;;  %v3875_v63 = vadd.f32 %v1321_v42, %v3744_v17  ;;  %v1682_v50 = vmul.f32 %v1673_v44, %v5335_v35 }
 0x257   :  { %1708 = vrot.lane.b32.xlu2 %v1679_v48, %s2613_s29  ;;  %1706 = vrot.lane.b32.xlu1 %v1678_v8, %s2613_s29 }
 0x258   :  { %1704 = vrot.lane.b32.xlu0 %v1677_v46, %s2613_s29 }
 0x259   :  { %v3881_v36 = vpop.permute.xlu2 %1390  ;;  %v1313_v32 = vpop.permute.xlu1 %1312 }
 0x25a   :  { %v1324_v13 = vsel %vm637_vm6, %v1313_v32, %v1315_v49  ;;  %v1311_v26 = vpop.permute.xlu0 %1310  ;;  %v1680_v49 = vmul.f32 %v5340_v55, %v1673_v44 }
 0x25b   :  { %v3886_v59 = vadd.f32 %v1324_v13, %v3785_v30  ;;  %v1322_v17 = vsel %vm637_vm6, %v3777_v23, %v1311_v26  ;;  %v1323_v51 = vsel %vm637_vm6, %v1311_v26, %v1313_v32 }
 0x25c   :  { %v3893_v9 = vadd.f32 %v1322_v17, %v3795_v47  ;;  %v3896_v41 = vadd.f32 %v1323_v51, %v3797_v60 }
 0x25f   :  { %1714 = vrot.lane.b32.xlu2 %v1682_v50, %s2613_s29  ;;  %1712 = vrot.lane.b32.xlu1 %v1681_v40, %s2613_s29 }
 0x260   :  { %1710 = vrot.lane.b32.xlu0 %v1680_v49, %s2613_s29 }
 0x261   :  { %v1397_v23 = vpop.permute.xlu2 %1396  ;;  %v1377_v30 = vpop.permute.xlu1 %1376 }
 0x262   :  { %v3903_v54 = vadd.f32 %v1397_v23, %v3823_v58  ;;  %v1399_v47 = vsel %vm720_vm7, %v1377_v30, %v3847_v0  ;;  %v1375_v60 = vpop.permute.xlu0 %1374  ;;  %v3915_v58 = vstv %s2525_s27 }
 0x263   :  { %v1420_v6 = vadd.f32 %v1399_v47, %v3827_v38  ;;  %v1398_v52 = vsel %vm720_vm7, %v1375_v60, %v1377_v30  ;;  %v1757_v56 = vmul.f32 %v3915_v58, %v3470_v33  ;;  %v1756_v20 = vmul.f32 %v3915_v58, %v3479_v24 }
 0x264   :  { %v1419_v53 = vadd.f32 %v1398_v52, %v3834_v12  ;;  %v1758_v12 = vmul.f32 %v3915_v58, %v3463_v3  ;;  %v1761_v29 = vmul.f32 %v3367_v14, %v3915_v58  ;;  %v1760_v45 = vmul.f32 %v3373_v37, %v3915_v58 }
 0x265   :  { %v5169_v42 = vrot.slane %v3903_v54, 1  ;;  %v1759_v46 = vmul.f32 %v3915_v58, %v5320_v10  ;;  %v1447_v50 = vrot.slane %v1420_v6, 1  ;;  %v1764_v52 = vmul.f32 %v3915_v58, %v5335_v35 }
 0x266   :  { %v1444_v25 = vrot.slane %v1419_v53, 1 }
 0x267   :  { %1720 = vrot.lane.b32.xlu2 %v1685_v22, %s2613_s29  ;;  %1718 = vrot.lane.b32.xlu1 %v1684_v1, %s2613_s29 }
 0x268   :  { %1716 = vrot.lane.b32.xlu0 %v1683_v7, %s2613_s29  ;;  %v1763_v7 = vmul.f32 %v5337_v15, %v3915_v58  ;;  %s2526_s29 = sld [smem:[#allocation3 + $0x11]] }
 0x269   :  { %v3918_v18 = vpop.permute.xlu2 %1538  ;;  %v1383_v38 = vpop.permute.xlu1 %1382 }
 0x26a   :  { %v1401_v11 = vsel %vm720_vm7, %v1383_v38, %v3861_v16  ;;  %v1381_v2 = vpop.permute.xlu0 %1380 }
 0x26b   :  { %v1423_v31 = vadd.f32 %v1401_v11, %v1341_v21  ;;  %v1400_v44 = vsel %vm720_vm7, %v3847_v0, %v1381_v2  ;;  %v1422_v39 = vadd.f32 %v1381_v2, %v1340_v4  ;;  %v1762_v11 = vmul.f32 %v5340_v55, %v3915_v58 }
 0x26c   :  { %v1421_v57 = vadd.f32 %v1400_v44, %v1339_v43 }
 0x26d   :  { %v1445_v28 = vrot.slane %v1423_v31, 1  ;;  %v1453_v32 = vrot.slane %v1422_v39, 1 }
 0x26e   :  { %v1450_v17 = vrot.slane %v1421_v57, 1 }
 0x26f   :  { %v3931_v27 = vsel %vm1443_vm8, %v1444_v25, %v1445_v28  ;;  %1784 = vrot.lane.b32.xlu2 %v1758_v12, %s2614_s7  ;;  %1782 = vrot.lane.b32.xlu1 %v1757_v56, %s2614_s7  ;;  %v1766_v25 = vmul.f32 %v3915_v58, %v5346_v19 }
 0x270   :  { %1780 = vrot.lane.b32.xlu0 %v1756_v20, %s2614_s7  ;;  %v1767_v20 = vmul.f32 %v3915_v58, %v3577_v61 }
 0x271   :  { %v3936_v0 = vpop.permute.xlu2 %1544  ;;  %v1389_v21 = vpop.permute.xlu1 %1388 }
 0x272   :  { %v1426_v4 = vadd.f32 %v1389_v21, %v3864_v34  ;;  %v1387_v43 = vpop.permute.xlu0 %1386 }
 0x273   :  { %v1402_v48 = vsel %vm720_vm7, %v3861_v16, %v1387_v43  ;;  %v1403_v8 = vsel %vm720_vm7, %v1387_v43, %v1389_v21  ;;  %v1837_v21 = vstv %s2526_s29 }
 0x274   :  { %v1454_v13 = vrot.slane %v1426_v4, 1  ;;  %v1424_v34 = vadd.f32 %v1402_v48, %v3872_v5  ;;  %v1425_v26 = vadd.f32 %v1403_v8, %v3875_v63  ;;  %v1840_v8 = vmul.f32 %v1837_v21, %v3463_v3 }
 0x276   :  { %v3952_v51 = vsel %vm1443_vm8, %v1453_v32, %v1454_v13  ;;  %v3957_v16 = vsel %vm1443_vm8, %v1454_v13, %v5169_v42  ;;  %v1448_v40 = vrot.slane %v1424_v34, 1  ;;  %v1451_v49 = vrot.slane %v1425_v26, 1 }
 0x277   :  { %1790 = vrot.lane.b32.xlu2 %v1761_v29, %s2614_s7  ;;  %1788 = vrot.lane.b32.xlu1 %v1760_v45, %s2614_s7 }
 0x278   :  { %v3962_v5 = vsel %vm1443_vm8, %v1447_v50, %v1448_v40  ;;  %v3965_v63 = vsel %vm1443_vm8, %v1450_v17, %v1451_v49  ;;  %1786 = vrot.lane.b32.xlu0 %v1759_v46, %s2614_s7  ;;  %v1838_v46 = vmul.f32 %v1837_v21, %v3479_v24  ;;  %v1843_v50 = vmul.f32 %v3367_v14, %v1837_v21 }
 0x279   :  { %v3968_v30 = vpop.permute.xlu2 %1550  ;;  %v1395_v47 = vpop.permute.xlu1 %1394  ;;  %v1842_v17 = vmul.f32 %v3373_v37, %v1837_v21 }
 0x27a   :  { %v1406_v60 = vsel %vm720_vm7, %v1395_v47, %v1397_v23  ;;  %v1393_v6 = vpop.permute.xlu0 %1392 }
 0x27b   :  { %v3974_v22 = vadd.f32 %v1406_v60, %v3886_v59  ;;  %v1404_v1 = vsel %vm720_vm7, %v3881_v36, %v1393_v6  ;;  %v1405_v53 = vsel %vm720_vm7, %v1393_v6, %v1395_v47 }
 0x27c   :  { %v3982_v38 = vadd.f32 %v1404_v1, %v3893_v9  ;;  %v3985_v23 = vadd.f32 %v1405_v53, %v3896_v41  ;;  %v1846_v1 = vmul.f32 %v1837_v21, %v5335_v35  ;;  %v1845_v53 = vmul.f32 %v5337_v15, %v1837_v21 }
 0x27d   :  { %v5168_v59 = vrot.slane %v3974_v22, 1 }
 0x27e   :  { %v5167_v2 = vrot.slane %v3982_v38, 1  ;;  %v5166_v36 = vrot.slane %v3985_v23, 1 }
 0x27f   :  { %v3995_v12 = vsel %vm1443_vm8, %v1451_v49, %v5168_v59  ;;  %1796 = vrot.lane.b32.xlu2 %v1764_v52, %s2614_s7  ;;  %1794 = vrot.lane.b32.xlu1 %v1763_v7, %s2614_s7 }
 0x280   :  { %v4002_v9 = vsel %vm1443_vm8, %v1445_v28, %v5167_v2  ;;  %v4007_v41 = vsel %vm1443_vm8, %v1448_v40, %v5166_v36  ;;  %1792 = vrot.lane.b32.xlu0 %v1762_v11, %s2614_s7  ;;  %v1765_v28 = vmul.f32 %v3915_v58, %v5347_v62  ;;  %v1839_v58 = vmul.f32 %v1837_v21, %v3470_v33  ;;  %v5367_v36 = vld [vmem:[#allocation11_spill] sm:$0xff] }
 0x281   :  { %v1557_v31 = vpop.permute.xlu2 %1556  ;;  %v1537_v44 = vpop.permute.xlu1 %1536  ;;  %v1841_v40 = vmul.f32 %v1837_v21, %v5320_v10  ;;  %v1844_v11 = vmul.f32 %v5340_v55, %v1837_v21 }
 0x282   :  { %v1559_v39 = vsel %vm139_vm1, %v1537_v44, %v3918_v18  ;;  %v1535_v56 = vpop.permute.xlu0 %1534 }
 0x283   :  { %v1558_v57 = vsel %vm139_vm1, %v1535_v56, %v1537_v44 }
 0x287   :  { %1802 = vrot.lane.b32.xlu2 %v1767_v20, %s2614_s7  ;;  %1800 = vrot.lane.b32.xlu1 %v1766_v25, %s2614_s7 }
 0x288   :  { %1798 = vrot.lane.b32.xlu0 %v1765_v28, %s2614_s7  ;;  %s2515_s7 = sld [smem:[#allocation3 + $0x6]] }
 0x289   :  { %v4022_v4 = vpop.permute.xlu2 %1620  ;;  %v1543_v43 = vpop.permute.xlu1 %1542 }
 0x28a   :  { %v1561_v29 = vsel %vm139_vm1, %v1543_v43, %v3936_v0  ;;  %v1541_v45 = vpop.permute.xlu0 %1540 }
 0x28b   :  { %v1560_v48 = vsel %vm139_vm1, %v3918_v18, %v1541_v45 }
 0x28e   :  { %v4054_v47 = vstv %s2515_s7 }
 0x28f   :  { %1866 = vrot.lane.b32.xlu2 %v1840_v8, %s2615_s9  ;;  %1864 = vrot.lane.b32.xlu1 %v1839_v58, %s2615_s9  ;;  %v1508_v7 = vmul.f32 %v4054_v47, %v3577_v61  ;;  %v1498_v44 = vmul.f32 %v4054_v47, %v3470_v33  ;;  %v1497_v56 = vmul.f32 %v4054_v47, %v3479_v24 }
 0x290   :  { %1862 = vrot.lane.b32.xlu0 %v1838_v46, %s2615_s9 }
 0x291   :  { %v4034_v32 = vpop.permute.xlu2 %1626  ;;  %v4036_v13 = vpop.permute.xlu1 %1548  ;;  %v1580_v20 = vadd.f32 %v1559_v39, %v1498_v44  ;;  %v1579_v43 = vadd.f32 %v1558_v57, %v1497_v56  ;;  %v1501_v57 = vmul.f32 %v3373_v37, %v4054_v47 }
 0x292   :  { %v1547_v34 = vpop.permute.xlu0 %1546 }
 0x293   :  { %v4040_v18 = vsel %vm139_vm1, %v3936_v0, %v1547_v34  ;;  %v4044_v26 = vsel %vm139_vm1, %v1547_v34, %v4036_v13 }
 0x297   :  { %1872 = vrot.lane.b32.xlu2 %v1843_v50, %s2615_s9  ;;  %1870 = vrot.lane.b32.xlu1 %v1842_v17, %s2615_s9  ;;  %v1848_v17 = vmul.f32 %v1837_v21, %v5346_v19 }
 0x298   :  { %1868 = vrot.lane.b32.xlu0 %v1841_v40, %s2615_s9  ;;  %v1847_v40 = vmul.f32 %v1837_v21, %v5347_v62 }
 0x299   :  { %v4052_v49 = vpop.permute.xlu2 %1632  ;;  %v1555_v0 = vpop.permute.xlu1 %1554 }
 0x29a   :  { %v4057_v60 = vsel %vm139_vm1, %v1555_v0, %v1557_v31  ;;  %v1553_v6 = vpop.permute.xlu0 %1552 }
 0x29b   :  { %v4061_v14 = vsel %vm139_vm1, %v3968_v30, %v1553_v6  ;;  %v4064_v52 = vsel %vm139_vm1, %v1553_v6, %v1555_v0  ;;  %v1590_v30 = vadd.f32 %v1557_v31, %v1508_v7  ;;  %v1849_v31 = vmul.f32 %v1837_v21, %v3577_v61 }
 0x29c   :  { %v1500_v0 = vmul.f32 %v4054_v47, %v5320_v10  ;;  %v1499_v6 = vmul.f32 %v4054_v47, %v3463_v3 }
 0x29e   :  { %v1582_v7 = vadd.f32 %v1541_v45, %v1500_v0  ;;  %v1581_v37 = vadd.f32 %v1560_v48, %v1499_v6  ;;  %v1504_v45 = vmul.f32 %v5337_v15, %v4054_v47 }
 0x29f   :  { %1878 = vrot.lane.b32.xlu2 %v1846_v1, %s2615_s9  ;;  %1876 = vrot.lane.b32.xlu1 %v1845_v53, %s2615_s9  ;;  %v4101_v1 = vstv %s2533_s16  ;;  %v1583_v53 = vadd.f32 %v1561_v29, %v1501_v57 }
 0x2a0   :  { %1874 = vrot.lane.b32.xlu0 %v1844_v11, %s2615_s9  ;;  %v1921_v29 = vmul.f32 %v4101_v1, %v3470_v33  ;;  %v1586_v33 = vadd.f32 %v4036_v13, %v1504_v45  ;;  %v4149_v13 = vld [vmem:[%s5055_s0 + $0x30] sm:$0xff] }
 0x2a1   :  { %v4078_v25 = vpop.permute.xlu2 %1638  ;;  %v1619_v28 = vpop.permute.xlu1 %1618  ;;  %v1926_v0 = vmul.f32 %v4149_v13, %v4101_v1 }
 0x2a2   :  { %v4081_v8 = vadd.f32 %v4078_v25, %v1590_v30  ;;  %v1641_v58 = vsel %vm222_vm2, %v1619_v28, %v4022_v4  ;;  %v1617_v46 = vpop.permute.xlu0 %1616  ;;  %v1922_v30 = vmul.f32 %v4101_v1, %v3463_v3  ;;  %v4127_v3 = vld [vmem:[%s5055_s0 + $0x28] sm:$0xff] }
 0x2a3   :  { %v4085_v34 = vadd.f32 %v1641_v58, %v1580_v20  ;;  %v1640_v50 = vsel %vm222_vm2, %v1617_v46, %v1619_v28  ;;  %v1920_v58 = vmul.f32 %v4101_v1, %v3479_v24  ;;  %v1503_v46 = vmul.f32 %v5340_v55, %v4054_v47 }
 0x2a4   :  { %v4090_v39 = vadd.f32 %v1640_v50, %v1579_v43 }
 0x2a7   :  { %1884 = vrot.lane.b32.xlu2 %v1849_v31, %s2615_s9  ;;  %1882 = vrot.lane.b32.xlu1 %v1848_v17, %s2615_s9  ;;  %v1585_v31 = vadd.f32 %v4044_v26, %v1503_v46 }
 0x2a8   :  { %1880 = vrot.lane.b32.xlu0 %v1847_v40, %s2615_s9 }
 0x2a9   :  { %v4104_v21 = vpop.permute.xlu2 %1702  ;;  %v1625_v11 = vpop.permute.xlu1 %1624 }
 0x2aa   :  { %v1643_v44 = vsel %vm222_vm2, %v1625_v11, %v4034_v32  ;;  %v1623_v56 = vpop.permute.xlu0 %1622  ;;  %v1505_v11 = vmul.f32 %v4054_v47, %v5335_v35 }
 0x2ab   :  { %v4110_v20 = vadd.f32 %v1643_v44, %v1583_v53  ;;  %v1642_v28 = vsel %vm222_vm2, %v4022_v4, %v1623_v56  ;;  %v4114_v43 = vadd.f32 %v1623_v56, %v1582_v7  ;;  %v1502_v4 = vmul.f32 %v4127_v3, %v4054_v47 }
 0x2ac   :  { %v4120_v48 = vadd.f32 %v1642_v28, %v1581_v37  ;;  %v1507_v7 = vmul.f32 %v4054_v47, %v5346_v19  ;;  %v1506_v37 = vmul.f32 %v4054_v47, %v5347_v62  ;;  %v1587_v28 = vadd.f32 %v4061_v14, %v1505_v11 }
 0x2ad   :  { %v1584_v50 = vadd.f32 %v4040_v18, %v1502_v4  ;;  %v1925_v18 = vmul.f32 %v4127_v3, %v4101_v1  ;;  %v1929_v47 = vmul.f32 %v4101_v1, %v5347_v62  ;;  %v1930_v11 = vmul.f32 %v4101_v1, %v5346_v19 }
 0x2ae   :  { %v1589_v44 = vadd.f32 %v4057_v60, %v1507_v7 }
 0x2af   :  { %1948 = vrot.lane.b32.xlu2 %v1922_v30, %s2616_s11  ;;  %1946 = vrot.lane.b32.xlu1 %v1921_v29, %s2616_s11  ;;  %v1588_v29 = vadd.f32 %v4064_v52, %v1506_v37  ;;  %v4192_v52 = vld [vmem:[%s5055_s0 + $0x38] sm:$0xff] }
 0x2b0   :  { %1944 = vrot.lane.b32.xlu0 %v1920_v58, %s2616_s11 }
 0x2b1   :  { %v4137_v24 = vpop.permute.xlu2 %1708  ;;  %v1631_v15 = vpop.permute.xlu1 %1630 }
 0x2b2   :  { %v4141_v17 = vadd.f32 %v1631_v15, %v1586_v33  ;;  %v1629_v40 = vpop.permute.xlu0 %1628  ;;  %v1928_v33 = vmul.f32 %v4101_v1, %v5335_v35 }
 0x2b3   :  { %v1644_v55 = vsel %vm222_vm2, %v4034_v32, %v1629_v40  ;;  %v1645_v57 = vsel %vm222_vm2, %v1629_v40, %v1631_v15  ;;  %v4162_v32 = vld [vmem:[%s5055_s0 + $0x20] sm:$0xff] }
 0x2b4   :  { %v4155_v26 = vadd.f32 %v1644_v55, %v1584_v50  ;;  %v4157_v6 = vadd.f32 %v1645_v57, %v1585_v31  ;;  %v1924_v53 = vmul.f32 %v4162_v32, %v4101_v1 }
 0x2b7   :  { %1956 = vrot.lane.b32.xlu2 %v1926_v0, %s2616_s11  ;;  %1954 = vrot.lane.b32.xlu1 %v1925_v18, %s2616_s11  ;;  %v1923_v18 = vmul.f32 %v4101_v1, %v5320_v10 }
 0x2b8   :  { %1952 = vrot.lane.b32.xlu0 %v1924_v53, %s2616_s11  ;;  %v1931_v53 = vmul.f32 %v4101_v1, %v3577_v61 }
 0x2b9   :  { %v4176_v56 = vpop.permute.xlu2 %1714  ;;  %v1637_v30 = vpop.permute.xlu1 %1636 }
 0x2ba   :  { %v1648_v45 = vsel %vm222_vm2, %v1637_v30, %v4078_v25  ;;  %v1635_v58 = vpop.permute.xlu0 %1634  ;;  %v1927_v25 = vmul.f32 %v4192_v52, %v4101_v1 }
 0x2bb   :  { %v1671_v4 = vadd.f32 %v1648_v45, %v1589_v44  ;;  %v1646_v46 = vsel %vm222_vm2, %v4052_v49, %v1635_v58  ;;  %v1647_v60 = vsel %vm222_vm2, %v1635_v58, %v1637_v30 }
 0x2bc   :  { %v1669_v15 = vadd.f32 %v1646_v46, %v1587_v28  ;;  %v1670_v14 = vadd.f32 %v1647_v60, %v1588_v29 }
 0x2bf   :  { %1962 = vrot.lane.b32.xlu2 %v1929_v47, %s2616_s11  ;;  %1960 = vrot.lane.b32.xlu1 %v1928_v33, %s2616_s11 }
 0x2c0   :  { %1958 = vrot.lane.b32.xlu0 %v1927_v25, %s2616_s11 }
 0x2c1   :  { %v1721_v49 = vpop.permute.xlu2 %1720  ;;  %v1701_v50 = vpop.permute.xlu1 %1700 }
 0x2c2   :  { %v1754_v31 = vadd.f32 %v1721_v49, %v4081_v8  ;;  %v1723_v40 = vsel %vm305_vm3, %v1701_v50, %v4104_v21  ;;  %v1699_v55 = vpop.permute.xlu0 %1698  ;;  %v2001_v8 = vstv %s2534_s24 }
 0x2c3   :  { %v1744_v57 = vadd.f32 %v1723_v40, %v4085_v34  ;;  %v1722_v0 = vsel %vm305_vm3, %v1699_v55, %v1701_v50  ;;  %v2008_v30 = vmul.f32 %v4149_v13, %v2001_v8  ;;  %v2007_v29 = vmul.f32 %v4127_v3, %v2001_v8 }
 0x2c4   :  { %v1743_v7 = vadd.f32 %v1722_v0, %v4090_v39  ;;  %v2006_v58 = vmul.f32 %v4162_v32, %v2001_v8  ;;  %v2011_v60 = vmul.f32 %v2001_v8, %v5347_v62  ;;  %v2010_v33 = vmul.f32 %v2001_v8, %v5335_v35 }
 0x2c5   :  { %v2009_v40 = vmul.f32 %v4192_v52, %v2001_v8 }
 0x2c7   :  { %1950 = vrot.lane.b32.xlu2 %v1923_v18, %s2616_s11  ;;  %1966 = vrot.lane.b32.xlu1 %v1931_v53, %s2616_s11  ;;  %v2013_v53 = vmul.f32 %v2001_v8, %v3577_v61 }
 0x2c8   :  { %1964 = vrot.lane.b32.xlu0 %v1930_v11, %s2616_s11 }
 0x2c9   :  { %v4214_v34 = vpop.permute.xlu2 %1784  ;;  %v1707_v37 = vpop.permute.xlu1 %1706 }
 0x2ca   :  { %v1725_v10 = vsel %vm305_vm3, %v1707_v37, %v4137_v24  ;;  %v1705_v44 = vpop.permute.xlu0 %1704  ;;  %v2012_v37 = vmul.f32 %v2001_v8, %v5346_v19  ;;  %v4288_v19 = vld [vmem:[%s5055_s0 + $0x18] sm:$0xfc] }
 0x2cb   :  { %v4220_v39 = vadd.f32 %v1725_v10, %v4110_v20  ;;  %v1724_v1 = vsel %vm305_vm3, %v4104_v21, %v1705_v44  ;;  %v4225_v28 = vadd.f32 %v1705_v44, %v4114_v43 }
 0x2cc   :  { %v4229_v45 = vadd.f32 %v1724_v1, %v4120_v48 }
 0x2cf   :  { %2038 = vrot.lane.b32.xlu2 %v2008_v30, %s2617_s13  ;;  %2036 = vrot.lane.b32.xlu1 %v2007_v29, %s2617_s13  ;;  %v2005_v30 = vmul.f32 %v4288_v19, %v2001_v8 }
 0x2d0   :  { %2034 = vrot.lane.b32.xlu0 %v2006_v58, %s2617_s13 }
 0x2d1   :  { %v4235_v20 = vpop.permute.xlu2 %1790  ;;  %v1713_v47 = vpop.permute.xlu1 %1712 }
 0x2d2   :  { %v4238_v21 = vadd.f32 %v1713_v47, %v4141_v17  ;;  %v1711_v43 = vpop.permute.xlu0 %1710 }
 0x2d3   :  { %v1726_v46 = vsel %vm305_vm3, %v4137_v24, %v1711_v43  ;;  %v1727_v48 = vsel %vm305_vm3, %v1711_v43, %v1713_v47  ;;  %v2083_v47 = vstv %s2535_s26 }
 0x2d4   :  { %v4246_v25 = vadd.f32 %v1726_v46, %v4155_v26  ;;  %v4249_v50 = vadd.f32 %v1727_v48, %v4157_v6  ;;  %v4261_v26 = vld [vmem:[%s5055_s0] sm:$0xfc] }
 0x2d5   :  { %v2002_v6 = vmul.f32 %v4261_v26, %v2001_v8 }
 0x2d7   :  { %2044 = vrot.lane.b32.xlu2 %v2011_v60, %s2617_s13  ;;  %2042 = vrot.lane.b32.xlu1 %v2010_v33, %s2617_s13  ;;  %v2090_v60 = vmul.f32 %v4149_v13, %v2083_v47 }
 0x2d8   :  { %2040 = vrot.lane.b32.xlu0 %v2009_v40, %s2617_s13 }
 0x2d9   :  { %v4255_v24 = vpop.permute.xlu2 %1796  ;;  %v1719_v17 = vpop.permute.xlu1 %1718 }
 0x2da   :  { %v1730_v62 = vsel %vm305_vm3, %v1719_v17, %v1721_v49  ;;  %v1717_v35 = vpop.permute.xlu0 %1716 }
 0x2db   :  { %v4264_v55 = vadd.f32 %v1730_v62, %v1671_v4  ;;  %v1728_v0 = vsel %vm305_vm3, %v4176_v56, %v1717_v35  ;;  %v1729_v18 = vsel %vm305_vm3, %v1717_v35, %v1719_v17  ;;  %v2089_v17 = vmul.f32 %v4127_v3, %v2083_v47 }
 0x2dc   :  { %v4270_v11 = vadd.f32 %v1728_v0, %v1669_v15  ;;  %v4272_v49 = vadd.f32 %v1729_v18, %v1670_v14  ;;  %v2088_v35 = vmul.f32 %v4162_v32, %v2083_v47 }
 0x2df   :  { %2026 = vrot.lane.b32.xlu2 %v2002_v6, %s2617_s13  ;;  %2048 = vrot.lane.b32.xlu1 %v2013_v53, %s2617_s13 }
 0x2e0   :  { %2046 = vrot.lane.b32.xlu0 %v2012_v37, %s2617_s13  ;;  %v2559_v37 = vld [vmem:[%s5055_s0 + $0x40] sm:$0x3f] }
 0x2e1   :  { %v1803_v4 = vpop.permute.xlu2 %1802  ;;  %v1783_v10 = vpop.permute.xlu1 %1782 }
 0x2e2   :  { %v4278_v56 = vadd.f32 %v1803_v4, %v1754_v31  ;;  %v1805_v61 = vsel %vm388_vm4, %v1783_v10, %v4214_v34  ;;  %v1781_v15 = vpop.permute.xlu0 %1780  ;;  %v4294_v31 = vld [vmem:[%s5055_s0 + $0x10] sm:$0xfc] }
 0x2e3   :  { %v4282_v44 = vadd.f32 %v1805_v61, %v1744_v57  ;;  %v1804_v14 = vsel %vm388_vm4, %v1781_v15, %v1783_v10  ;;  %v2004_v1 = vmul.f32 %v4294_v31, %v2001_v8  ;;  %v4302_v57 = vld [vmem:[%s5055_s0 + $0x8] sm:$0xfc]  ;;  %v2092_v10 = vmul.f32 %v2559_v37, %v2083_v47 }
 0x2e4   :  { %v4297_v29 = vadd.f32 %v1804_v14, %v1743_v7  ;;  %v2003_v58 = vmul.f32 %v4302_v57, %v2001_v8  ;;  %v2091_v15 = vmul.f32 %v4192_v52, %v2083_v47 }
 0x2e7   :  { %2032 = vrot.lane.b32.xlu2 %v2005_v30, %s2617_s13  ;;  %2030 = vrot.lane.b32.xlu1 %v2004_v1, %s2617_s13 }
 0x2e8   :  { %2028 = vrot.lane.b32.xlu0 %v2003_v58, %s2617_s13  ;;  %v2084_v58 = vmul.f32 %v4261_v26, %v2083_v47  ;;  %v2561_v26 = vld [vmem:[%s5055_s0 + $0x50] sm:$0x3f] }
 0x2e9   :  { %v4308_v43 = vpop.permute.xlu2 %1866  ;;  %v1789_v46 = vpop.permute.xlu1 %1788 }
 0x2ea   :  { %v1807_v7 = vsel %vm388_vm4, %v1789_v46, %v4235_v20  ;;  %v1787_v48 = vpop.permute.xlu0 %1786 }
 0x2eb   :  { %v1829_v33 = vadd.f32 %v1807_v7, %v4220_v39  ;;  %v1806_v8 = vsel %vm388_vm4, %v4214_v34, %v1787_v48  ;;  %v1828_v40 = vadd.f32 %v1787_v48, %v4225_v28  ;;  %v2560_v7 = vld [vmem:[%s5055_s0 + $0x58] sm:$0x3f] }
 0x2ec   :  { %v1827_v62 = vadd.f32 %v1806_v8, %v4229_v45  ;;  %v2558_v45 = vld [vmem:[%s5055_s0 + $0x48] sm:$0x3f]  ;;  %v2095_v48 = vmul.f32 %v2560_v7, %v2083_v47 }
 0x2ed   :  { %v2093_v53 = vmul.f32 %v2558_v45, %v2083_v47  ;;  %v2085_v45 = vmul.f32 %v4302_v57, %v2083_v47 }
 0x2ef   :  { %2120 = vrot.lane.b32.xlu2 %v2090_v60, %s2618_s15  ;;  %2118 = vrot.lane.b32.xlu1 %v2089_v17, %s2618_s15 }
 0x2f0   :  { %2116 = vrot.lane.b32.xlu0 %v2088_v35, %s2618_s15 }
 0x2f1   :  { %v1873_v6 = vpop.permute.xlu2 %1872  ;;  %v1795_v0 = vpop.permute.xlu1 %1794 }
 0x2f2   :  { %v1832_v39 = vadd.f32 %v1795_v0, %v4238_v21  ;;  %v1793_v18 = vpop.permute.xlu0 %1792 }
 0x2f3   :  { %v1808_v34 = vsel %vm388_vm4, %v4235_v20, %v1793_v18  ;;  %v1809_v28 = vsel %vm388_vm4, %v1793_v18, %v1795_v0  ;;  %v2087_v18 = vmul.f32 %v4288_v19, %v2083_v47 }
 0x2f4   :  { %v1830_v61 = vadd.f32 %v1808_v34, %v4246_v25  ;;  %v1831_v21 = vadd.f32 %v1809_v28, %v4249_v50  ;;  %v2086_v34 = vmul.f32 %v4294_v31, %v2083_v47 }
 0x2f7   :  { %2126 = vrot.lane.b32.xlu2 %v2093_v53, %s2618_s15  ;;  %2124 = vrot.lane.b32.xlu1 %v2092_v10, %s2618_s15 }
 0x2f8   :  { %2122 = vrot.lane.b32.xlu0 %v2091_v15, %s2618_s15 }
 0x2f9   :  { %v1879_v20 = vpop.permute.xlu2 %1878  ;;  %v1801_v14 = vpop.permute.xlu1 %1800 }
 0x2fa   :  { %v1812_v30 = vsel %vm388_vm4, %v1801_v14, %v1803_v4  ;;  %v1799_v1 = vpop.permute.xlu0 %1798  ;;  %v2094_v4 = vmul.f32 %v2561_v26, %v2083_v47 }
 0x2fb   :  { %v1835_v46 = vadd.f32 %v1812_v30, %v4264_v55  ;;  %v1810_v25 = vsel %vm388_vm4, %v4255_v24, %v1799_v1  ;;  %v1811_v50 = vsel %vm388_vm4, %v1799_v1, %v1801_v14 }
 0x2fc   :  { %v1833_v60 = vadd.f32 %v1810_v25, %v4270_v11  ;;  %v1834_v8 = vadd.f32 %v1811_v50, %v4272_v49 }
 0x2ff   :  { %2108 = vrot.lane.b32.xlu2 %v2084_v58, %s2618_s15  ;;  %2130 = vrot.lane.b32.xlu1 %v2095_v48, %s2618_s15 }
 0x300   :  { %2128 = vrot.lane.b32.xlu0 %v2094_v4, %s2618_s15 }
 0x301   :  { %v1885_v24 = vpop.permute.xlu2 %1884  ;;  %v1865_v55 = vpop.permute.xlu1 %1864 }
 0x302   :  { %v4357_v17 = vadd.f32 %v1885_v24, %v4278_v56  ;;  %v1887_v11 = vsel %vm471_vm0, %v1865_v55, %v4308_v43  ;;  %v1863_v49 = vpop.permute.xlu0 %1862 }
 0x303   :  { %v1908_v35 = vadd.f32 %v1887_v11, %v4282_v44  ;;  %v1886_v0 = vsel %vm471_vm0, %v1863_v49, %v1865_v55 }
 0x304   :  { %v1907_v28 = vadd.f32 %v1886_v0, %v4297_v29 }
 0x307   :  { %2114 = vrot.lane.b32.xlu2 %v2087_v18, %s2618_s15  ;;  %2112 = vrot.lane.b32.xlu1 %v2086_v34, %s2618_s15 }
 0x308   :  { %2110 = vrot.lane.b32.xlu0 %v2085_v45, %s2618_s15  ;;  %s38_s15 = sld [smem:[#allocation3]] }
 0x309   :  { %v1949_v56 = vpop.permute.xlu2 %1948  ;;  %v1871_v53 = vpop.permute.xlu1 %1870 }
 0x30a   :  { %v1889_v44 = vsel %vm471_vm0, %v1871_v53, %v1873_v6  ;;  %v1869_v37 = vpop.permute.xlu0 %1868 }
 0x30b   :  { %v1911_v10 = vadd.f32 %v1889_v44, %v1829_v33  ;;  %v1888_v19 = vsel %vm471_vm0, %v4308_v43, %v1869_v37  ;;  %v4373_v31 = vadd.f32 %v1869_v37, %v1828_v40  ;;  %v5355_v44 = vld [vmem:[#allocation10_spill] sm:$0xff]  ;;  %v5356_v37 = vld [vmem:[#allocation9_spill] sm:$0xff] }
 0x30c   :  { %v1909_v29 = vadd.f32 %v1888_v19, %v1827_v62  ;;  %v143_v19 = vsel %vm139_vm1, %v5356_v37, %v5355_v44 }
 0x311   :  { %v1957_v15 = vpop.permute.xlu2 %1956  ;;  %v1877_v57 = vpop.permute.xlu1 %1876 }
 0x312   :  { %v4375_v47 = vadd.f32 %v1877_v57, %v1832_v39  ;;  %v1875_v14 = vpop.permute.xlu0 %1874 }
 0x313   :  { %v1890_v30 = vsel %vm471_vm0, %v1873_v6, %v1875_v14  ;;  %v1891_v1 = vsel %vm471_vm0, %v1875_v14, %v1877_v57 }
 0x314   :  { %v1912_v58 = vadd.f32 %v1890_v30, %v1830_v61  ;;  %v1913_v25 = vadd.f32 %v1891_v1, %v1831_v21 }
 0x319   :  { %v4379_v50 = vpop.permute.xlu2 %1962  ;;  %v1883_v33 = vpop.permute.xlu1 %1882 }
 0x31a   :  { %v1894_v7 = vsel %vm471_vm0, %v1883_v33, %v1885_v24  ;;  %v1881_v43 = vpop.permute.xlu0 %1880 }
 0x31b   :  { %v4382_v40 = vadd.f32 %v1894_v7, %v1835_v46  ;;  %v1892_v62 = vsel %vm471_vm0, %v1879_v20, %v1881_v43  ;;  %v1893_v39 = vsel %vm471_vm0, %v1881_v43, %v1883_v33  ;;  %v2566_v7 = vld [vmem:[%s5055_s0 + $0x8] sm:$0xff] }
 0x31c   :  { %v4386_v48 = vadd.f32 %v1892_v62, %v1833_v60  ;;  %v4388_v26 = vadd.f32 %v1893_v39, %v1834_v8 }
 0x321   :  { %v4390_v6 = vpop.permute.xlu2 %1950  ;;  %v1947_v61 = vpop.permute.xlu1 %1946 }
 0x322   :  { %v1970_v21 = vsel %vm554_vm5, %v1949_v56, %v4390_v6  ;;  %v1969_v4 = vsel %vm554_vm5, %v1947_v61, %v1949_v56  ;;  %v1945_v24 = vpop.permute.xlu0 %1944  ;;  %v77_v56 = vstv %s38_s15 }
 0x323   :  { %v4395_v55 = vadd.f32 %v1970_v21, %v1909_v29  ;;  %v4397_v46 = vadd.f32 %v1969_v4, %v1908_v35  ;;  %v1968_v20 = vsel %vm554_vm5, %v1945_v24, %v1947_v61  ;;  %v82_v35 = vmul.f32 %v4162_v32, %v77_v56  ;;  %v2562_v29 = vld [vmem:[%s5055_s0 + $0x58] sm:$0xf] }
 0x324   :  { %v4400_v11 = vadd.f32 %v1968_v20, %v1907_v28  ;;  %v89_v57 = vmul.f32 %v2562_v29, %v77_v56  ;;  %v2564_v32 = vld [vmem:[%s5055_s0 + $0x18] sm:$0xff]  ;;  %v79_v43 = vmul.f32 %v2566_v7, %v77_v56  ;;  %v85_v39 = vmul.f32 %v4192_v52, %v77_v56  ;;  %v2569_v29 = vld [vmem:[%s5055_s0 + $0x48] sm:$0xf] }
 0x325   :  { %5349 = vst [vmem:[#allocation132_spill] sm:$0xff] %v4395_v55  ;;  %v81_v1 = vmul.f32 %v2564_v32, %v77_v56  ;;  %v83_v61 = vmul.f32 %v4127_v3, %v77_v56  ;;  %v84_v21 = vmul.f32 %v4149_v13, %v77_v56  ;;  %v165_v24 = vadd.f32 %v143_v19, %v82_v35  ;;  %v5358_v20 = vld [vmem:[#allocation16_spill] sm:$0xff] }
 0x326   :  { %5350 = vst [vmem:[#allocation130_spill] sm:$0xff] %v4397_v46  ;;  %v5362_v13 = vld [vmem:[#allocation20_spill] sm:$0xff] }
 0x327   :  { %5351 = vst [vmem:[#allocation116_spill] sm:$0xff] %v4400_v11  ;;  %v2568_v35 = vld [vmem:[%s5055_s0 + $0x40] sm:$0xf]  ;;  %v164_v7 = vadd.f32 %v5358_v20, %v81_v1 }
 0x328   :  { %v86_v19 = vmul.f32 %v2568_v35, %v77_v56  ;;  %v5363_v32 = vld [vmem:[#allocation12_spill] sm:$0xff]  ;;  %v5366_v35 = vld [vmem:[#allocation23_spill] sm:$0xff]  ;;  %v5382_v11 = vld [vmem:[#allocation37_spill] sm:$0xff] }
 0x329   :  { %v4402_v60 = vpop.permute.xlu2 %2038  ;;  %v1955_v8 = vpop.permute.xlu1 %1954  ;;  %v146_v2 = vsel %vm139_vm1, %v5367_v36, %v5366_v35  ;;  %v5371_v36 = vld [vmem:[#allocation26_spill] sm:$0xff] }
 0x32a   :  { %v1972_v49 = vsel %vm554_vm5, %v1955_v8, %v1957_v15  ;;  %v1953_v0 = vpop.permute.xlu0 %1952 }
 0x32b   :  { %v4405_v18 = vadd.f32 %v1972_v49, %v1912_v58  ;;  %v1971_v34 = vsel %vm554_vm5, %v1953_v0, %v1955_v8  ;;  %v2565_v58 = vld [vmem:[%s5055_s0] sm:$0xff] }
 0x32c   :  { %v4408_v45 = vadd.f32 %v1971_v34, %v1911_v10  ;;  %v2563_v10 = vld [vmem:[%s5055_s0 + $0x10] sm:$0xff]  ;;  %v78_v33 = vmul.f32 %v2565_v58, %v77_v56  ;;  %v5359_v8 = vld [vmem:[#allocation13_spill] sm:$0xff]  ;;  %v172_v58 = vadd.f32 %v5363_v32, %v89_v57 }
 0x32d   :  { %5352 = vst [vmem:[#allocation117_spill] sm:$0xff] %v4405_v18  ;;  %v80_v14 = vmul.f32 %v2563_v10, %v77_v56  ;;  %v142_v49 = vsel %vm139_vm1, %v5359_v8, %v5358_v20  ;;  %v5360_v0 = vld [vmem:[#allocation17_spill] sm:$0xff]  ;;  %v5361_v34 = vld [vmem:[#allocation14_spill] sm:$0xff]  ;;  %v87_v10 = vmul.f32 %v2569_v29, %v77_v56  ;;  %v5368_v29 = vld [vmem:[#allocation15_spill] sm:$0xff] }
 0x32e   :  { %5353 = vst [vmem:[#allocation110_spill] sm:$0xff] %v4408_v45  ;;  %v140_v37 = vsel %vm139_vm1, %v5361_v34, %v5360_v0  ;;  %v141_v3 = vsel %vm139_vm1, %v5360_v0, %v5359_v8 }
 0x32f   :  { %v163_v34 = vadd.f32 %v142_v49, %v80_v14  ;;  %v162_v57 = vadd.f32 %v141_v3, %v79_v43 }
 0x331   :  { %v4411_v53 = vpop.permute.xlu2 %2044  ;;  %v4413_v28 = vpop.permute.xlu1 %1960 }
 0x332   :  { %5354 = vst [vmem:[#allocation133_spill] sm:$0xff] %v4411_v53  ;;  %v4424_v30 = vpop.permute.xlu0 %1958  ;;  %v5397_v53 = vld [vmem:[#allocation42_spill] sm:$0xff] }
 0x333   :  { %v1973_v62 = vsel %vm554_vm5, %v1957_v15, %v4424_v30  ;;  %v2567_v15 = vld [vmem:[%s5055_s0 + $0x50] sm:$0xf] }
 0x334   :  { %v4440_v4 = vadd.f32 %v1973_v62, %v1913_v25  ;;  %v88_v52 = vmul.f32 %v2567_v15, %v77_v56  ;;  %v144_v25 = vsel %vm139_vm1, %v5355_v44, %v5362_v13  ;;  %v5364_v62 = vld [vmem:[#allocation19_spill] sm:$0xff]  ;;  %v5365_v44 = vld [vmem:[#allocation22_spill] sm:$0xff]  ;;  %v161_v15 = vadd.f32 %v140_v37, %v78_v33 }
 0x335   :  { %v145_v8 = vsel %vm139_vm1, %v5362_v13, %v5364_v62  ;;  %v148_v0 = vsel %vm139_vm1, %v5365_v44, %v5363_v32  ;;  %v147_v56 = vsel %vm139_vm1, %v5366_v35, %v5365_v44  ;;  %v168_v1 = vadd.f32 %v5364_v62, %v85_v39  ;;  %v5369_v13 = vld [vmem:[#allocation25_spill] sm:$0xff]  ;;  %v5372_v32 = vld [vmem:[#allocation18_spill] sm:$0xff]  ;;  %v5373_v44 = vld [vmem:[#allocation28_spill] sm:$0xff] }
 0x336   :  { %5357 = vst [vmem:[#allocation120_spill] sm:$0xff] %v4440_v4  ;;  %v166_v20 = vadd.f32 %v144_v25, %v83_v61  ;;  %v224_v59 = vsel %vm222_vm2, %v5369_v13, %v5368_v29  ;;  %v167_v33 = vadd.f32 %v145_v8, %v84_v21  ;;  %v171_v49 = vadd.f32 %v148_v0, %v88_v52  ;;  %v5374_v25 = vld [vmem:[#allocation24_spill] sm:$0xff]  ;;  %v5375_v35 = vld [vmem:[#allocation29_spill] sm:$0xff]  ;;  %v5377_v0 = vld [vmem:[#allocation31_spill] sm:$0xff] }
 0x337   :  { %v223_v37 = vsel %vm222_vm2, %v5371_v36, %v5369_v13  ;;  %v226_v43 = vsel %vm222_vm2, %v5373_v44, %v5372_v32  ;;  %v169_v61 = vadd.f32 %v146_v2, %v86_v19  ;;  %v170_v3 = vadd.f32 %v147_v56, %v87_v10  ;;  %v5376_v52 = vld [vmem:[#allocation32_spill] sm:$0xff]  ;;  %v5378_v36 = vld [vmem:[#allocation34_spill] sm:$0xff]  ;;  %v5380_v56 = vld [vmem:[#allocation21_spill] sm:$0xff] }
 0x338   :  { %v255_v62 = vadd.f32 %v5374_v25, %v172_v58  ;;  %v225_v46 = vsel %vm222_vm2, %v5368_v29, %v5375_v35  ;;  %v245_v21 = vadd.f32 %v224_v59, %v162_v57  ;;  %v227_v8 = vsel %vm222_vm2, %v5372_v32, %v5376_v52  ;;  %v5379_v58 = vld [vmem:[#allocation35_spill] sm:$0xff]  ;;  %v5384_v4 = vld [vmem:[#allocation30_spill] sm:$0xff] }
 0x339   :  { %v4481_v42 = vpop.permute.xlu2 %2026  ;;  %v4483_v14 = vpop.permute.xlu1 %1966  ;;  %v228_v13 = vsel %vm222_vm2, %v5376_v52, %v5377_v0  ;;  %v231_v2 = vsel %vm222_vm2, %v5378_v36, %v5374_v25  ;;  %v244_v19 = vadd.f32 %v223_v37, %v161_v15  ;;  %v248_v10 = vadd.f32 %v226_v43, %v165_v24  ;;  %v5381_v52 = vld [vmem:[#allocation27_spill] sm:$0xff]  ;;  %v5383_v37 = vld [vmem:[#allocation38_spill] sm:$0xff] }
 0x33a   :  { %5370 = vst [vmem:[#allocation125_spill] sm:$0xff] %v4481_v42  ;;  %v4491_v39 = vpop.permute.xlu0 %1964  ;;  %v229_v44 = vsel %vm222_vm2, %v5380_v56, %v5379_v58  ;;  %v230_v59 = vsel %vm222_vm2, %v5379_v58, %v5378_v36  ;;  %v246_v57 = vadd.f32 %v225_v46, %v163_v34  ;;  %v247_v29 = vadd.f32 %v5375_v35, %v164_v7  ;;  %v5385_v36 = vld [vmem:[#allocation40_spill] sm:$0xff]  ;;  %v5386_v7 = vld [vmem:[#allocation41_spill] sm:$0xff]  ;;  %v5392_v58 = vld [vmem:[#allocation47_spill] sm:$0xff] }
 0x33b   :  { %v251_v32 = vadd.f32 %v5377_v0, %v168_v1  ;;  %v307_v55 = vsel %vm305_vm3, %v5382_v11, %v5381_v52  ;;  %v249_v25 = vadd.f32 %v227_v8, %v166_v20  ;;  %v250_v15 = vadd.f32 %v228_v13, %v167_v33  ;;  %v5387_v1 = vld [vmem:[#allocation36_spill] sm:$0xff]  ;;  %v5391_v13 = vld [vmem:[#allocation46_spill] sm:$0xff] }
 0x33c   :  { %v254_v24 = vadd.f32 %v231_v2, %v171_v49  ;;  %v306_v43 = vsel %vm305_vm3, %v5383_v37, %v5382_v11  ;;  %v252_v56 = vadd.f32 %v229_v44, %v169_v61  ;;  %v253_v42 = vadd.f32 %v230_v59, %v170_v3  ;;  %v5388_v20 = vld [vmem:[#allocation44_spill] sm:$0xff]  ;;  %v5389_v49 = vld [vmem:[#allocation43_spill] sm:$0xff] }
 0x33d   :  { %v309_v46 = vsel %vm305_vm3, %v5385_v36, %v5384_v4  ;;  %v308_v34 = vsel %vm305_vm3, %v5381_v52, %v5386_v7  ;;  %v338_v35 = vadd.f32 %v5387_v1, %v255_v62  ;;  %v328_v0 = vadd.f32 %v307_v55, %v245_v21  ;;  %v5393_v62 = vld [vmem:[#allocation33_spill] sm:$0xff]  ;;  %v5394_v37 = vld [vmem:[#allocation39_spill] sm:$0xff] }
 0x33e   :  { %v310_v33 = vsel %vm305_vm3, %v5384_v4, %v5388_v20  ;;  %v311_v11 = vsel %vm305_vm3, %v5388_v20, %v5389_v49  ;;  %v327_v8 = vadd.f32 %v306_v43, %v244_v19  ;;  %v314_v2 = vsel %vm305_vm3, %v5391_v13, %v5387_v1  ;;  %v5395_v19 = vld [vmem:[#allocation49_spill] sm:$0xff] }
 0x33f   :  { %v312_v55 = vsel %vm305_vm3, %v5393_v62, %v5392_v58  ;;  %v313_v4 = vsel %vm305_vm3, %v5392_v58, %v5391_v13  ;;  %v331_v44 = vadd.f32 %v309_v46, %v248_v10  ;;  %v329_v59 = vadd.f32 %v308_v34, %v246_v57  ;;  %v5396_v62 = vld [vmem:[#allocation50_spill] sm:$0xff]  ;;  %v5398_v10 = vld [vmem:[#allocation52_spill] sm:$0xff]  ;;  %v5400_v34 = vld [vmem:[#allocation53_spill] sm:$0xff] }
 0x340   :  { %v330_v52 = vadd.f32 %v5386_v7, %v247_v29  ;;  %v390_v43 = vsel %vm388_vm4, %v5395_v19, %v5394_v37  ;;  %v334_v36 = vadd.f32 %v5389_v49, %v251_v32  ;;  %v332_v1 = vadd.f32 %v310_v33, %v249_v25  ;;  %v5399_v29 = vld [vmem:[#allocation48_spill] sm:$0xff]  ;;  %v5402_v49 = vld [vmem:[#allocation55_spill] sm:$0xff] }
 0x341   :  { %v4533_v61 = vpop.permute.xlu2 %2032  ;;  %v4535_v3 = vpop.permute.xlu1 %2036  ;;  %v333_v20 = vadd.f32 %v311_v11, %v250_v15  ;;  %v389_v45 = vsel %vm388_vm4, %v5396_v62, %v5395_v19  ;;  %v337_v18 = vadd.f32 %v314_v2, %v254_v24  ;;  %v335_v13 = vadd.f32 %v312_v55, %v252_v56  ;;  %v5401_v25 = vld [vmem:[#allocation56_spill] sm:$0xff]  ;;  %v5403_v24 = vld [vmem:[#allocation58_spill] sm:$0xff]  ;;  %v5404_v11 = vld [vmem:[#allocation59_spill] sm:$0xff] }
 0x342   :  { %5390 = vst [vmem:[#allocation131_spill] sm:$0xff] %v4533_v61  ;;  %v4546_v21 = vpop.permute.xlu0 %2034  ;;  %v336_v58 = vadd.f32 %v313_v4, %v253_v42  ;;  %v392_v57 = vsel %vm388_vm4, %v5398_v10, %v5397_v53  ;;  %v421_v46 = vadd.f32 %v5399_v29, %v338_v35  ;;  %v411_v7 = vadd.f32 %v390_v43, %v328_v0  ;;  %v5405_v35 = vld [vmem:[#allocation45_spill] sm:$0xff]  ;;  %v5408_v62 = vld [vmem:[#allocation62_spill] sm:$0xff] }
 0x343   :  { %v391_v32 = vsel %vm388_vm4, %v5394_v37, %v5400_v34  ;;  %v393_v15 = vsel %vm388_vm4, %v5397_v53, %v5401_v25  ;;  %v410_v33 = vadd.f32 %v389_v45, %v327_v8  ;;  %v394_v42 = vsel %vm388_vm4, %v5401_v25, %v5402_v49  ;;  %v5406_v45 = vld [vmem:[#allocation51_spill] sm:$0xff]  ;;  %v5407_v8 = vld [vmem:[#allocation61_spill] sm:$0xff]  ;;  %v5411_v25 = vld [vmem:[#allocation54_spill] sm:$0xff] }
 0x344   :  { %v397_v56 = vsel %vm388_vm4, %v5403_v24, %v5399_v29  ;;  %v395_v0 = vsel %vm388_vm4, %v5405_v35, %v5404_v11  ;;  %v414_v2 = vadd.f32 %v392_v57, %v331_v44  ;;  %v413_v55 = vadd.f32 %v5400_v34, %v330_v52 }
 0x345   :  { %v396_v53 = vsel %vm388_vm4, %v5404_v11, %v5403_v24  ;;  %v473_v4 = vsel %vm471_vm0, %v5407_v8, %v5406_v45  ;;  %v412_v37 = vadd.f32 %v391_v32, %v329_v59  ;;  %v417_v19 = vadd.f32 %v5402_v49, %v334_v36  ;;  %v5412_v24 = vld [vmem:[#allocation65_spill] sm:$0xff]  ;;  %v5414_v36 = vld [vmem:[#allocation60_spill] sm:$0xff] }
 0x346   :  { %v415_v43 = vadd.f32 %v393_v15, %v332_v1  ;;  %v472_v10 = vsel %vm471_vm0, %v5408_v62, %v5407_v8  ;;  %v416_v52 = vadd.f32 %v394_v42, %v333_v20  ;;  %v420_v57 = vadd.f32 %v397_v56, %v337_v18  ;;  %v5415_v15 = vld [vmem:[#allocation66_spill] sm:$0xff]  ;;  %v5416_v62 = vld [vmem:[#allocation69_spill] sm:$0xff]  ;;  %v5417_v20 = vld [vmem:[#allocation68_spill] sm:$0xff] }
 0x347   :  { %v418_v34 = vadd.f32 %v395_v0, %v335_v13  ;;  %v475_v11 = vsel %vm471_vm0, %v5412_v24, %v5411_v25  ;;  %v419_v59 = vadd.f32 %v396_v53, %v336_v58  ;;  %v504_v1 = vadd.f32 %v5414_v36, %v421_v46  ;;  %v5418_v42 = vld [vmem:[#allocation71_spill] sm:$0xff]  ;;  %v5420_v0 = vld [vmem:[#allocation57_spill] sm:$0xff] }
 0x348   :  { %v494_v32 = vadd.f32 %v473_v4, %v411_v7  ;;  %v474_v49 = vsel %vm471_vm0, %v5406_v45, %v5415_v15  ;;  %v493_v8 = vadd.f32 %v472_v10, %v410_v33  ;;  %v476_v18 = vsel %vm471_vm0, %v5411_v25, %v5416_v62  ;;  %v5419_v7 = vld [vmem:[#allocation72_spill] sm:$0xff]  ;;  %v5422_v25 = vld [vmem:[#allocation74_spill] sm:$0xff] }
 0x349   :  { %v4586_v29 = vpop.permute.xlu2 %2120  ;;  %v4588_v44 = vpop.permute.xlu1 %2042  ;;  %v477_v13 = vsel %vm471_vm0, %v5416_v62, %v5417_v20  ;;  %v480_v58 = vsel %vm471_vm0, %v5418_v42, %v5414_v36  ;;  %v497_v56 = vadd.f32 %v475_v11, %v414_v2  ;;  %v496_v46 = vadd.f32 %v5415_v15, %v413_v55  ;;  %v5421_v10 = vld [vmem:[#allocation64_spill] sm:$0xff]  ;;  %v5423_v36 = vld [vmem:[#allocation75_spill] sm:$0xff] }
 0x34a   :  { %5409 = vst [vmem:[#allocation108_spill] sm:$0xff] %v4586_v29  ;;  %v4593_v35 = vpop.permute.xlu0 %2040  ;;  %v478_v53 = vsel %vm471_vm0, %v5420_v0, %v5419_v7  ;;  %v479_v33 = vsel %vm471_vm0, %v5419_v7, %v5418_v42  ;;  %v495_v45 = vadd.f32 %v474_v49, %v412_v37  ;;  %v500_v4 = vadd.f32 %v5417_v20, %v417_v19  ;;  %v5424_v62 = vld [vmem:[#allocation67_spill] sm:$0xff]  ;;  %v5425_v0 = vld [vmem:[#allocation77_spill] sm:$0xff]  ;;  %v5426_v37 = vld [vmem:[#allocation78_spill] sm:$0xff] }
 0x34b   :  { %5410 = vst [vmem:[#allocation111_spill] sm:$0xff] %v4588_v44  ;;  %v556_v24 = vsel %vm554_vm5, %v5422_v25, %v5421_v10  ;;  %v555_v2 = vsel %vm554_vm5, %v5423_v36, %v5422_v25  ;;  %v498_v55 = vadd.f32 %v476_v18, %v415_v43  ;;  %v499_v11 = vadd.f32 %v477_v13, %v416_v52  ;;  %v5427_v49 = vld [vmem:[#allocation81_spill] sm:$0xff]  ;;  %v5429_v52 = vld [vmem:[#allocation80_spill] sm:$0xff]  ;;  %v5432_v13 = vld [vmem:[#allocation83_spill] sm:$0xff] }
 0x34c   :  { %5413 = vst [vmem:[#allocation126_spill] sm:$0xff] %v4593_v35  ;;  %v503_v15 = vadd.f32 %v480_v58, %v420_v57  ;;  %v558_v29 = vsel %vm554_vm5, %v5425_v0, %v5424_v62  ;;  %v501_v35 = vadd.f32 %v478_v53, %v418_v34  ;;  %v502_v42 = vadd.f32 %v479_v33, %v419_v59  ;;  %v5428_v7 = vld [vmem:[#allocation73_spill] sm:$0xff]  ;;  %v5433_v53 = vld [vmem:[#allocation84_spill] sm:$0xff]  ;;  %v5434_v33 = vld [vmem:[#allocation70_spill] sm:$0xff] }
 0x34d   :  { %v557_v19 = vsel %vm554_vm5, %v5421_v10, %v5426_v37  ;;  %v559_v20 = vsel %vm554_vm5, %v5424_v62, %v5427_v49  ;;  %v587_v44 = vadd.f32 %v5428_v7, %v504_v1  ;;  %v577_v25 = vadd.f32 %v556_v24, %v494_v32  ;;  %v5437_v62 = vld [vmem:[#allocation86_spill] sm:$0xff] }
 0x34e   :  { %v576_v43 = vadd.f32 %v555_v2, %v493_v8  ;;  %v560_v57 = vsel %vm554_vm5, %v5427_v49, %v5429_v52  ;;  %v580_v59 = vadd.f32 %v558_v29, %v497_v56  ;;  %v563_v58 = vsel %vm554_vm5, %v5432_v13, %v5428_v7  ;;  %v5436_v2 = vld [vmem:[#allocation76_spill] sm:$0xff]  ;;  %v5438_v49 = vld [vmem:[#allocation87_spill] sm:$0xff] }
 0x34f   :  { %v561_v10 = vsel %vm554_vm5, %v5434_v33, %v5433_v53  ;;  %v562_v1 = vsel %vm554_vm5, %v5433_v53, %v5432_v13  ;;  %v578_v8 = vadd.f32 %v557_v19, %v495_v45  ;;  %v579_v24 = vadd.f32 %v5426_v37, %v496_v46  ;;  %v5439_v33 = vld [vmem:[#allocation79_spill] sm:$0xff]  ;;  %v5441_v46 = vld [vmem:[#allocation90_spill] sm:$0xff]  ;;  %v5443_v37 = vld [vmem:[#allocation93_spill] sm:$0xff] }
 0x350   :  { %v583_v36 = vadd.f32 %v5429_v52, %v500_v4  ;;  %v581_v29 = vadd.f32 %v559_v20, %v498_v55  ;;  %v582_v56 = vadd.f32 %v560_v57, %v499_v11  ;;  %v639_v0 = vsel %vm637_vm6, %v5437_v62, %v5436_v2  ;;  %v5442_v55 = vld [vmem:[#allocation85_spill] sm:$0xff]  ;;  %v5444_v52 = vld [vmem:[#allocation92_spill] sm:$0xff] }
 0x351   :  { %v4635_v18 = vpop.permute.xlu2 %2126  ;;  %v4637_v34 = vpop.permute.xlu1 %2048  ;;  %v638_v7 = vsel %vm637_vm6, %v5438_v49, %v5437_v62  ;;  %v586_v53 = vadd.f32 %v563_v58, %v503_v15  ;;  %v584_v45 = vadd.f32 %v561_v10, %v501_v35  ;;  %v585_v19 = vadd.f32 %v562_v1, %v502_v42  ;;  %v5445_v62 = vld [vmem:[#allocation95_spill] sm:$0xff]  ;;  %v5446_v58 = vld [vmem:[#allocation96_spill] sm:$0xff]  ;;  %v5447_v10 = vld [vmem:[#allocation82_spill] sm:$0xff] }
 0x352   :  { %5430 = vst [vmem:[#allocation115_spill] sm:$0xff] %v4635_v18  ;;  %v4648_v32 = vpop.permute.xlu0 %2046  ;;  %v5440_v18 = vld [vmem:[#allocation89_spill] sm:$0xff]  ;;  %v640_v4 = vsel %vm637_vm6, %v5436_v2, %v5441_v46  ;;  %v670_v11 = vadd.f32 %v5442_v55, %v587_v44  ;;  %v642_v20 = vsel %vm637_vm6, %v5439_v33, %v5443_v37  ;;  %v643_v57 = vsel %vm637_vm6, %v5443_v37, %v5444_v52 }
 0x353   :  { %5431 = vst [vmem:[#allocation112_spill] sm:$0xff] %v4637_v34  ;;  %v641_v13 = vsel %vm637_vm6, %v5440_v18, %v5439_v33  ;;  %v646_v15 = vsel %vm637_vm6, %v5445_v62, %v5442_v55  ;;  %v660_v35 = vadd.f32 %v639_v0, %v577_v25  ;;  %v659_v42 = vadd.f32 %v638_v7, %v576_v43  ;;  %v5448_v55 = vld [vmem:[#allocation88_spill] sm:$0xff]  ;;  %v5449_v25 = vld [vmem:[#allocation98_spill] sm:$0xff]  ;;  %v5452_v7 = vld [vmem:[#allocation91_spill] sm:$0xff] }
 0x354   :  { %5435 = vst [vmem:[#allocation63_spill] sm:$0xff] %v4648_v32  ;;  %v663_v18 = vadd.f32 %v641_v13, %v580_v59  ;;  %v644_v1 = vsel %vm637_vm6, %v5447_v10, %v5446_v58  ;;  %v661_v44 = vadd.f32 %v640_v4, %v578_v8  ;;  %v662_v2 = vadd.f32 %v5441_v46, %v579_v24  ;;  %v5451_v8 = vld [vmem:[#allocation99_spill] sm:$0xff]  ;;  %v5454_v46 = vld [vmem:[#allocation102_spill] sm:$0xff]  ;;  %v5456_v4 = vld [vmem:[#allocation104_spill] sm:$0xff] }
 0x355   :  { %v666_v49 = vadd.f32 %v5444_v52, %v583_v36  ;;  %v645_v33 = vsel %vm637_vm6, %v5446_v58, %v5445_v62  ;;  %v664_v37 = vadd.f32 %v642_v20, %v581_v29  ;;  %v665_v32 = vadd.f32 %v643_v57, %v582_v56  ;;  %v5453_v36 = vld [vmem:[#allocation101_spill] sm:$0xff] }
 0x356   :  { %v669_v34 = vadd.f32 %v646_v15, %v586_v53  ;;  %v722_v43 = vsel %vm720_vm7, %v5449_v25, %v5448_v55  ;;  %v667_v0 = vadd.f32 %v644_v1, %v584_v45  ;;  %v721_v24 = vsel %vm720_vm7, %v5451_v8, %v5449_v25  ;;  %v5457_v45 = vld [vmem:[#allocation103_spill] sm:$0xff]  ;;  %v5458_v57 = vld [vmem:[#allocation97_spill] sm:$0xff]  ;;  %v5462_v25 = vld [vmem:[#allocation94_spill] sm:$0xff] }
 0x357   :  { %v724_v13 = vsel %vm720_vm7, %v5453_v36, %v5452_v7  ;;  %v723_v29 = vsel %vm720_vm7, %v5448_v55, %v5454_v46  ;;  %v668_v53 = vadd.f32 %v645_v33, %v585_v19  ;;  %v725_v20 = vsel %vm720_vm7, %v5452_v7, %v5456_v4  ;;  %v5459_v62 = vld [vmem:[#allocation105_spill] sm:$0xff]  ;;  %v5461_v55 = vld [vmem:[#allocation106_spill] sm:$0xff] }
 0x358   :  { %v726_v52 = vsel %vm720_vm7, %v5456_v4, %v5457_v45  ;;  %v729_v15 = vsel %vm720_vm7, %v5459_v62, %v5458_v57  ;;  %v753_v10 = vadd.f32 %v5458_v57, %v670_v11  ;;  %v743_v1 = vadd.f32 %v722_v43, %v660_v35 }
 0x359   :  { %v4685_v59 = vpop.permute.xlu1 %2030  ;;  %v4707_v58 = vpop.permute.xlu2 %2108  ;;  %v727_v19 = vsel %vm720_vm7, %v5462_v25, %v5461_v55  ;;  %v728_v33 = vsel %vm720_vm7, %v5461_v55, %v5459_v62  ;;  %v742_v8 = vadd.f32 %v721_v24, %v659_v42  ;;  %v746_v7 = vadd.f32 %v724_v13, %v663_v18  ;;  %v5468_v24 = vld [vmem:[#allocation133_spill] sm:$0xff]  ;;  %v5469_v13 = vld [vmem:[#allocation111_spill] sm:$0xff] }
 0x35a   :  { %5450 = vst [vmem:[#allocation107_spill] sm:$0xff] %v4685_v59  ;;  %v4696_v56 = vpop.permute.xlu0 %2028  ;;  %v744_v36 = vadd.f32 %v723_v29, %v661_v44  ;;  %v745_v4 = vadd.f32 %v5454_v46, %v662_v2  ;;  %v747_v59 = vadd.f32 %v725_v20, %v664_v37  ;;  %v752_v61 = vadd.f32 %v729_v15, %v669_v34  ;;  %v5470_v29 = vld [vmem:[#allocation126_spill] sm:$0xff]  ;;  %v5475_v62 = vld [vmem:[#allocation112_spill] sm:$0xff] }
 0x35b   :  { %5455 = vst [vmem:[#allocation100_spill] sm:$0xff] %v4696_v56  ;;  %v749_v56 = vadd.f32 %v5457_v45, %v666_v49  ;;  %v750_v11 = vadd.f32 %v727_v19, %v667_v0  ;;  %v751_v35 = vadd.f32 %v728_v33, %v668_v53  ;;  %v5463_v43 = vrot.slane %v3903_v54, 1  ;;  %v5474_v53 = vld [vmem:[#allocation120_spill] sm:$0xff] }
 0x35c   :  { %5460 = vst [vmem:[#allocation113_spill] sm:$0xff] %v4707_v58  ;;  %v748_v58 = vadd.f32 %v726_v52, %v665_v32  ;;  %v4723_v25 = vadd.f32 %v3931_v27, %v742_v8  ;;  %v4726_v42 = vadd.f32 %v3952_v51, %v745_v4  ;;  %v4732_v44 = vadd.f32 %v3962_v5, %v743_v1 }
 0x35d   :  { %v4720_v57 = vadd.f32 %v5463_v43, %v753_v10  ;;  %v4729_v18 = vadd.f32 %v3957_v16, %v749_v56  ;;  %v4735_v34 = vadd.f32 %v3965_v63, %v744_v36  ;;  %v5464_v54 = vrot.slane %v3974_v22, 1  ;;  %v5479_v36 = vld [vmem:[#allocation125_spill] sm:$0xff] }
 0x35e   :  { %v4738_v32 = vadd.f32 %v3995_v12, %v748_v58  ;;  %v1974_v27 = vsel %vm554_vm5, %v4413_v28, %v4379_v50  ;;  %v1975_v51 = vsel %vm554_vm5, %v4379_v50, %v4491_v39  ;;  %v4751_v5 = vadd.f32 %v4002_v9, %v746_v7  ;;  %v5476_v58 = vld [vmem:[#allocation63_spill] sm:$0xff] }
 0x35f   :  { %v4742_v2 = vadd.f32 %v5464_v54, %v752_v61  ;;  %v4754_v63 = vadd.f32 %v4007_v41, %v747_v59  ;;  %v5465_v12 = vrot.slane %v3982_v38, 1  ;;  %v1976_v61 = vsel %vm554_vm5, %v4491_v39, %v4483_v14 }
 0x360   :  { %v5466_v28 = vrot.slane %v3985_v23, 1  ;;  %v1992_v50 = vadd.f32 %v4390_v6, %v4373_v31  ;;  %v2054_v9 = vsel %vm637_vm6, %v4535_v3, %v4402_v60  ;;  %v2053_v38 = vsel %vm637_vm6, %v4546_v21, %v4535_v3  ;;  %v5467_v6 = vld [vmem:[#allocation131_spill] sm:$0xff]  ;;  %v5472_v21 = vld [vmem:[#allocation110_spill] sm:$0xff] }
 0x361   :  { %v2119_v16 = vpop.permute.xlu1 %2118  ;;  %v1484_v22 = vadd.f32 %v5465_v12, %v750_v11  ;;  %v1997_v41 = vadd.f32 %v1974_v27, %v4386_v48  ;;  %v1996_v39 = vadd.f32 %v4424_v30, %v4375_v47  ;;  %v2000_v23 = vadd.f32 %v4483_v14, %v4357_v17  ;;  %v4787_v3 = vpop.permute.xlu2 %2114  ;;  %v5471_v47 = vld [vmem:[#allocation117_spill] sm:$0xff]  ;;  %v5477_v33 = vld [vmem:[#allocation107_spill] sm:$0xff] }
 0x362   :  { %v2117_v49 = vpop.permute.xlu0 %2116  ;;  %v4763_v37 = vadd.f32 %v5466_v28, %v751_v35  ;;  %v1998_v59 = vadd.f32 %v1975_v51, %v4388_v26  ;;  %v1999_v31 = vadd.f32 %v1976_v61, %v4382_v40  ;;  %v2074_v0 = vadd.f32 %v5467_v6, %v1992_v50  ;;  %v5473_v40 = vld [vmem:[#allocation108_spill] sm:$0xff]  ;;  %v5480_v35 = vld [vmem:[#allocation115_spill] sm:$0xff] }
 0x363   :  { %v2056_v46 = vsel %vm637_vm6, %v5469_v13, %v5468_v24  ;;  %v2055_v48 = vsel %vm637_vm6, %v4402_v60, %v5470_v29  ;;  %v2076_v30 = vadd.f32 %v2054_v9, %v5471_v47  ;;  %v2075_v17 = vadd.f32 %v2053_v38, %v5472_v21  ;;  %v5478_v7 = vld [vmem:[#allocation100_spill] sm:$0xff] }
 0x364   :  { %v2135_v26 = vsel %vm720_vm7, %v2117_v49, %v2119_v16  ;;  %v2136_v14 = vsel %vm720_vm7, %v2119_v16, %v5473_v40  ;;  %v4797_v56 = vstv %s5058_s3  ;;  %v2079_v60 = vadd.f32 %v2056_v46, %v1997_v41  ;;  %v4829_v50 = vld [vmem:[%s5056_s1] sm:$0xff] }
 0x365   :  { %v2077_v20 = vadd.f32 %v2055_v48, %v5474_v53  ;;  %v2078_v45 = vadd.f32 %v5470_v29, %v1996_v39  ;;  %v2156_v52 = vadd.f32 %v4787_v3, %v2074_v0  ;;  %v2082_v15 = vadd.f32 %v5475_v62, %v2000_v23  ;;  %v5481_v23 = vld [vmem:[#allocation132_spill] sm:$0xff] }
 0x366   :  { %v2057_v10 = vsel %vm637_vm6, %v5468_v24, %v5476_v58  ;;  %v2058_v1 = vsel %vm637_vm6, %v5476_v58, %v5475_v62  ;;  %v4809_v55 = vadd.f32 %v2135_v26, %v2075_v17  ;;  %v2052_v8 = vsel %vm637_vm6, %v5477_v33, %v5467_v6  ;;  %v5482_v0 = vld [vmem:[#allocation116_spill] sm:$0xff]  ;;  %v4854_v17 = vld [vmem:[%s5056_s1 + $0x8] sm:$0xff] }
 0x367   :  { %v2050_v4 = vsel %vm637_vm6, %v5479_v36, %v5478_v7  ;;  %v4817_v11 = vadd.f32 %v2136_v14, %v2076_v30  ;;  %v2051_v27 = vsel %vm637_vm6, %v5478_v7, %v5477_v33  ;;  %v2080_v61 = vadd.f32 %v2057_v10, %v1998_v59 }
 0x368   :  { %v2081_v49 = vadd.f32 %v2058_v1, %v1999_v31  ;;  %v2187_v28 = vrot.slane %v2156_v52, 2  ;;  %v2179_v9 = vrot.slane %v4809_v55, 2  ;;  %v4835_v6 = vadd.f32 %v2052_v8, %v5481_v23  ;;  %v5483_v31 = vld [vmem:[#allocation130_spill] sm:$0xff] }
 0x369   :  { %v2125_v19 = vpop.permute.xlu1 %2124  ;;  %v4838_v59 = vadd.f32 %v2050_v4, %v5482_v0  ;;  %v4841_v24 = vadd.f32 %v2051_v27, %v5483_v31  ;;  %v2182_v13 = vrot.slane %v4817_v11, 2  ;;  %vm2297_vm0 = vcmask 441346  }
 0x36a   :  { %v2138_v43 = vsel %vm720_vm7, %v2125_v19, %v5480_v35  ;;  %v2123_v54 = vpop.permute.xlu0 %2122  ;;  %v2322_v47 = vperm.slane %v4829_v50, 0  ;;  %v2347_v26 = vperm.slane %v4829_v50, 1  ;;  %v2325_v53 = vperm.slane %v4854_v17, 4 }
 0x36b   :  { %v2161_v51 = vadd.f32 %v2138_v43, %v2079_v60  ;;  %v2137_v16 = vsel %vm720_vm7, %v5473_v40, %v2123_v54  ;;  %v2160_v12 = vadd.f32 %v2123_v54, %v2078_v45  ;;  %v2432_v40 = vperm.slane %v4829_v50, 3 }
 0x36c   :  { %v4832_v41 = vadd.f32 %v2137_v16, %v2077_v20  ;;  %v2350_v62 = vperm.slane %v4854_v17, 5  ;;  %v2323_v36 = vperm.slane %v4829_v50, 4  ;;  %v2324_v43 = vperm.slane %v4854_v17, 0 }
 0x36d   :  { %v2190_v38 = vrot.slane %v2161_v51, 2  ;;  %v2188_v39 = vrot.slane %v2160_v12, 2  ;;  %v2349_v54 = vperm.slane %v4854_v17, 1  ;;  %vm2334_vm1 = vcmask 1040384  }
 0x36e   :  { %vm2338_vm2 = vcmask 434176   ;;  %vm2491_vm3 = vcmask 24576  }
 0x36f   :  { %v2191_v46 = vsel %vm2177_vm9, %v2179_v9, %v2190_v38  ;;  %v2218_v29 = vadd.f32 %v2190_v38, %v1484_v22  ;;  %v2189_v48 = vsel %vm2177_vm9, %v2187_v28, %v2188_v39  ;;  %v2185_v22 = vrot.slane %v4832_v41, 2 }
 0x370   :  { %v2214_v30 = vadd.f32 %v2191_v46, %v4751_v5  ;;  %v2213_v21 = vadd.f32 %v2189_v48, %v4726_v42  ;;  %v2407_v5 = vperm.slane %v4829_v50, 2 }
 0x371   :  { %v2271_v14 = vsel %vm2270_vm12, %v2218_v29, -inf  ;;  %v2131_v60 = vpop.permute.xlu1 %2130 }
 0x372   :  { %v4863_v42 = vsel %vm2223_vm10, %v2214_v30, -inf  ;;  %v2269_v20 = vsel %vm2268_vm11, %v2214_v30, -inf  ;;  %v2164_v45 = vadd.f32 %v2131_v60, %v2082_v15  ;;  %v2129_v52 = vpop.permute.xlu0 %2128  ;;  %v2249_v10 = vsel %vm2248_vm13, %v2213_v21, -inf }
 0x373   :  { %v2272_v58 = vmax.f32 %v2269_v20, %v2271_v14  ;;  %v2139_v1 = vsel %vm720_vm7, %v5480_v35, %v2129_v52  ;;  %v2140_v19 = vsel %vm720_vm7, %v2129_v52, %v2131_v60  ;;  %v2348_v15 = vperm.slane %v4829_v50, 5 }
 0x374   :  { %v2196_v33 = vrot.slane %v2164_v45, 2  ;;  %v2162_v8 = vadd.f32 %v2139_v1, %v2080_v61  ;;  %v2163_v7 = vadd.f32 %v2140_v19, %v2081_v49  ;;  %v2433_v61 = vperm.slane %v4829_v50, 7 }
 0x375   :  { %v2273_v4 = vrot.slane %v2272_v58, 4  ;;  %v2434_v49 = vperm.slane %v4854_v17, 3 }
 0x376   :  { %v2197_v27 = vsel %vm2177_vm9, %v2188_v39, %v2196_v33  ;;  %v2221_v51 = vadd.f32 %v2196_v33, %v4720_v57  ;;  %v2192_v16 = vrot.slane %v2162_v8, 2  ;;  %v2194_v35 = vrot.slane %v2163_v7, 2 }
 0x377   :  { %v2274_v12 = vmax.f32 %v2272_v58, %v2273_v4  ;;  %v2217_v28 = vadd.f32 %v2197_v27, %v4729_v18 }
 0x378   :  { %v2300_v38 = vsel %vm2299_vm14, %v2221_v51, -inf  ;;  %v2193_v23 = vsel %vm2177_vm9, %v2182_v13, %v2192_v16  ;;  %v2195_v39 = vsel %vm2177_vm9, %v2185_v22, %v2194_v35  ;;  %v2219_v57 = vadd.f32 %v2192_v16, %v4763_v37 }
 0x379   :  { %v2275_v0 = vrot.slane %v2274_v12, 2  ;;  %v2251_v31 = vsel %vm2250_vm15, %v2217_v28, -inf  ;;  %v2298_v18 = vsel %vm2297_vm0, %v2217_v28, -inf  ;;  %v2215_v46 = vadd.f32 %v2193_v23, %v4754_v63  ;;  %v2113_v14 = vpop.permute.xlu1 %2112 }
 0x37a   :  { %v2252_v29 = vmax.f32 %v2249_v10, %v2251_v31  ;;  %v2301_v48 = vmax.f32 %v2298_v18, %v2300_v38  ;;  %v2216_v30 = vadd.f32 %v2195_v39, %v4738_v32  ;;  %v2220_v21 = vadd.f32 %v2194_v35, %v4742_v2  ;;  %v2111_v63 = vpop.permute.xlu0 %2110  ;;  %v5484_v35 = vld [vmem:[#allocation113_spill] sm:$0xff] }
 0x37b   :  { %v2276_v60 = vmax.f32 %v2274_v12, %v2275_v0  ;;  %v2232_v20 = vsel %vm2223_vm10, %v2215_v46, -inf  ;;  %v2279_v45 = vsel %vm2268_vm11, %v2215_v46, -inf  ;;  %v2280_v37 = vsel %vm2270_vm12, %v2219_v57, -inf }
 0x37c   :  { %v2253_v52 = vrot.slane %v2252_v29, 4  ;;  %v2302_v58 = vrot.slane %v2301_v48, 4  ;;  %v2240_v1 = vsel %vm2223_vm10, %v2216_v30, -inf  ;;  %v2281_v19 = vmax.f32 %v2279_v45, %v2280_v37 }
 0x37d   :  { %v2277_v10 = vrot.slane %v2276_v60, 1  ;;  %v2288_v32 = vsel %vm2268_vm11, %v2216_v30, -inf  ;;  %v2289_v2 = vsel %vm2270_vm12, %v2220_v21, -inf  ;;  %v2134_v33 = vsel %vm720_vm7, %v2113_v14, %v4787_v3 }
 0x37e   :  { %v2254_v8 = vmax.f32 %v2252_v29, %v2253_v52  ;;  %v2303_v7 = vmax.f32 %v2301_v48, %v2302_v58  ;;  %v2282_v4 = vrot.slane %v2281_v19, 4  ;;  %v2290_v27 = vmax.f32 %v2288_v32, %v2289_v2 }
 0x37f   :  { %v2278_v51 = vmax.f32 %v2276_v60, %v2277_v10  ;;  %v2155_v16 = vadd.f32 %v2134_v33, %v4835_v6  ;;  %v2132_v12 = vsel %vm720_vm7, %v5484_v35, %v2111_v63  ;;  %v2133_v28 = vsel %vm720_vm7, %v2111_v63, %v2113_v14 }
 0x380   :  { %v2255_v38 = vrot.slane %v2254_v8, 2  ;;  %v2304_v23 = vrot.slane %v2303_v7, 2  ;;  %v2283_v39 = vmax.f32 %v2281_v19, %v2282_v4  ;;  %v2291_v57 = vrot.slane %v2290_v27, 4 }
 0x381   :  { %v2308_v0 = vadd.f32 %v2278_v51, %v4797_v56  ;;  %v2184_v31 = vrot.slane %v2155_v16, 2  ;;  %v2153_v3 = vadd.f32 %v2132_v12, %v4838_v59  ;;  %v2154_v18 = vadd.f32 %v2133_v28, %v4841_v24 }
 0x382   :  { %v2256_v46 = vmax.f32 %v2254_v8, %v2255_v38  ;;  %v2305_v29 = vmax.f32 %v2303_v7, %v2304_v23  ;;  %v2284_v48 = vrot.slane %v2283_v39, 2  ;;  %v2292_v6 = vmax.f32 %v2290_v27, %v2291_v57 }
 0x383   :  { %v4908_v30 = vmax.f32 %v2308_v0, 0.0  ;;  %v2186_v21 = vsel %vm2177_vm9, %v2184_v31, %v2185_v22  ;;  %v2178_v14 = vrot.slane %v2153_v3, 2  ;;  %v2181_v60 = vrot.slane %v2154_v18, 2 }
 0x384   :  { %v2257_v45 = vrot.slane %v2256_v46, 1  ;;  %v2306_v37 = vrot.slane %v2305_v29, 1  ;;  %v2285_v52 = vmax.f32 %v2283_v39, %v2284_v48  ;;  %v2293_v58 = vrot.slane %v2292_v6, 2 }
 0x385   :  { %v2212_v59 = vadd.f32 %v2186_v21, %v4735_v34  ;;  %v2180_v24 = vsel %vm2177_vm9, %v2178_v14, %v2179_v9  ;;  %v2183_v19 = vsel %vm2177_vm9, %v2181_v60, %v2182_v13  ;;  %v2373_v41 = vmul.f32 %v2322_v47, %v4908_v30 }
 0x386   :  { %v2258_v22 = vmax.f32 %v2256_v46, %v2257_v45  ;;  %v2307_v63 = vmax.f32 %v2305_v29, %v2306_v37  ;;  %v2286_v10 = vrot.slane %v2285_v52, 1  ;;  %v2294_v32 = vmax.f32 %v2292_v6, %v2293_v58 }
 0x387   :  { %v2241_v2 = vmax.f32 %v2212_v59, %v2240_v1  ;;  %v2210_v33 = vadd.f32 %v2180_v24, %v4723_v25  ;;  %v2211_v34 = vadd.f32 %v2183_v19, %v4732_v44  ;;  %v2377_v55 = vsel %vm2334_vm1, %v2373_v41, -inf }
 0x388   :  { %v2311_v9 = vadd.f32 %v2307_v63, %v4797_v56  ;;  %v2287_v11 = vmax.f32 %v2285_v52, %v2286_v10  ;;  %v2295_v8 = vrot.slane %v2294_v32, 1  ;;  %v2263_v13 = vadd.f32 %v4797_v56, %v2258_v22 }
 0x389   :  { %v2242_v7 = vrot.slane %v2241_v2, 4  ;;  %v2225_v4 = vmax.f32 %v2210_v33, %v4863_v42  ;;  %v2233_v27 = vmax.f32 %v2211_v34, %v2232_v20  ;;  %v2390_v1 = vmul.f32 %v2347_v26, %v4908_v30 }
 0x38a   :  { %v4932_v51 = vmax.f32 %v2311_v9, 0.0  ;;  %v2296_v25 = vmax.f32 %v2294_v32, %v2295_v8  ;;  %v2309_v44 = vadd.f32 %v2287_v11, %v4797_v56  ;;  %v2267_v16 = vmax.f32 %v2263_v13, 0.0 }
 0x38b   :  { %v2243_v35 = vmax.f32 %v2241_v2, %v2242_v7  ;;  %v2226_v12 = vrot.slane %v2225_v4, 4  ;;  %v2234_v28 = vrot.slane %v2233_v27, 4  ;;  %v2394_v38 = vsel %vm2334_vm1, %v2390_v1, -inf }
 0x38c   :  { %v2310_v23 = vadd.f32 %v2296_v25, %v4797_v56  ;;  %v4937_v39 = vmax.f32 %v2309_v44, 0.0  ;;  %v2376_v42 = vmul.f32 %v2325_v53, %v4932_v51  ;;  %v2358_v20 = vmul.f32 %v2350_v62, %v2267_v16 }
 0x38d   :  { %v2244_v57 = vrot.slane %v2243_v35, 2  ;;  %v2227_v0 = vmax.f32 %v2225_v4, %v2226_v12  ;;  %v2235_v31 = vmax.f32 %v2233_v27, %v2234_v28  ;;  %v2333_v3 = vmul.f32 %v2325_v53, %v2267_v16 }
 0x38e   :  { %v4946_v18 = vmax.f32 %v2310_v23, 0.0  ;;  %v2374_v46 = vmul.f32 %v2323_v36, %v4937_v39  ;;  %v2380_v29 = vsel %vm2338_vm2, %v2376_v42, -inf  ;;  %v4953_v48 = vsel %vm2338_vm2, %v2358_v20, -inf }
 0x38f   :  { %v2245_v6 = vmax.f32 %v2243_v35, %v2244_v57  ;;  %v2228_v21 = vrot.slane %v2227_v0, 2  ;;  %v2236_v14 = vrot.slane %v2235_v31, 2  ;;  %v4956_v60 = vsel %vm2338_vm2, %v2333_v3, -inf }
 0x390   :  { %v2375_v53 = vmul.f32 %v2324_v43, %v4946_v18  ;;  %v2378_v45 = vsel %vm2334_vm1, %v2374_v46, -inf  ;;  %v2391_v37 = vmul.f32 %v2348_v15, %v4937_v39  ;;  %v2392_v52 = vmul.f32 %v2349_v54, %v4946_v18 }
 0x391   :  { %v2246_v58 = vrot.slane %v2245_v6, 1  ;;  %v2229_v59 = vmax.f32 %v2227_v0, %v2228_v21  ;;  %v2237_v24 = vmax.f32 %v2235_v31, %v2236_v14  ;;  %v2381_v19 = vmax.f32 %v2377_v55, %v2378_v45 }
 0x392   :  { %v2379_v41 = vsel %vm2334_vm1, %v2375_v53, -inf  ;;  %v2393_v22 = vmul.f32 %v2350_v62, %v4932_v51  ;;  %v2395_v63 = vsel %vm2334_vm1, %v2391_v37, -inf  ;;  %v2396_v10 = vsel %vm2334_vm1, %v2392_v52, -inf }
 0x393   :  { %v2247_v32 = vmax.f32 %v2245_v6, %v2246_v58  ;;  %v2230_v2 = vrot.slane %v2229_v59, 1  ;;  %v2238_v33 = vrot.slane %v2237_v24, 1  ;;  %v2382_v34 = vmax.f32 %v2379_v41, %v2380_v29 }
 0x394   :  { %v2397_v9 = vsel %vm2338_vm2, %v2393_v22, -inf  ;;  %v2398_v11 = vmax.f32 %v2394_v38, %v2395_v63  ;;  %v2435_v8 = vperm.slane %v4854_v17, 7  ;;  %v2408_v55 = vperm.slane %v4829_v50, 6 }
 0x395   :  { %v2231_v13 = vmax.f32 %v2229_v59, %v2230_v2  ;;  %v2239_v7 = vmax.f32 %v2237_v24, %v2238_v33  ;;  %v2383_v4 = vmax.f32 %v2381_v19, %v2382_v34  ;;  %v2262_v62 = vadd.f32 %v4797_v56, %v2247_v32 }
 0x396   :  { %v2399_v27 = vmax.f32 %v2396_v10, %v2397_v9  ;;  %v2443_v1 = vmul.f32 %v2435_v8, %v2267_v16  ;;  %v2409_v25 = vperm.slane %v4854_v17, 2  ;;  %v2410_v44 = vperm.slane %v4854_v17, 6  ;;  %v2318_v17 = vld [vmem:[%s5059_s4] sm:$0xff]  ;;  %s2619_s4 = smov [#allocation6]  }
 0x397   :  { %2384 = vmax.xlane.f32.xlu2 %v2383_v4  ;;  %v2260_v35 = vadd.f32 %v4797_v56, %v2231_v13  ;;  %v2261_v12 = vadd.f32 %v4797_v56, %v2239_v7  ;;  %v2266_v28 = vmax.f32 %v2262_v62, 0.0  ;;  %v2457_v38 = vmul.f32 %v2407_v5, %v4908_v30 }
 0x398   :  { %v2400_v23 = vmax.f32 %v2398_v11, %v2399_v27  ;;  %v2447_v42 = vsel %vm2338_vm2, %v2443_v1, -inf  ;;  %v2418_v20 = vmul.f32 %v2410_v44, %v2267_v16  ;;  %v2458_v57 = vmul.f32 %v2408_v55, %v4937_v39 }
 0x399   :  { %v2264_v0 = vmax.f32 %v2260_v35, 0.0  ;;  %v2265_v31 = vmax.f32 %v2261_v12, 0.0  ;;  %v2357_v3 = vmul.f32 %v2349_v54, %v2266_v28  ;;  %v2332_v46 = vmul.f32 %v2324_v43, %v2266_v28 }
 0x39a   :  { %v2442_v56 = vmul.f32 %v2434_v49, %v2266_v28  ;;  %v2417_v29 = vmul.f32 %v2409_v25, %v2266_v28  ;;  %v2422_v6 = vsel %vm2338_vm2, %v2418_v20, -inf  ;;  %v2459_v21 = vmul.f32 %v2409_v25, %v4946_v18 }
 0x39b   :  { %v2355_v16 = vmul.f32 %v2347_v26, %v2264_v0  ;;  %v2356_v14 = vmul.f32 %v2348_v15, %v2265_v31  ;;  %v2361_v53 = vsel %vm2334_vm1, %v2357_v3, -inf  ;;  %v2330_v54 = vmul.f32 %v2322_v47, %v2264_v0 }
 0x39c   :  { %v2364_v43 = vmax.f32 %v2361_v53, %v4953_v48  ;;  %v2331_v45 = vmul.f32 %v2323_v36, %v2265_v31  ;;  %v2337_v37 = vsel %vm2334_vm1, %v2332_v46, -inf  ;;  %v2440_v52 = vmul.f32 %v2432_v40, %v2264_v0 }
 0x39d   :  { %v2359_v26 = vsel %vm2334_vm1, %v2355_v16, -inf  ;;  %v2360_v58 = vsel %vm2334_vm1, %v2356_v14, -inf  ;;  %v2335_v15 = vsel %vm2334_vm1, %v2330_v54, -inf  ;;  %v2341_v59 = vmax.f32 %v2337_v37, %v4956_v60 }
 0x39e   :  { %v2363_v24 = vmax.f32 %v2359_v26, %v2360_v58  ;;  %v2336_v47 = vsel %vm2334_vm1, %v2331_v45, -inf  ;;  %v2441_v48 = vmul.f32 %v2433_v61, %v2265_v31  ;;  %v2444_v36 = vsel %vm2334_vm1, %v2440_v52, -inf }
 0x39f   :  { %v2340_v19 = vmax.f32 %v2335_v15, %v2336_v47  ;;  %2401 = vmax.xlane.f32.xlu2 %v2400_v23  ;;  %v2446_v41 = vsel %vm2334_vm1, %v2442_v56, -inf  ;;  %v2415_v22 = vmul.f32 %v2407_v5, %v2264_v0  ;;  %v2416_v63 = vmul.f32 %v2408_v55, %v2265_v31 }
 0x3a0   :  { %v2365_v10 = vmax.f32 %v2363_v24, %v2364_v43  ;;  %v2445_v32 = vsel %vm2334_vm1, %v2441_v48, -inf  ;;  %v2449_v60 = vmax.f32 %v2446_v41, %v2447_v42  ;;  %v2421_v2 = vsel %vm2334_vm1, %v2417_v29, -inf }
 0x3a1   :  { %v2342_v33 = vmax.f32 %v2340_v19, %v2341_v59  ;;  %v2448_v34 = vmax.f32 %v2444_v36, %v2445_v32  ;;  %v2419_v9 = vsel %vm2334_vm1, %v2415_v22, -inf  ;;  %v2420_v11 = vsel %vm2334_vm1, %v2416_v63, -inf }
 0x3a2   :  { %2366 = vmax.xlane.f32.xlu1 %v2365_v10  ;;  %v2423_v13 = vmax.f32 %v2419_v9, %v2420_v11  ;;  %v2424_v7 = vmax.f32 %v2421_v2, %v2422_v6  ;;  %v2460_v4 = vmul.f32 %v2410_v44, %v4932_v51  ;;  %v2461_v5 = vsel %vm2334_vm1, %v2457_v38, -inf }
 0x3a3   :  { %2343 = vmax.xlane.f32.xlu0 %v2342_v33  ;;  %v2450_v55 = vmax.f32 %v2448_v34, %v2449_v60  ;;  %v2462_v62 = vsel %vm2334_vm1, %v2458_v57, -inf  ;;  %v2463_v27 = vsel %vm2334_vm1, %v2459_v21, -inf  ;;  %v2474_v1 = vmul.f32 %v2432_v40, %v4908_v30 }
 0x3a4   :  { %v2425_v25 = vmax.f32 %v2423_v13, %v2424_v7  ;;  %v2464_v35 = vsel %vm2338_vm2, %v2460_v4, -inf  ;;  %v2465_v12 = vmax.f32 %v2461_v5, %v2462_v62  ;;  %v2475_v44 = vmul.f32 %v2433_v61, %v4937_v39 }
 0x3a5   :  { %v2466_v28 = vmax.f32 %v2463_v27, %v2464_v35  ;;  %v2476_v38 = vmul.f32 %v2434_v49, %v4946_v18  ;;  %v2477_v23 = vmul.f32 %v2435_v8, %v4932_v51  ;;  %v2478_v42 = vsel %vm2334_vm1, %v2474_v1, -inf  ;;  %v2319_v8 = vld [vmem:[%s5060_s5] sm:$0x1]  ;;  %s2498_s5 = sshll.u32 %s2619_s4, 4  ;;  %s2499_s5 = int_to_ptr.vmem [resolvable:$true] %s2498_s5 }
 0x3a6   :  { %v2479_v40 = vsel %vm2334_vm1, %v2475_v44, -inf  ;;  %v2369_v51 = vrot.slane %v2318_v17, 1  ;;  %v2386_v31 = vrot.slane %v2318_v17, 2  ;;  %v2403_v6 = vrot.slane %v2318_v17, 3 }
 0x3a7   :  { %v2467_v30 = vmax.f32 %v2465_v12, %v2466_v28  ;;  %v2480_v20 = vsel %vm2334_vm1, %v2476_v38, -inf  ;;  %v2481_v57 = vsel %vm2338_vm2, %v2477_v23, -inf  ;;  %v2482_v50 = vmax.f32 %v2478_v42, %v2479_v40 }
 0x3a8   :  { %v2483_v61 = vmax.f32 %v2480_v20, %v2481_v57  ;;  %v2428_v14 = vrot.slane %v2318_v17, 4  ;;  %v2453_v43 = vrot.slane %v2318_v17, 5  ;;  %v2470_v59 = vrot.slane %v2318_v17, 6 }
 0x3a9   :  { %2468 = vmax.xlane.f32.xlu2 %v2467_v30  ;;  %v2487_v48 = vrot.slane %v2318_v17, 7 }
 0x3aa   :  { %2451 = vmax.xlane.f32.xlu1 %v2450_v55  ;;  %v2484_v39 = vmax.f32 %v2482_v50, %v2483_v61 }
 0x3ab   :  { %2426 = vmax.xlane.f32.xlu0 %v2425_v25 }
 0x3b3   :  { %2485 = vmax.xlane.f32.xlu0 %v2484_v39 }
 0x40a   :  { %v2385_v49 = vpop.xlane.xlu2 %2384 }
 0x40b   :  { %v2388_v21 = vmul.f32 %v2386_v31, %v2385_v49 }
 0x412   :  { %v2402_v46 = vpop.xlane.xlu2 %2401 }
 0x413   :  { %v2405_v54 = vmul.f32 %v2403_v6, %v2402_v46 }
 0x415   :  { %v2367_v18 = vpop.xlane.xlu1 %2366 }
 0x416   :  { %v2344_v0 = vpop.xlane.xlu0 %2343  ;;  %v2371_v56 = vmul.f32 %v2369_v51, %v2367_v18 }
 0x417   :  { %v2345_v3 = vmul.f32 %v2344_v0, %v2318_v17 }
 0x419   :  { %v2346_v29 = vadd.f32 %v2345_v3, %v2319_v8 }
 0x41b   :  { %v2372_v16 = vadd.f32 %v2371_v56, %v2346_v29 }
 0x41c   :  { %v2469_v24 = vpop.xlane.xlu2 %2468 }
 0x41d   :  { %v2389_v53 = vadd.f32 %v2388_v21, %v2372_v16  ;;  %v2452_v45 = vpop.xlane.xlu1 %2451  ;;  %v2472_v36 = vmul.f32 %v2470_v59, %v2469_v24 }
 0x41e   :  { %v2427_v37 = vpop.xlane.xlu0 %2426  ;;  %v2455_v58 = vmul.f32 %v2453_v43, %v2452_v45 }
 0x41f   :  { %v2406_v52 = vadd.f32 %v2405_v54, %v2389_v53  ;;  %v2430_v26 = vmul.f32 %v2428_v14, %v2427_v37 }
 0x421   :  { %v2431_v15 = vadd.f32 %v2430_v26, %v2406_v52 }
 0x423   :  { %v2456_v47 = vadd.f32 %v2455_v58, %v2431_v15 }
 0x425   :  { %v2473_v41 = vadd.f32 %v2472_v36, %v2456_v47 }
 0x426   :  { %v2486_v19 = vpop.xlane.xlu0 %2485 }
 0x427   :  { %v2489_v22 = vmul.f32 %v2487_v48, %v2486_v19 }
 0x429   :  { %v2490_v63 = vadd.f32 %v2489_v22, %v2473_v41 }
 0x42b   :  { %2492 = vst.msk [vmem:[#allocation6] sm:$0x1] %vm2491_vm3, %v2490_v63 }
 0x42c   :  { %2503 = dma.vmem_to_hbm [thread:$0]  %s2499_s5, 16, %s2501_s18, [#allocation4]  }
 0x42d   :  { %2608 = dma.done.wait [#allocation4], 16  }
 0x42e   :  { %2609 = vsyncadd [#allocation4], 4294967280 }
 0x42f   :  { %2508 = vsyncpa [#allocation4], 1 }
 0x430   :  { %2509 = vsyncpa [#allocation5], 1 }

</bundles_post_ra>
